<compile_context>
chip_gen: v7x
topology: tpu7x:2x2x1
jax: 0.10.0
libtpu: 0.0.40
codegen_flags: <defaults>
</compile_context>

<pallas_src>
import functools

import jax
import jax.numpy as jnp
from jax.experimental import pallas as pl
from jax.experimental.pallas import tpu as pltpu

BN_EPS = 1e-5
C_OUT = 128
# (kernel_size, stride) of the three Conv1d layers -- static Python config.
LAYER_KS = ((7, 5), (7, 5), (5, 3))


def _round_up(n, m):
    return ((n + m - 1) // m) * m


# ------------------------------- fused kernel --------------------------------

def _fused_kernel(p1_ref, w1_ref, w2_ref, w3_ref, bn_ref, o_ref,
                  y1_ref, d2_ref, y2_ref, d3_ref,
                  *, B, L1, L2, L3, RB1, RB2):
    (K2, S2), (K3, S3) = LAYER_KS[1], LAYER_KS[2]
    f32 = jnp.float32
    Ld2 = S2 * (L2 - 1) + 1            # dense (stride-1) length, layer 2
    Ld3 = S3 * (L3 - 1) + 1            # dense (stride-1) length, layer 3
    M2 = (B - 1) * RB1 + Ld2           # batch-merged dense rows, layer 2
    M3 = (B - 1) * RB2 + Ld3           # batch-merged dense rows, layer 3

    def bn_relu(blocks, n_real, gamma, beta):
        # One-pass training-mode batch statistics over a list of (rows, 128) blocks.
        s1 = sum(jnp.sum(r, axis=0, keepdims=True) for r in blocks)
        s2 = sum(jnp.sum(r * r, axis=0, keepdims=True) for r in blocks)
        mean = s1 * (1.0 / n_real)
        # Clamp: E[x^2]-E[x]^2 can cancel slightly negative for large-mean channels.
        var = jnp.maximum(s2 * (1.0 / n_real) - mean * mean, 0.0)
        scale = gamma * jax.lax.rsqrt(var + BN_EPS)
        shift = beta - mean * scale
        return [jnp.maximum(r * scale + shift, 0.0) for r in blocks]

    # ---- layer 1: single matmul over zero-padded im2col patches + BN + ReLU ----
    # Pad rows/cols of p1 are zero and conv bias is dropped (cancels under training-
    # mode BN), so pad rows of acc1 are exactly 0 and the one-pass sums just divide
    # by the real row count B*L1.
    acc1 = jnp.dot(p1_ref[...], w1_ref[...], preferred_element_type=f32)  # (B*RB1, C)
    (y1,) = bn_relu([acc1], B * L1, bn_ref[0:1, :], bn_ref[1:2, :])
    y1_ref[...] = y1     # pad rows (>= L1 per batch block) hold garbage, never selected

    # ---- layer 2: batch-merged K-tap dense conv (K2 MXU pushes, M = M2) ----------
    acc2 = jnp.dot(y1_ref[0:M2, :], w2_ref[0], preferred_element_type=f32)
    for k in range(1, K2):
        acc2 = acc2 + jnp.dot(y1_ref[k:k + M2, :], w2_ref[k],
                              preferred_element_type=f32)
    d2_ref[0:M2, :] = acc2
    # Stride selection via strided sublane reads (bases b*RB1 are multiples of 8).
    # Selected rows b*RB1 + t*S2 (t < L2) only ever touch real rows of batch b;
    # inter-batch gap rows of the dense result are never selected.
    sel2 = [d2_ref[pl.ds(b * RB1, L2, stride=S2), :] for b in range(B)]
    y2_act = bn_relu(sel2, B * L2, bn_ref[2:3, :], bn_ref[3:4, :])
    y2_ref[...] = jnp.zeros_like(y2_ref)          # zero pad rows between batch blocks
    for b in range(B):
        y2_ref[b * RB2:b * RB2 + L2, :] = y2_act[b]

    # ---- layer 3 (same scheme) + global average pool ------------------------------
    acc3 = jnp.dot(y2_ref[0:M3, :], w3_ref[0], preferred_element_type=f32)
    for k in range(1, K3):
        acc3 = acc3 + jnp.dot(y2_ref[k:k + M3, :], w3_ref[k],
                              preferred_element_type=f32)
    d3_ref[0:M3, :] = acc3
    sel3 = [d3_ref[pl.ds(b * RB2, L3, stride=S3), :] for b in range(B)]
    y3_act = bn_relu(sel3, B * L3, bn_ref[4:5, :], bn_ref[5:6, :])
    o_ref[...] = jnp.concatenate(
        [jnp.mean(y, axis=0, keepdims=True) for y in y3_act], axis=0)


# ------------------------------- JAX wrappers ----------------------------------

def prepare_params(params, in_channels):
    """One-time re-layout of weights into kernel format (hoisted out of forward)."""
    (K1, _), _, _ = LAYER_KS
    CK1 = in_channels * K1
    CK1p = _round_up(CK1, 8)
    w1 = params["conv1"][0]                                            # (128, C_in, K1)
    w1m = jnp.pad(jnp.transpose(w1, (2, 1, 0)).reshape(CK1, C_OUT),
                  ((0, CK1p - CK1), (0, 0)))                           # (CK1p, 128)
    w2t = jnp.transpose(params["conv2"][0], (2, 1, 0))                 # (K2, 128, 128)
    w3t = jnp.transpose(params["conv3"][0], (2, 1, 0))                 # (K3, 128, 128)
    bn = jnp.stack([params["bn1"][0], params["bn1"][1],
                    params["bn2"][0], params["bn2"][1],
                    params["bn3"][0], params["bn3"][1]], axis=0)        # (6, 128)
    return {"w1m": w1m, "w2t": w2t, "w3t": w3t, "bn": bn}


@jax.jit
def spectral_adapter_forward(kparams, x):
    """x: (B, in_channels, L) f32 -> (B, 128, 1) f32 (training-mode BatchNorm)."""
    B, C_in, L = x.shape
    (K1, S1), (K2, S2), (K3, S3) = LAYER_KS
    L1 = (L - K1) // S1 + 1
    L2 = (L1 - K2) // S2 + 1
    L3 = (L2 - K3) // S3 + 1
    RB1 = _round_up(L1, 8)             # per-batch row block of the y1 scratch
    RB2 = _round_up(L2, 8)             # per-batch row block of the y2 scratch
    CK1 = C_in * K1
    CK1p = kparams["w1m"].shape[0]
    Ld2 = S2 * (L2 - 1) + 1
    Ld3 = S3 * (L3 - 1) + 1
    M2 = (B - 1) * RB1 + Ld2
    M3 = (B - 1) * RB2 + Ld3
    # Static invariants the "gap rows never selected" scheme relies on.
    assert (L2 - 1) * S2 + K2 <= L1 and (L3 - 1) * S3 + K3 <= L2
    assert K2 - 1 + M2 <= B * RB1 and K3 - 1 + M3 <= B * RB2

    # Tiny layer-1 im2col (data-dependent, stays per-call), channels-last,
    # (tap, channel) order, zero-padded rows/cols.
    xt = jnp.transpose(x, (0, 2, 1))                                   # (B, L, C_in)
    taps = jnp.arange(L1)[:, None] * S1 + jnp.arange(K1)[None, :]      # static indices
    p1 = xt[:, taps, :].reshape(B, L1, CK1)
    p1 = jnp.pad(p1, ((0, 0), (0, RB1 - L1), (0, CK1p - CK1)))
    p1 = p1.reshape(B * RB1, CK1p)

    kernel = functools.partial(_fused_kernel, B=B, L1=L1, L2=L2, L3=L3,
                               RB1=RB1, RB2=RB2)
    vmem = pl.BlockSpec(memory_space=pltpu.MemorySpace.VMEM)

    flops = 2 * (B * RB1 * CK1p * C_OUT
                 + K2 * M2 * C_OUT * C_OUT
                 + K3 * M3 * C_OUT * C_OUT)
    bytes_accessed = 4 * (p1.size + kparams["w1m"].size + kparams["w2t"].size
                          + kparams["w3t"].size + kparams["bn"].size + B * C_OUT)

    out = pl.pallas_call(
        kernel,
        out_shape=jax.ShapeDtypeStruct((B, C_OUT), jnp.float32),
        in_specs=[vmem] * 5,
        out_specs=vmem,
        scratch_shapes=[pltpu.VMEM((B * RB1, C_OUT), jnp.float32),          # y1
                        pltpu.VMEM((_round_up(M2, 8), C_OUT), jnp.float32),  # dense l2
                        pltpu.VMEM((B * RB2, C_OUT), jnp.float32),           # y2
                        pltpu.VMEM((_round_up(M3, 8), C_OUT), jnp.float32)], # dense l3
        cost_estimate=pl.CostEstimate(flops=flops, transcendentals=3 * C_OUT,
                                      bytes_accessed=bytes_accessed),
    )(p1, kparams["w1m"], kparams["w2t"], kparams["w3t"], kparams["bn"])
    return out[:, :, None]                                             # (B, 128, 1)


# ------------------------------- params / reference ---------------------------

def init_params(key, in_channels):
    """PyTorch-style Conv1d init; BN gamma/beta randomized to exercise the affine."""
    def conv_init(k, c_out, c_in, ksz):
        k1, k2 = jax.random.split(k)
        bound = 1.0 / jnp.sqrt(c_in * ksz)
        w = jax.random.uniform(k1, (c_out, c_in, ksz), jnp.float32, -bound, bound)
        b = jax.random.uniform(k2, (c_out,), jnp.float32, -bound, bound)
        return w, b

    def bn_init(k):
        k1, k2 = jax.random.split(k)
        g = jax.random.uniform(k1, (C_OUT,), jnp.float32, 0.5, 1.5)
        be = jax.random.uniform(k2, (C_OUT,), jnp.float32, -0.5, 0.5)
        return g, be

    (K1, _), (K2, _), (K3, _) = LAYER_KS
    k1, k2, k3, k4, k5, k6 = jax.random.split(key, 6)
    return {
        "conv1": conv_init(k1, C_OUT, in_channels, K1), "bn1": bn_init(k4),
        "conv2": conv_init(k2, C_OUT, C_OUT, K2),        "bn2": bn_init(k5),
        "conv3": conv_init(k3, C_OUT, C_OUT, K3),        "bn3": bn_init(k6),
    }


def _reference_forward(params, x):
    """Pure-JAX reference matching the PyTorch module in training mode (batch-stat BN)."""
    for li, (_, s) in zip((1, 2, 3), LAYER_KS):
        w, b = params[f"conv{li}"]
        g, be = params[f"bn{li}"]
        y = jax.lax.conv_general_dilated(
            x, w, window_strides=(s,), padding="VALID",
            dimension_numbers=("NCH", "OIH", "NCH"))
        y = y + b[None, :, None]
        mean = jnp.mean(y, axis=(0, 2), keepdims=True)
        var = jnp.mean((y - mean) ** 2, axis=(0, 2), keepdims=True)
        y = (y - mean) * jax.lax.rsqrt(var + BN_EPS)
        y = y * g[None, :, None] + be[None, :, None]
        x = jnp.maximum(y, 0.0)
    return jnp.mean(x, axis=2, keepdims=True)


# ----------------------------------- main --------------------------------------

if __name__ == "__main__":
    key = jax.random.PRNGKey(0)
    k_param, k_x = jax.random.split(key)

    B, C_in, L = 2, 4, 512          # L=512 -> L1=102 -> L2=20 -> L3=6
    params = init_params(k_param, C_in)
    kparams = prepare_params(params, C_in)      # one-time kernel-format re-layout
    x = jax.random.normal(k_x, (B, C_in, L), jnp.float32)

    out = jax.block_until_ready(spectral_adapter_forward(kparams, x))
    assert out.shape == (B, 128, 1), out.shape

    ref = _reference_forward(params, x)
    err = float(jnp.max(jnp.abs(out - ref)))
    assert jnp.allclose(out, ref, atol=1e-2, rtol=1e-2), err

    print("KERNEL_OK")
</pallas_src>

<mosaic_0001>
module attributes {stable_mosaic.version = 11 : i64} {
  func.func @_fused_kernel(%arg0: memref<208x32xf32, #tpu.memory_space<vmem>>, %arg1: memref<32x128xf32, #tpu.memory_space<vmem>>, %arg2: memref<7x128x128xf32, #tpu.memory_space<vmem>>, %arg3: memref<5x128x128xf32, #tpu.memory_space<vmem>>, %arg4: memref<6x128xf32, #tpu.memory_space<vmem>>, %arg5: memref<2x128xf32, #tpu.memory_space<vmem>>, %arg6: memref<208x128xf32, #tpu.memory_space<vmem>>, %arg7: memref<200x128xf32, #tpu.memory_space<vmem>>, %arg8: memref<48x128xf32, #tpu.memory_space<vmem>>, %arg9: memref<40x128xf32, #tpu.memory_space<vmem>>) attributes {dimension_semantics = [], scalar_prefetch = 0 : i64, scratch_operands = 4 : i64, tpu.core_type = #tpu.core_type<tc>} {
    %c0 = arith.constant 0 : index
    %c0_0 = arith.constant 0 : index
    %0 = vector.load %arg0[%c0, %c0_0] : memref<208x32xf32, #tpu.memory_space<vmem>>, vector<208x32xf32>
    %c0_1 = arith.constant 0 : index
    %c0_2 = arith.constant 0 : index
    %1 = vector.load %arg1[%c0_1, %c0_2] : memref<32x128xf32, #tpu.memory_space<vmem>>, vector<32x128xf32>
    %cst = arith.constant dense<0.000000e+00> : vector<208x128xf32>
    %2 = tpu.matmul %0, %1, %cst {dimension_numbers = #tpu.dot_dimension_numbers<[1], [0], [0], [1], [0, 0, 1, 1], [], []>} : vector<208x32xf32>, vector<32x128xf32>, vector<208x128xf32> -> vector<208x128xf32>
    %c0_3 = arith.constant 0 : index
    %c0_4 = arith.constant 0 : index
    %3 = vector.load %arg4[%c0_3, %c0_4] : memref<6x128xf32, #tpu.memory_space<vmem>>, vector<1x128xf32>
    %c1 = arith.constant 1 : index
    %c0_5 = arith.constant 0 : index
    %4 = vector.load %arg4[%c1, %c0_5] : memref<6x128xf32, #tpu.memory_space<vmem>>, vector<1x128xf32>
    %cst_6 = arith.constant dense<0.000000e+00> : vector<128xf32>
    %5 = vector.multi_reduction <add>, %2, %cst_6 [0] : vector<208x128xf32> to vector<128xf32>
    %6 = vector.shape_cast %5 : vector<128xf32> to vector<1x128xf32>
    %cst_7 = arith.constant 0.000000e+00 : f32
    %7 = vector.broadcast %cst_7 : f32 to vector<1x128xf32>
    %8 = arith.addf %7, %6 : vector<1x128xf32>
    %9 = arith.mulf %2, %2 : vector<208x128xf32>
    %cst_8 = arith.constant dense<0.000000e+00> : vector<128xf32>
    %10 = vector.multi_reduction <add>, %9, %cst_8 [0] : vector<208x128xf32> to vector<128xf32>
    %11 = vector.shape_cast %10 : vector<128xf32> to vector<1x128xf32>
    %cst_9 = arith.constant 0.000000e+00 : f32
    %12 = vector.broadcast %cst_9 : f32 to vector<1x128xf32>
    %13 = arith.addf %12, %11 : vector<1x128xf32>
    %cst_10 = arith.constant 0.00490196096 : f32
    %14 = vector.broadcast %cst_10 : f32 to vector<1x128xf32>
    %15 = arith.mulf %8, %14 : vector<1x128xf32>
    %cst_11 = arith.constant 0.00490196096 : f32
    %16 = vector.broadcast %cst_11 : f32 to vector<1x128xf32>
    %17 = arith.mulf %13, %16 : vector<1x128xf32>
    %18 = arith.mulf %15, %15 : vector<1x128xf32>
    %19 = arith.subf %17, %18 : vector<1x128xf32>
    %cst_12 = arith.constant 0.000000e+00 : f32
    %20 = vector.broadcast %cst_12 : f32 to vector<1x128xf32>
    %21 = arith.maximumf %19, %20 : vector<1x128xf32>
    %cst_13 = arith.constant 9.99999974E-6 : f32
    %22 = vector.broadcast %cst_13 : f32 to vector<1x128xf32>
    %23 = arith.addf %21, %22 : vector<1x128xf32>
    %24 = math.rsqrt %23 : vector<1x128xf32>
    %25 = arith.mulf %3, %24 : vector<1x128xf32>
    %26 = arith.mulf %15, %25 : vector<1x128xf32>
    %27 = arith.subf %4, %26 : vector<1x128xf32>
    %28 = vector.broadcast %25 : vector<1x128xf32> to vector<208x128xf32>
    %29 = arith.mulf %2, %28 : vector<208x128xf32>
    %30 = vector.broadcast %27 : vector<1x128xf32> to vector<208x128xf32>
    %31 = arith.addf %29, %30 : vector<208x128xf32>
    %cst_14 = arith.constant 0.000000e+00 : f32
    %32 = vector.broadcast %cst_14 : f32 to vector<208x128xf32>
    %33 = arith.maximumf %31, %32 : vector<208x128xf32>
    %c0_15 = arith.constant 0 : index
    %c0_16 = arith.constant 0 : index
    %34 = vector.load %arg6[%c0_15, %c0_16] : memref<208x128xf32, #tpu.memory_space<vmem>>, vector<208x128xf32>
    tpu.vector_store %arg6[%c0_15, %c0_16], %33 {strides = array<i32>} : memref<208x128xf32, #tpu.memory_space<vmem>>, vector<208x128xf32>,
    %c0_17 = arith.constant 0 : index
    %c0_18 = arith.constant 0 : index
    %35 = vector.load %arg6[%c0_17, %c0_18] : memref<208x128xf32, #tpu.memory_space<vmem>>, vector<200x128xf32>
    %c0_19 = arith.constant 0 : index
    %c0_20 = arith.constant 0 : index
    %c0_21 = arith.constant 0 : index
    %36 = vector.load %arg2[%c0_19, %c0_20, %c0_21] : memref<7x128x128xf32, #tpu.memory_space<vmem>>, vector<1x128x128xf32>
    %37 = vector.shape_cast %36 : vector<1x128x128xf32> to vector<128x128xf32>
    %cst_22 = arith.constant dense<0.000000e+00> : vector<200x128xf32>
    %38 = tpu.matmul %35, %37, %cst_22 {dimension_numbers = #tpu.dot_dimension_numbers<[1], [0], [0], [1], [0, 0, 1, 1], [], []>} : vector<200x128xf32>, vector<128x128xf32>, vector<200x128xf32> -> vector<200x128xf32>
    %c1_23 = arith.constant 1 : index
    %c0_24 = arith.constant 0 : index
    %39 = vector.load %arg6[%c1_23, %c0_24] : memref<208x128xf32, #tpu.memory_space<vmem>>, vector<200x128xf32>
    %c1_25 = arith.constant 1 : index
    %c0_26 = arith.constant 0 : index
    %c0_27 = arith.constant 0 : index
    %40 = vector.load %arg2[%c1_25, %c0_26, %c0_27] : memref<7x128x128xf32, #tpu.memory_space<vmem>>, vector<1x128x128xf32>
    %41 = vector.shape_cast %40 : vector<1x128x128xf32> to vector<128x128xf32>
    %cst_28 = arith.constant dense<0.000000e+00> : vector<200x128xf32>
    %42 = tpu.matmul %39, %41, %cst_28 {dimension_numbers = #tpu.dot_dimension_numbers<[1], [0], [0], [1], [0, 0, 1, 1], [], []>} : vector<200x128xf32>, vector<128x128xf32>, vector<200x128xf32> -> vector<200x128xf32>
    %43 = arith.addf %38, %42 : vector<200x128xf32>
    %c2 = arith.constant 2 : index
    %c0_29 = arith.constant 0 : index
    %44 = vector.load %arg6[%c2, %c0_29] : memref<208x128xf32, #tpu.memory_space<vmem>>, vector<200x128xf32>
    %c2_30 = arith.constant 2 : index
    %c0_31 = arith.constant 0 : index
    %c0_32 = arith.constant 0 : index
    %45 = vector.load %arg2[%c2_30, %c0_31, %c0_32] : memref<7x128x128xf32, #tpu.memory_space<vmem>>, vector<1x128x128xf32>
    %46 = vector.shape_cast %45 : vector<1x128x128xf32> to vector<128x128xf32>
    %cst_33 = arith.constant dense<0.000000e+00> : vector<200x128xf32>
    %47 = tpu.matmul %44, %46, %cst_33 {dimension_numbers = #tpu.dot_dimension_numbers<[1], [0], [0], [1], [0, 0, 1, 1], [], []>} : vector<200x128xf32>, vector<128x128xf32>, vector<200x128xf32> -> vector<200x128xf32>
    %48 = arith.addf %43, %47 : vector<200x128xf32>
    %c3 = arith.constant 3 : index
    %c0_34 = arith.constant 0 : index
    %49 = vector.load %arg6[%c3, %c0_34] : memref<208x128xf32, #tpu.memory_space<vmem>>, vector<200x128xf32>
    %c3_35 = arith.constant 3 : index
    %c0_36 = arith.constant 0 : index
    %c0_37 = arith.constant 0 : index
    %50 = vector.load %arg2[%c3_35, %c0_36, %c0_37] : memref<7x128x128xf32, #tpu.memory_space<vmem>>, vector<1x128x128xf32>
    %51 = vector.shape_cast %50 : vector<1x128x128xf32> to vector<128x128xf32>
    %cst_38 = arith.constant dense<0.000000e+00> : vector<200x128xf32>
    %52 = tpu.matmul %49, %51, %cst_38 {dimension_numbers = #tpu.dot_dimension_numbers<[1], [0], [0], [1], [0, 0, 1, 1], [], []>} : vector<200x128xf32>, vector<128x128xf32>, vector<200x128xf32> -> vector<200x128xf32>
    %53 = arith.addf %48, %52 : vector<200x128xf32>
    %c4 = arith.constant 4 : index
    %c0_39 = arith.constant 0 : index
    %54 = vector.load %arg6[%c4, %c0_39] : memref<208x128xf32, #tpu.memory_space<vmem>>, vector<200x128xf32>
    %c4_40 = arith.constant 4 : index
    %c0_41 = arith.constant 0 : index
    %c0_42 = arith.constant 0 : index
    %55 = vector.load %arg2[%c4_40, %c0_41, %c0_42] : memref<7x128x128xf32, #tpu.memory_space<vmem>>, vector<1x128x128xf32>
    %56 = vector.shape_cast %55 : vector<1x128x128xf32> to vector<128x128xf32>
    %cst_43 = arith.constant dense<0.000000e+00> : vector<200x128xf32>
    %57 = tpu.matmul %54, %56, %cst_43 {dimension_numbers = #tpu.dot_dimension_numbers<[1], [0], [0], [1], [0, 0, 1, 1], [], []>} : vector<200x128xf32>, vector<128x128xf32>, vector<200x128xf32> -> vector<200x128xf32>
    %58 = arith.addf %53, %57 : vector<200x128xf32>
    %c5 = arith.constant 5 : index
    %c0_44 = arith.constant 0 : index
    %59 = vector.load %arg6[%c5, %c0_44] : memref<208x128xf32, #tpu.memory_space<vmem>>, vector<200x128xf32>
    %c5_45 = arith.constant 5 : index
    %c0_46 = arith.constant 0 : index
    %c0_47 = arith.constant 0 : index
    %60 = vector.load %arg2[%c5_45, %c0_46, %c0_47] : memref<7x128x128xf32, #tpu.memory_space<vmem>>, vector<1x128x128xf32>
    %61 = vector.shape_cast %60 : vector<1x128x128xf32> to vector<128x128xf32>
    %cst_48 = arith.constant dense<0.000000e+00> : vector<200x128xf32>
    %62 = tpu.matmul %59, %61, %cst_48 {dimension_numbers = #tpu.dot_dimension_numbers<[1], [0], [0], [1], [0, 0, 1, 1], [], []>} : vector<200x128xf32>, vector<128x128xf32>, vector<200x128xf32> -> vector<200x128xf32>
    %63 = arith.addf %58, %62 : vector<200x128xf32>
    %c6 = arith.constant 6 : index
    %c0_49 = arith.constant 0 : index
    %64 = vector.load %arg6[%c6, %c0_49] : memref<208x128xf32, #tpu.memory_space<vmem>>, vector<200x128xf32>
    %c6_50 = arith.constant 6 : index
    %c0_51 = arith.constant 0 : index
    %c0_52 = arith.constant 0 : index
    %65 = vector.load %arg2[%c6_50, %c0_51, %c0_52] : memref<7x128x128xf32, #tpu.memory_space<vmem>>, vector<1x128x128xf32>
    %66 = vector.shape_cast %65 : vector<1x128x128xf32> to vector<128x128xf32>
    %cst_53 = arith.constant dense<0.000000e+00> : vector<200x128xf32>
    %67 = tpu.matmul %64, %66, %cst_53 {dimension_numbers = #tpu.dot_dimension_numbers<[1], [0], [0], [1], [0, 0, 1, 1], [], []>} : vector<200x128xf32>, vector<128x128xf32>, vector<200x128xf32> -> vector<200x128xf32>
    %68 = arith.addf %63, %67 : vector<200x128xf32>
    %c0_54 = arith.constant 0 : index
    %c0_55 = arith.constant 0 : index
    %69 = vector.load %arg7[%c0_54, %c0_55] : memref<200x128xf32, #tpu.memory_space<vmem>>, vector<200x128xf32>
    tpu.vector_store %arg7[%c0_54, %c0_55], %68 {strides = array<i32>} : memref<200x128xf32, #tpu.memory_space<vmem>>, vector<200x128xf32>,
    %c0_56 = arith.constant 0 : index
    %c0_57 = arith.constant 0 : index
    %70 = tpu.strided_load %arg7[%c0_56, %c0_57] {strides = array<i32: 5, 1>} : memref<200x128xf32, #tpu.memory_space<vmem>>, vector<20x128xf32>
    %c104 = arith.constant 104 : index
    %c0_58 = arith.constant 0 : index
    %71 = tpu.strided_load %arg7[%c104, %c0_58] {strides = array<i32: 5, 1>} : memref<200x128xf32, #tpu.memory_space<vmem>>, vector<20x128xf32>
    %c2_59 = arith.constant 2 : index
    %c0_60 = arith.constant 0 : index
    %72 = vector.load %arg4[%c2_59, %c0_60] : memref<6x128xf32, #tpu.memory_space<vmem>>, vector<1x128xf32>
    %c3_61 = arith.constant 3 : index
    %c0_62 = arith.constant 0 : index
    %73 = vector.load %arg4[%c3_61, %c0_62] : memref<6x128xf32, #tpu.memory_space<vmem>>, vector<1x128xf32>
    %cst_63 = arith.constant dense<0.000000e+00> : vector<128xf32>
    %74 = vector.multi_reduction <add>, %70, %cst_63 [0] : vector<20x128xf32> to vector<128xf32>
    %75 = vector.shape_cast %74 : vector<128xf32> to vector<1x128xf32>
    %cst_64 = arith.constant 0.000000e+00 : f32
    %76 = vector.broadcast %cst_64 : f32 to vector<1x128xf32>
    %77 = arith.addf %76, %75 : vector<1x128xf32>
    %cst_65 = arith.constant dense<0.000000e+00> : vector<128xf32>
    %78 = vector.multi_reduction <add>, %71, %cst_65 [0] : vector<20x128xf32> to vector<128xf32>
    %79 = vector.shape_cast %78 : vector<128xf32> to vector<1x128xf32>
    %80 = arith.addf %77, %79 : vector<1x128xf32>
    %81 = arith.mulf %70, %70 : vector<20x128xf32>
    %cst_66 = arith.constant dense<0.000000e+00> : vector<128xf32>
    %82 = vector.multi_reduction <add>, %81, %cst_66 [0] : vector<20x128xf32> to vector<128xf32>
    %83 = vector.shape_cast %82 : vector<128xf32> to vector<1x128xf32>
    %cst_67 = arith.constant 0.000000e+00 : f32
    %84 = vector.broadcast %cst_67 : f32 to vector<1x128xf32>
    %85 = arith.addf %84, %83 : vector<1x128xf32>
    %86 = arith.mulf %71, %71 : vector<20x128xf32>
    %cst_68 = arith.constant dense<0.000000e+00> : vector<128xf32>
    %87 = vector.multi_reduction <add>, %86, %cst_68 [0] : vector<20x128xf32> to vector<128xf32>
    %88 = vector.shape_cast %87 : vector<128xf32> to vector<1x128xf32>
    %89 = arith.addf %85, %88 : vector<1x128xf32>
    %cst_69 = arith.constant 2.500000e-02 : f32
    %90 = vector.broadcast %cst_69 : f32 to vector<1x128xf32>
    %91 = arith.mulf %80, %90 : vector<1x128xf32>
    %cst_70 = arith.constant 2.500000e-02 : f32
    %92 = vector.broadcast %cst_70 : f32 to vector<1x128xf32>
    %93 = arith.mulf %89, %92 : vector<1x128xf32>
    %94 = arith.mulf %91, %91 : vector<1x128xf32>
    %95 = arith.subf %93, %94 : vector<1x128xf32>
    %cst_71 = arith.constant 0.000000e+00 : f32
    %96 = vector.broadcast %cst_71 : f32 to vector<1x128xf32>
    %97 = arith.maximumf %95, %96 : vector<1x128xf32>
    %cst_72 = arith.constant 9.99999974E-6 : f32
    %98 = vector.broadcast %cst_72 : f32 to vector<1x128xf32>
    %99 = arith.addf %97, %98 : vector<1x128xf32>
    %100 = math.rsqrt %99 : vector<1x128xf32>
    %101 = arith.mulf %72, %100 : vector<1x128xf32>
    %102 = arith.mulf %91, %101 : vector<1x128xf32>
    %103 = arith.subf %73, %102 : vector<1x128xf32>
    %104 = vector.broadcast %101 : vector<1x128xf32> to vector<20x128xf32>
    %105 = arith.mulf %70, %104 : vector<20x128xf32>
    %106 = vector.broadcast %103 : vector<1x128xf32> to vector<20x128xf32>
    %107 = arith.addf %105, %106 : vector<20x128xf32>
    %cst_73 = arith.constant 0.000000e+00 : f32
    %108 = vector.broadcast %cst_73 : f32 to vector<20x128xf32>
    %109 = arith.maximumf %107, %108 : vector<20x128xf32>
    %110 = vector.broadcast %101 : vector<1x128xf32> to vector<20x128xf32>
    %111 = arith.mulf %71, %110 : vector<20x128xf32>
    %112 = vector.broadcast %103 : vector<1x128xf32> to vector<20x128xf32>
    %113 = arith.addf %111, %112 : vector<20x128xf32>
    %cst_74 = arith.constant 0.000000e+00 : f32
    %114 = vector.broadcast %cst_74 : f32 to vector<20x128xf32>
    %115 = arith.maximumf %113, %114 : vector<20x128xf32>
    %cst_75 = arith.constant 0.000000e+00 : f32
    %116 = vector.broadcast %cst_75 : f32 to vector<48x128xf32>
    %c0_76 = arith.constant 0 : index
    %c0_77 = arith.constant 0 : index
    %117 = vector.load %arg8[%c0_76, %c0_77] : memref<48x128xf32, #tpu.memory_space<vmem>>, vector<48x128xf32>
    tpu.vector_store %arg8[%c0_76, %c0_77], %116 {strides = array<i32>} : memref<48x128xf32, #tpu.memory_space<vmem>>, vector<48x128xf32>,
    %c0_78 = arith.constant 0 : index
    %c0_79 = arith.constant 0 : index
    %118 = vector.load %arg8[%c0_78, %c0_79] : memref<48x128xf32, #tpu.memory_space<vmem>>, vector<20x128xf32>
    tpu.vector_store %arg8[%c0_78, %c0_79], %109 {strides = array<i32>} : memref<48x128xf32, #tpu.memory_space<vmem>>, vector<20x128xf32>,
    %c24 = arith.constant 24 : index
    %c0_80 = arith.constant 0 : index
    %119 = vector.load %arg8[%c24, %c0_80] : memref<48x128xf32, #tpu.memory_space<vmem>>, vector<20x128xf32>
    tpu.vector_store %arg8[%c24, %c0_80], %115 {strides = array<i32>} : memref<48x128xf32, #tpu.memory_space<vmem>>, vector<20x128xf32>,
    %c0_81 = arith.constant 0 : index
    %c0_82 = arith.constant 0 : index
    %120 = vector.load %arg8[%c0_81, %c0_82] : memref<48x128xf32, #tpu.memory_space<vmem>>, vector<40x128xf32>
    %c0_83 = arith.constant 0 : index
    %c0_84 = arith.constant 0 : index
    %c0_85 = arith.constant 0 : index
    %121 = vector.load %arg3[%c0_83, %c0_84, %c0_85] : memref<5x128x128xf32, #tpu.memory_space<vmem>>, vector<1x128x128xf32>
    %122 = vector.shape_cast %121 : vector<1x128x128xf32> to vector<128x128xf32>
    %cst_86 = arith.constant dense<0.000000e+00> : vector<40x128xf32>
    %123 = tpu.matmul %120, %122, %cst_86 {dimension_numbers = #tpu.dot_dimension_numbers<[1], [0], [0], [1], [0, 0, 1, 1], [], []>} : vector<40x128xf32>, vector<128x128xf32>, vector<40x128xf32> -> vector<40x128xf32>
    %c1_87 = arith.constant 1 : index
    %c0_88 = arith.constant 0 : index
    %124 = vector.load %arg8[%c1_87, %c0_88] : memref<48x128xf32, #tpu.memory_space<vmem>>, vector<40x128xf32>
    %c1_89 = arith.constant 1 : index
    %c0_90 = arith.constant 0 : index
    %c0_91 = arith.constant 0 : index
    %125 = vector.load %arg3[%c1_89, %c0_90, %c0_91] : memref<5x128x128xf32, #tpu.memory_space<vmem>>, vector<1x128x128xf32>
    %126 = vector.shape_cast %125 : vector<1x128x128xf32> to vector<128x128xf32>
    %cst_92 = arith.constant dense<0.000000e+00> : vector<40x128xf32>
    %127 = tpu.matmul %124, %126, %cst_92 {dimension_numbers = #tpu.dot_dimension_numbers<[1], [0], [0], [1], [0, 0, 1, 1], [], []>} : vector<40x128xf32>, vector<128x128xf32>, vector<40x128xf32> -> vector<40x128xf32>
    %128 = arith.addf %123, %127 : vector<40x128xf32>
    %c2_93 = arith.constant 2 : index
    %c0_94 = arith.constant 0 : index
    %129 = vector.load %arg8[%c2_93, %c0_94] : memref<48x128xf32, #tpu.memory_space<vmem>>, vector<40x128xf32>
    %c2_95 = arith.constant 2 : index
    %c0_96 = arith.constant 0 : index
    %c0_97 = arith.constant 0 : index
    %130 = vector.load %arg3[%c2_95, %c0_96, %c0_97] : memref<5x128x128xf32, #tpu.memory_space<vmem>>, vector<1x128x128xf32>
    %131 = vector.shape_cast %130 : vector<1x128x128xf32> to vector<128x128xf32>
    %cst_98 = arith.constant dense<0.000000e+00> : vector<40x128xf32>
    %132 = tpu.matmul %129, %131, %cst_98 {dimension_numbers = #tpu.dot_dimension_numbers<[1], [0], [0], [1], [0, 0, 1, 1], [], []>} : vector<40x128xf32>, vector<128x128xf32>, vector<40x128xf32> -> vector<40x128xf32>
    %133 = arith.addf %128, %132 : vector<40x128xf32>
    %c3_99 = arith.constant 3 : index
    %c0_100 = arith.constant 0 : index
    %134 = vector.load %arg8[%c3_99, %c0_100] : memref<48x128xf32, #tpu.memory_space<vmem>>, vector<40x128xf32>
    %c3_101 = arith.constant 3 : index
    %c0_102 = arith.constant 0 : index
    %c0_103 = arith.constant 0 : index
    %135 = vector.load %arg3[%c3_101, %c0_102, %c0_103] : memref<5x128x128xf32, #tpu.memory_space<vmem>>, vector<1x128x128xf32>
    %136 = vector.shape_cast %135 : vector<1x128x128xf32> to vector<128x128xf32>
    %cst_104 = arith.constant dense<0.000000e+00> : vector<40x128xf32>
    %137 = tpu.matmul %134, %136, %cst_104 {dimension_numbers = #tpu.dot_dimension_numbers<[1], [0], [0], [1], [0, 0, 1, 1], [], []>} : vector<40x128xf32>, vector<128x128xf32>, vector<40x128xf32> -> vector<40x128xf32>
    %138 = arith.addf %133, %137 : vector<40x128xf32>
    %c4_105 = arith.constant 4 : index
    %c0_106 = arith.constant 0 : index
    %139 = vector.load %arg8[%c4_105, %c0_106] : memref<48x128xf32, #tpu.memory_space<vmem>>, vector<40x128xf32>
    %c4_107 = arith.constant 4 : index
    %c0_108 = arith.constant 0 : index
    %c0_109 = arith.constant 0 : index
    %140 = vector.load %arg3[%c4_107, %c0_108, %c0_109] : memref<5x128x128xf32, #tpu.memory_space<vmem>>, vector<1x128x128xf32>
    %141 = vector.shape_cast %140 : vector<1x128x128xf32> to vector<128x128xf32>
    %cst_110 = arith.constant dense<0.000000e+00> : vector<40x128xf32>
    %142 = tpu.matmul %139, %141, %cst_110 {dimension_numbers = #tpu.dot_dimension_numbers<[1], [0], [0], [1], [0, 0, 1, 1], [], []>} : vector<40x128xf32>, vector<128x128xf32>, vector<40x128xf32> -> vector<40x128xf32>
    %143 = arith.addf %138, %142 : vector<40x128xf32>
    %c0_111 = arith.constant 0 : index
    %c0_112 = arith.constant 0 : index
    %144 = vector.load %arg9[%c0_111, %c0_112] : memref<40x128xf32, #tpu.memory_space<vmem>>, vector<40x128xf32>
    tpu.vector_store %arg9[%c0_111, %c0_112], %143 {strides = array<i32>} : memref<40x128xf32, #tpu.memory_space<vmem>>, vector<40x128xf32>,
    %c0_113 = arith.constant 0 : index
    %c0_114 = arith.constant 0 : index
    %145 = tpu.strided_load %arg9[%c0_113, %c0_114] {strides = array<i32: 3, 1>} : memref<40x128xf32, #tpu.memory_space<vmem>>, vector<6x128xf32>
    %c24_115 = arith.constant 24 : index
    %c0_116 = arith.constant 0 : index
    %146 = tpu.strided_load %arg9[%c24_115, %c0_116] {strides = array<i32: 3, 1>} : memref<40x128xf32, #tpu.memory_space<vmem>>, vector<6x128xf32>
    %c4_117 = arith.constant 4 : index
    %c0_118 = arith.constant 0 : index
    %147 = vector.load %arg4[%c4_117, %c0_118] : memref<6x128xf32, #tpu.memory_space<vmem>>, vector<1x128xf32>
    %c5_119 = arith.constant 5 : index
    %c0_120 = arith.constant 0 : index
    %148 = vector.load %arg4[%c5_119, %c0_120] : memref<6x128xf32, #tpu.memory_space<vmem>>, vector<1x128xf32>
    %cst_121 = arith.constant dense<0.000000e+00> : vector<128xf32>
    %149 = vector.multi_reduction <add>, %145, %cst_121 [0] : vector<6x128xf32> to vector<128xf32>
    %150 = vector.shape_cast %149 : vector<128xf32> to vector<1x128xf32>
    %cst_122 = arith.constant 0.000000e+00 : f32
    %151 = vector.broadcast %cst_122 : f32 to vector<1x128xf32>
    %152 = arith.addf %151, %150 : vector<1x128xf32>
    %cst_123 = arith.constant dense<0.000000e+00> : vector<128xf32>
    %153 = vector.multi_reduction <add>, %146, %cst_123 [0] : vector<6x128xf32> to vector<128xf32>
    %154 = vector.shape_cast %153 : vector<128xf32> to vector<1x128xf32>
    %155 = arith.addf %152, %154 : vector<1x128xf32>
    %156 = arith.mulf %145, %145 : vector<6x128xf32>
    %cst_124 = arith.constant dense<0.000000e+00> : vector<128xf32>
    %157 = vector.multi_reduction <add>, %156, %cst_124 [0] : vector<6x128xf32> to vector<128xf32>
    %158 = vector.shape_cast %157 : vector<128xf32> to vector<1x128xf32>
    %cst_125 = arith.constant 0.000000e+00 : f32
    %159 = vector.broadcast %cst_125 : f32 to vector<1x128xf32>
    %160 = arith.addf %159, %158 : vector<1x128xf32>
    %161 = arith.mulf %146, %146 : vector<6x128xf32>
    %cst_126 = arith.constant dense<0.000000e+00> : vector<128xf32>
    %162 = vector.multi_reduction <add>, %161, %cst_126 [0] : vector<6x128xf32> to vector<128xf32>
    %163 = vector.shape_cast %162 : vector<128xf32> to vector<1x128xf32>
    %164 = arith.addf %160, %163 : vector<1x128xf32>
    %cst_127 = arith.constant 0.0833333358 : f32
    %165 = vector.broadcast %cst_127 : f32 to vector<1x128xf32>
    %166 = arith.mulf %155, %165 : vector<1x128xf32>
    %cst_128 = arith.constant 0.0833333358 : f32
    %167 = vector.broadcast %cst_128 : f32 to vector<1x128xf32>
    %168 = arith.mulf %164, %167 : vector<1x128xf32>
    %169 = arith.mulf %166, %166 : vector<1x128xf32>
    %170 = arith.subf %168, %169 : vector<1x128xf32>
    %cst_129 = arith.constant 0.000000e+00 : f32
    %171 = vector.broadcast %cst_129 : f32 to vector<1x128xf32>
    %172 = arith.maximumf %170, %171 : vector<1x128xf32>
    %cst_130 = arith.constant 9.99999974E-6 : f32
    %173 = vector.broadcast %cst_130 : f32 to vector<1x128xf32>
    %174 = arith.addf %172, %173 : vector<1x128xf32>
    %175 = math.rsqrt %174 : vector<1x128xf32>
    %176 = arith.mulf %147, %175 : vector<1x128xf32>
    %177 = arith.mulf %166, %176 : vector<1x128xf32>
    %178 = arith.subf %148, %177 : vector<1x128xf32>
    %179 = vector.broadcast %176 : vector<1x128xf32> to vector<6x128xf32>
    %180 = arith.mulf %145, %179 : vector<6x128xf32>
    %181 = vector.broadcast %178 : vector<1x128xf32> to vector<6x128xf32>
    %182 = arith.addf %180, %181 : vector<6x128xf32>
    %cst_131 = arith.constant 0.000000e+00 : f32
    %183 = vector.broadcast %cst_131 : f32 to vector<6x128xf32>
    %184 = arith.maximumf %182, %183 : vector<6x128xf32>
    %185 = vector.broadcast %176 : vector<1x128xf32> to vector<6x128xf32>
    %186 = arith.mulf %146, %185 : vector<6x128xf32>
    %187 = vector.broadcast %178 : vector<1x128xf32> to vector<6x128xf32>
    %188 = arith.addf %186, %187 : vector<6x128xf32>
    %cst_132 = arith.constant 0.000000e+00 : f32
    %189 = vector.broadcast %cst_132 : f32 to vector<6x128xf32>
    %190 = arith.maximumf %188, %189 : vector<6x128xf32>
    %cst_133 = arith.constant dense<0.000000e+00> : vector<128xf32>
    %191 = vector.multi_reduction <add>, %184, %cst_133 [0] : vector<6x128xf32> to vector<128xf32>
    %192 = vector.shape_cast %191 : vector<128xf32> to vector<1x128xf32>
    %cst_134 = arith.constant 6.000000e+00 : f32
    %193 = vector.broadcast %cst_134 : f32 to vector<1x128xf32>
    %194 = arith.divf %192, %193 : vector<1x128xf32>
    %cst_135 = arith.constant dense<0.000000e+00> : vector<128xf32>
    %195 = vector.multi_reduction <add>, %190, %cst_135 [0] : vector<6x128xf32> to vector<128xf32>
    %196 = vector.shape_cast %195 : vector<128xf32> to vector<1x128xf32>
    %cst_136 = arith.constant 6.000000e+00 : f32
    %197 = vector.broadcast %cst_136 : f32 to vector<1x128xf32>
    %198 = arith.divf %196, %197 : vector<1x128xf32>
    %199 = tpu.concatenate %194, %198 in 0 : vector<1x128xf32>, vector<1x128xf32> -> vector<2x128xf32>
    %c0_137 = arith.constant 0 : index
    %c0_138 = arith.constant 0 : index
    %200 = vector.load %arg5[%c0_137, %c0_138] : memref<2x128xf32, #tpu.memory_space<vmem>>, vector<2x128xf32>
    tpu.vector_store %arg5[%c0_137, %c0_138], %199 {strides = array<i32>} : memref<2x128xf32, #tpu.memory_space<vmem>>, vector<2x128xf32>,
    return
  }
}

</mosaic_0001>

<bundles_post_ra>
// kernel: spectral_adapter_forward.1
= control target key start
LH: loop header
LB: loop body
LE: loop exit
PB: predicated region body
PF: predicated region fallthrough
CT: control target
= control target key end

     0   :  { %vm51_vm0 = vcmask 261120   ;;  %s7204_s0 = inlined_call_operand.vmem [shape: f32[208,32], index: 0, kind: input, shape index: {}]   ;;  %s7205_s1 = inlined_call_operand.vmem [shape: f32[32,128], index: 1, kind: input, shape index: {}]   ;;  %s7206_s2 = inlined_call_operand.vmem [shape: f32[7,128,128], index: 2, kind: input, shape index: {}]   ;;  %s7207_s3 = inlined_call_operand.vmem [shape: f32[5,128,128], index: 3, kind: input, shape index: {}]   ;;  %s7208_s4 = inlined_call_operand.vmem [shape: f32[6,128], index: 4, kind: input, shape index: {}]   ;;  %s7209_s5 = inlined_call_operand.hbm [shape: f32[2,128], index: 5, kind: output, shape index: {}]  }
   0x1   :  { %v47_v0 = vld [vmem:[%s7205_s1] sm:$0xff]  ;;  %v48_v1 = vld [vmem:[%s7205_s1 + $0x8] sm:$0xff]  ;;  %v49_v2 = vld [vmem:[%s7205_s1 + $0x10] sm:$0xff] }
   0x2   :  { %v4736_v3 = vpack.c.bf16 %v48_v1, %v47_v0  ;;  %v50_v4 = vld [vmem:[%s7205_s1 + $0x18] sm:$0xff]  ;;  %v21_v5 = vld [vmem:[%s7204_s0] sm:$0xff]  ;;  %v22_v7 = vld [vmem:[%s7204_s0 + $0x8] sm:$0xff] }
   0x3   :  { %v4740_v6 = vpack.c.bf16 %v50_v4, %v49_v2  ;;  %3713 = vmatprep.mubr.msk.f32.mxu0 %vm51_vm0, %v21_v5  ;;  %v23_v8 = vld [vmem:[%s7204_s0 + $0x10] sm:$0xff] }
   0x4   :  { %4737 = vmatprep.subr.bf16.mxu0 %v4736_v3 }
   0x5   :  { %4739 = vmatpush3.bf16.msra.mxu0 %v4736_v3 }
   0x6   :  { %4741 = vmatprep.subr.bf16.mxu0 %v4740_v6 }
   0x9   :  { %4743 = vmatpush3.bf16.msra.mxu0 %v4740_v6 }
   0xa   :  { %10 = vsyncpa [#allocation7], 0  ;;  %v24_v9 = vld [vmem:[%s7204_s0 + $0x18] sm:$0xff]  ;;  %v25_v10 = vld [vmem:[%s7204_s0 + $0x20] sm:$0xff]  ;;  %v5398_v37 = vmov 0.0|0.0   ;;  %vm5399_vm1 = vmmov 0  }
   0xb   :  { %v26_v11 = vld [vmem:[%s7204_s0 + $0x28] sm:$0xff]  ;;  %v27_v12 = vld [vmem:[%s7204_s0 + $0x30] sm:$0xff]  ;;  %v28_v13 = vld [vmem:[%s7204_s0 + $0x38] sm:$0xff]  ;;  %5032 = vmatprep.subr.bf16.mxu1 %v5398_v37  ;;  %4744 = vmatprep.subr.bf16.mxu0 %v5398_v37  ;;  %vm2326_vm2 = vcmask 1043456   ;;  %vm3004_vm3 = vcmask 1045504   ;;  %vm3080_vm4 = vcmask 1040384  }
   0xc   :  { %3714 = vmatmul.mubr.msk.f32.vlgmr.msra.gmra.mrb[0].mxu0 %vm51_vm0, %v22_v7  ;;  %v29_v14 = vld [vmem:[%s7204_s0 + $0x40] sm:$0xff]  ;;  %v30_v15 = vld [vmem:[%s7204_s0 + $0x48] sm:$0xff]  ;;  %v31_v16 = vld [vmem:[%s7204_s0 + $0x50] sm:$0xff] }
   0xd   :  { %3716 = vmatprep.mubr.msk.f32.mxu0 %vm51_vm0, %v23_v8  ;;  %v32_v17 = vld [vmem:[%s7204_s0 + $0x58] sm:$0xff]  ;;  %v33_v18 = vld [vmem:[%s7204_s0 + $0x60] sm:$0xff]  ;;  %v34_v19 = vld [vmem:[%s7204_s0 + $0x68] sm:$0xff] }
   0xe   :  { %v35_v20 = vld [vmem:[%s7204_s0 + $0x70] sm:$0xff]  ;;  %v36_v21 = vld [vmem:[%s7204_s0 + $0x78] sm:$0xff]  ;;  %v37_v22 = vld [vmem:[%s7204_s0 + $0x80] sm:$0xff] }
   0xf   :  { %v38_v23 = vld [vmem:[%s7204_s0 + $0x88] sm:$0xff]  ;;  %v39_v24 = vld [vmem:[%s7204_s0 + $0x90] sm:$0xff]  ;;  %v40_v25 = vld [vmem:[%s7204_s0 + $0x98] sm:$0xff] }
  0x10   :  { %3717 = vmatmul.mubr.msk.f32.gmra.mrb[2].mxu0 %vm51_vm0, %v24_v9  ;;  %v41_v26 = vld [vmem:[%s7204_s0 + $0xa0] sm:$0xff]  ;;  %v42_v27 = vld [vmem:[%s7204_s0 + $0xa8] sm:$0xff]  ;;  %v43_v28 = vld [vmem:[%s7204_s0 + $0xb0] sm:$0xff] }
  0x11   :  { %3719 = vmatprep.mubr.msk.f32.mxu0 %vm51_vm0, %v25_v10  ;;  %v44_v29 = vld [vmem:[%s7204_s0 + $0xb8] sm:$0xff]  ;;  %v45_v30 = vld [vmem:[%s7204_s0 + $0xc0] sm:$0xff]  ;;  %v46_v31 = vld [vmem:[%s7204_s0 + $0xc8] sm:$0xff] }
  0x12   :  { %v3139_v32 = vld [vmem:[%s7206_s2 + $0x100] sm:$0xff]  ;;  %v3140_v33 = vld [vmem:[%s7206_s2 + $0x108] sm:$0xff]  ;;  %v3141_v39 = vld [vmem:[%s7206_s2 + $0x110] sm:$0xff] }
  0x13   :  { %v3123_v34 = vld [vmem:[%s7206_s2 + $0x80] sm:$0xff]  ;;  %v5557_v35 = vpack.c.bf16 %v3140_v33, %v3139_v32  ;;  %v3124_v36 = vld [vmem:[%s7206_s2 + $0x88] sm:$0xff]  ;;  %v3142_v40 = vld [vmem:[%s7206_s2 + $0x118] sm:$0xff] }
  0x14   :  { %3720 = vmatmul.mubr.msk.f32.gmra.mrb[4].mxu0 %vm51_vm0, %v26_v11  ;;  %v4745_v38 = vpack.c.bf16 %v3124_v36, %v3123_v34  ;;  %v3125_v41 = vld [vmem:[%s7206_s2 + $0x90] sm:$0xff]  ;;  %v5576_v42 = vpack.c.bf16 %v3142_v40, %v3141_v39  ;;  %v3126_v43 = vld [vmem:[%s7206_s2 + $0x98] sm:$0xff]  ;;  %v3143_v45 = vld [vmem:[%s7206_s2 + $0x120] sm:$0xff] }
  0x15   :  { %3722 = vmatprep.mubr.msk.f32.mxu0 %vm51_vm0, %v27_v12  ;;  %5040 = vmatpush3.bf16.msra.mxu1 %v5557_v35  ;;  %v4748_v44 = vpack.c.bf16 %v3126_v43, %v3125_v41  ;;  %v3144_v46 = vld [vmem:[%s7206_s2 + $0x128] sm:$0xff]  ;;  %v3127_v47 = vld [vmem:[%s7206_s2 + $0xa0] sm:$0xff]  ;;  %v3145_v51 = vld [vmem:[%s7206_s2 + $0x130] sm:$0xff] }
  0x16   :  { %4746 = vmatpush3.bf16.msra.mxu0 %v4745_v38  ;;  %5033 = vmatprep.subr.bf16.mxu1 %v5398_v37  ;;  %v5593_v48 = vpack.c.bf16 %v3144_v46, %v3143_v45  ;;  %v3128_v49 = vld [vmem:[%s7206_s2 + $0xa8] sm:$0xff]  ;;  %v3146_v52 = vld [vmem:[%s7206_s2 + $0x138] sm:$0xff]  ;;  %v3129_v53 = vld [vmem:[%s7206_s2 + $0xb0] sm:$0xff] }
  0x17   :  { %4747 = vmatprep.subr.bf16.mxu0 %v5398_v37  ;;  %v4751_v50 = vpack.c.bf16 %v3128_v49, %v3127_v47  ;;  %v5610_v54 = vpack.c.bf16 %v3146_v52, %v3145_v51  ;;  %v3130_v55 = vld [vmem:[%s7206_s2 + $0xb8] sm:$0xff]  ;;  %v3147_v57 = vld [vmem:[%s7206_s2 + $0x140] sm:$0xff]  ;;  %v3148_v58 = vld [vmem:[%s7206_s2 + $0x148] sm:$0xff] }
  0x18   :  { %3723 = vmatmul.mubr.msk.f32.gmra.mrb[6].mxu0 %vm51_vm0, %v28_v13  ;;  %v4754_v56 = vpack.c.bf16 %v3130_v55, %v3129_v53  ;;  %v3131_v59 = vld [vmem:[%s7206_s2 + $0xc0] sm:$0xff]  ;;  %v5627_v60 = vpack.c.bf16 %v3148_v58, %v3147_v57  ;;  %v3132_v61 = vld [vmem:[%s7206_s2 + $0xc8] sm:$0xff]  ;;  %v3149_v63 = vld [vmem:[%s7206_s2 + $0x150] sm:$0xff] }
  0x19   :  { %3725 = vmatprep.mubr.msk.f32.mxu0 %vm51_vm0, %v29_v14  ;;  %5041 = vmatpush3.bf16.msra.mxu1 %v5576_v42  ;;  %v4757_v62 = vpack.c.bf16 %v3132_v61, %v3131_v59  ;;  %v3150_v0 = vld [vmem:[%s7206_s2 + $0x158] sm:$0xff]  ;;  %v3133_v1 = vld [vmem:[%s7206_s2 + $0xd0] sm:$0xff]  ;;  %v3151_v5 = vld [vmem:[%s7206_s2 + $0x160] sm:$0xff] }
  0x1a   :  { %4749 = vmatpush3.bf16.msra.mxu0 %v4748_v44  ;;  %5034 = vmatprep.subr.bf16.mxu1 %v5398_v37  ;;  %v5644_v2 = vpack.c.bf16 %v3150_v0, %v3149_v63  ;;  %v3134_v3 = vld [vmem:[%s7206_s2 + $0xd8] sm:$0xff]  ;;  %v3152_v6 = vld [vmem:[%s7206_s2 + $0x168] sm:$0xff]  ;;  %v3135_v7 = vld [vmem:[%s7206_s2 + $0xe0] sm:$0xff] }
  0x1b   :  { %4750 = vmatprep.subr.bf16.mxu0 %v5398_v37  ;;  %v4760_v4 = vpack.c.bf16 %v3134_v3, %v3133_v1  ;;  %v5661_v8 = vpack.c.bf16 %v3152_v6, %v3151_v5  ;;  %v3136_v9 = vld [vmem:[%s7206_s2 + $0xe8] sm:$0xff]  ;;  %v3153_v11 = vld [vmem:[%s7206_s2 + $0x170] sm:$0xff]  ;;  %v3154_v12 = vld [vmem:[%s7206_s2 + $0x178] sm:$0xff] }
  0x1c   :  { %3726 = vmatmul.mubr.msk.f32.gmra.mrb[8].mxu0 %vm51_vm0, %v30_v15  ;;  %v4763_v10 = vpack.c.bf16 %v3136_v9, %v3135_v7  ;;  %v3137_v13 = vld [vmem:[%s7206_s2 + $0xf0] sm:$0xff]  ;;  %v5676_v14 = vpack.c.bf16 %v3154_v12, %v3153_v11  ;;  %v3138_v15 = vld [vmem:[%s7206_s2 + $0xf8] sm:$0xff] }
  0x1d   :  { %3728 = vmatprep.mubr.msk.f32.mxu0 %vm51_vm0, %v31_v16  ;;  %5042 = vmatpush3.bf16.msra.mxu1 %v5593_v48  ;;  %v5400_v16 = vmov 0.0  }
  0x1e   :  { %4752 = vmatpush3.bf16.msra.mxu0 %v4751_v50  ;;  %5035 = vmatprep.subr.bf16.mxu1 %v5398_v37  ;;  %2410 = vst [vmem:[#allocation4 + $0x10] sm:$0xff] %v5400_v16  ;;  %2413 = vst [vmem:[#allocation4 + $0x28] sm:$0xff] %v5400_v16 }
  0x1f   :  { %4753 = vmatprep.subr.bf16.mxu0 %v5398_v37  ;;  %4043 = vmatprep.mubr.msk.f32.mxu1 %vm5399_vm1, %v5400_v16 }
  0x20   :  { %3729 = vmatmul.mubr.msk.f32.gmra.mrb[10].mxu0 %vm51_vm0, %v32_v17  ;;  %v4766_v17 = vpack.c.bf16 %v3138_v15, %v3137_v13 }
  0x21   :  { %3731 = vmatprep.mubr.msk.f32.mxu0 %vm51_vm0, %v33_v18  ;;  %5043 = vmatpush3.bf16.msra.mxu1 %v5610_v54 }
  0x22   :  { %4755 = vmatpush3.bf16.msra.mxu0 %v4754_v56  ;;  %5036 = vmatprep.subr.bf16.mxu1 %v5398_v37 }
  0x23   :  { %4756 = vmatprep.subr.bf16.mxu0 %v5398_v37 }
  0x24   :  { %3732 = vmatmul.mubr.msk.f32.gmra.mrb[12].mxu0 %vm51_vm0, %v34_v19 }
  0x25   :  { %3734 = vmatprep.mubr.msk.f32.mxu0 %vm51_vm0, %v35_v20  ;;  %5044 = vmatpush3.bf16.msra.mxu1 %v5627_v60 }
  0x26   :  { %4758 = vmatpush3.bf16.msra.mxu0 %v4757_v62  ;;  %5037 = vmatprep.subr.bf16.mxu1 %v5398_v37 }
  0x27   :  { %4759 = vmatprep.subr.bf16.mxu0 %v5398_v37 }
  0x28   :  { %3735 = vmatmul.mubr.msk.f32.gmra.mrb[14].mxu0 %vm51_vm0, %v36_v21 }
  0x29   :  { %3737 = vmatprep.mubr.msk.f32.mxu0 %vm51_vm0, %v37_v22  ;;  %5045 = vmatpush3.bf16.msra.mxu1 %v5644_v2 }
  0x2a   :  { %4761 = vmatpush3.bf16.msra.mxu0 %v4760_v4  ;;  %5038 = vmatprep.subr.bf16.mxu1 %v5398_v37 }
  0x2b   :  { %4762 = vmatprep.subr.bf16.mxu0 %v5398_v37 }
  0x2c   :  { %3738 = vmatmul.mubr.msk.f32.gmra.mrb[16].mxu0 %vm51_vm0, %v38_v23 }
  0x2d   :  { %3740 = vmatprep.mubr.msk.f32.mxu0 %vm51_vm0, %v39_v24  ;;  %5046 = vmatpush3.bf16.msra.mxu1 %v5661_v8 }
  0x2e   :  { %4764 = vmatpush3.bf16.msra.mxu0 %v4763_v10  ;;  %5039 = vmatprep.subr.bf16.mxu1 %v5398_v37 }
  0x2f   :  { %4765 = vmatprep.subr.bf16.mxu0 %v5398_v37 }
  0x30   :  { %3741 = vmatmul.mubr.msk.f32.gmra.mrb[18].mxu0 %vm51_vm0, %v40_v25 }
  0x31   :  { %3743 = vmatprep.mubr.msk.f32.mxu0 %vm51_vm0, %v41_v26  ;;  %5047 = vmatpush3.bf16.msra.mxu1 %v5676_v14 }
  0x32   :  { %4767 = vmatpush3.bf16.msra.mxu0 %v4766_v17  ;;  %4816 = vmatprep.subr.bf16.mxu1 %v5398_v37 }
  0x33   :  { %4768 = vmatprep.subr.bf16.mxu0 %v5398_v37 }
  0x34   :  { %3744 = vmatmul.mubr.msk.f32.gmra.mrb[20].mxu0 %vm51_vm0, %v42_v27 }
  0x35   :  { %3746 = vmatprep.mubr.msk.f32.mxu0 %vm51_vm0, %v43_v28 }
  0x38   :  { %3747 = vmatmul.mubr.msk.f32.gmra.mrb[22].mxu0 %vm51_vm0, %v44_v29 }
  0x39   :  { %3749 = vmatprep.mubr.msk.f32.mxu0 %vm51_vm0, %v45_v30 }
  0x3c   :  { %3750 = vmatmul.mubr.msk.f32.gmra.mrb[24].mxu0 %vm51_vm0, %v46_v31 }
  0x3d   :  { %3784 = vmatprep.mubr.msk.f32.mxu0 %vm5399_vm1, %v5400_v16 }
  0xdf   :  { %v5692_v18 = vpop.f32.mrb[0].mxu0 }
  0xe0   :  { %v360_v19 = vmul.f32 %v5692_v18, %v5692_v18  ;;  %v5696_v20 = vpop.f32.mrb[1].mxu0 }
  0xe1   :  { %v327_v21 = vadd.f32 %v5692_v18, %v5696_v20  ;;  %v359_v22 = vmul.f32 %v5696_v20, %v5696_v20 }
  0xe3   :  { %v385_v23 = vadd.f32 %v360_v19, %v359_v22  ;;  %v5702_v24 = vpop.f32.mrb[2].mxu0 }
  0xe4   :  { %v5704_v25 = vpop.f32.mrb[3].mxu0  ;;  %v362_v28 = vmul.f32 %v5702_v24, %v5702_v24 }
  0xe5   :  { %v328_v26 = vadd.f32 %v327_v21, %v5704_v25  ;;  %v361_v27 = vmul.f32 %v5704_v25, %v5704_v25 }
  0xe7   :  { %v386_v29 = vadd.f32 %v385_v23, %v361_v27  ;;  %v5711_v30 = vpop.f32.mrb[4].mxu0  ;;  %v329_v31 = vadd.f32 %v5702_v24, %v328_v26 }
  0xe8   :  { %v5714_v32 = vpop.f32.mrb[5].mxu0  ;;  %v364_v38 = vmul.f32 %v5711_v30, %v5711_v30 }
  0xe9   :  { %v330_v33 = vadd.f32 %v329_v31, %v5714_v32  ;;  %v363_v34 = vmul.f32 %v5714_v32, %v5714_v32  ;;  %v387_v36 = vadd.f32 %v386_v29, %v362_v28 }
  0xeb   :  { %v388_v39 = vadd.f32 %v387_v36, %v363_v34  ;;  %v5721_v40 = vpop.f32.mrb[6].mxu0  ;;  %v331_v41 = vadd.f32 %v5711_v30, %v330_v33 }
  0xec   :  { %v5724_v43 = vpop.f32.mrb[7].mxu0  ;;  %v366_v47 = vmul.f32 %v5721_v40, %v5721_v40 }
  0xed   :  { %v332_v44 = vadd.f32 %v331_v41, %v5724_v43  ;;  %v365_v45 = vmul.f32 %v5724_v43, %v5724_v43  ;;  %v389_v46 = vadd.f32 %v388_v39, %v364_v38 }
  0xef   :  { %v390_v49 = vadd.f32 %v389_v46, %v365_v45  ;;  %v5731_v50 = vpop.f32.mrb[8].mxu0  ;;  %v333_v51 = vadd.f32 %v5721_v40, %v332_v44 }
  0xf0   :  { %v5734_v52 = vpop.f32.mrb[9].mxu0  ;;  %v368_v57 = vmul.f32 %v5731_v50, %v5731_v50 }
  0xf1   :  { %v334_v53 = vadd.f32 %v333_v51, %v5734_v52  ;;  %v367_v55 = vmul.f32 %v5734_v52, %v5734_v52  ;;  %v391_v56 = vadd.f32 %v390_v49, %v366_v47 }
  0xf3   :  { %v392_v58 = vadd.f32 %v391_v56, %v367_v55  ;;  %v5741_v59 = vpop.f32.mrb[10].mxu0  ;;  %v335_v61 = vadd.f32 %v5731_v50, %v334_v53 }
  0xf4   :  { %v5744_v62 = vpop.f32.mrb[11].mxu0  ;;  %v370_v3 = vmul.f32 %v5741_v59, %v5741_v59 }
  0xf5   :  { %v336_v63 = vadd.f32 %v335_v61, %v5744_v62  ;;  %v369_v0 = vmul.f32 %v5744_v62, %v5744_v62  ;;  %v393_v1 = vadd.f32 %v392_v58, %v368_v57 }
  0xf7   :  { %v394_v4 = vadd.f32 %v393_v1, %v369_v0  ;;  %v5751_v5 = vpop.f32.mrb[12].mxu0  ;;  %v337_v6 = vadd.f32 %v5741_v59, %v336_v63 }
  0xf8   :  { %v5754_v7 = vpop.f32.mrb[13].mxu0  ;;  %v372_v12 = vmul.f32 %v5751_v5, %v5751_v5 }
  0xf9   :  { %v338_v9 = vadd.f32 %v337_v6, %v5754_v7  ;;  %v371_v10 = vmul.f32 %v5754_v7, %v5754_v7  ;;  %v395_v11 = vadd.f32 %v394_v4, %v370_v3 }
  0xfb   :  { %v396_v13 = vadd.f32 %v395_v11, %v371_v10  ;;  %v5761_v15 = vpop.f32.mrb[14].mxu0  ;;  %v339_v17 = vadd.f32 %v5751_v5, %v338_v9 }
  0xfc   :  { %v5764_v19 = vpop.f32.mrb[15].mxu0  ;;  %v374_v26 = vmul.f32 %v5761_v15, %v5761_v15 }
  0xfd   :  { %v340_v21 = vadd.f32 %v339_v17, %v5764_v19  ;;  %v373_v22 = vmul.f32 %v5764_v19, %v5764_v19  ;;  %v397_v23 = vadd.f32 %v396_v13, %v372_v12 }
  0xff   :  { %v398_v27 = vadd.f32 %v397_v23, %v373_v22  ;;  %v5771_v28 = vpop.f32.mrb[16].mxu0  ;;  %v341_v29 = vadd.f32 %v5761_v15, %v340_v21 }
 0x100   :  { %v5774_v31 = vpop.f32.mrb[17].mxu0  ;;  %v376_v38 = vmul.f32 %v5771_v28, %v5771_v28 }
 0x101   :  { %v342_v33 = vadd.f32 %v341_v29, %v5774_v31  ;;  %v375_v34 = vmul.f32 %v5774_v31, %v5774_v31  ;;  %v399_v36 = vadd.f32 %v398_v27, %v374_v26 }
 0x103   :  { %v400_v39 = vadd.f32 %v399_v36, %v375_v34  ;;  %v5781_v41 = vpop.f32.mrb[18].mxu0  ;;  %v343_v44 = vadd.f32 %v5771_v28, %v342_v33 }
 0x104   :  { %v5784_v45 = vpop.f32.mrb[19].mxu0  ;;  %v378_v51 = vmul.f32 %v5781_v41, %v5781_v41 }
 0x105   :  { %v344_v46 = vadd.f32 %v343_v44, %v5784_v45  ;;  %v377_v47 = vmul.f32 %v5784_v45, %v5784_v45  ;;  %v401_v49 = vadd.f32 %v400_v39, %v376_v38 }
 0x107   :  { %v402_v53 = vadd.f32 %v401_v49, %v377_v47  ;;  %v5791_v55 = vpop.f32.mrb[20].mxu0  ;;  %v345_v56 = vadd.f32 %v5781_v41, %v344_v46 }
 0x108   :  { %v5794_v57 = vpop.f32.mrb[21].mxu0  ;;  %v380_v0 = vmul.f32 %v5791_v55, %v5791_v55 }
 0x109   :  { %v346_v58 = vadd.f32 %v345_v56, %v5794_v57  ;;  %v379_v61 = vmul.f32 %v5794_v57, %v5794_v57  ;;  %v403_v63 = vadd.f32 %v402_v53, %v378_v51 }
 0x10b   :  { %v404_v1 = vadd.f32 %v403_v63, %v379_v61  ;;  %v5801_v3 = vpop.f32.mrb[22].mxu0  ;;  %v347_v4 = vadd.f32 %v5791_v55, %v346_v58 }
 0x10c   :  { %v5804_v6 = vpop.f32.mrb[23].mxu0  ;;  %v382_v12 = vmul.f32 %v5801_v3, %v5801_v3 }
 0x10d   :  { %v348_v9 = vadd.f32 %v347_v4, %v5804_v6  ;;  %v381_v10 = vmul.f32 %v5804_v6, %v5804_v6  ;;  %v405_v11 = vadd.f32 %v404_v1, %v380_v0 }
 0x10f   :  { %v406_v13 = vadd.f32 %v405_v11, %v381_v10  ;;  %v5811_v17 = vpop.f32.mrb[24].mxu0  ;;  %v349_v21 = vadd.f32 %v5801_v3, %v348_v9 }
 0x110   :  { %v316_v22 = vpop.f32.mrb[25].mxu0  ;;  %v384_v29 = vmul.f32 %v5811_v17, %v5811_v17 }
 0x111   :  { %v350_v23 = vadd.f32 %v349_v21, %v316_v22  ;;  %v383_v26 = vmul.f32 %v316_v22, %v316_v22  ;;  %v407_v27 = vadd.f32 %v406_v13, %v382_v12  ;;  %v427_v12 = vlaneseq  ;;  %v325_v21 = vld [vmem:[%s7208_s4] sm:$0x1] }
 0x113   :  { %v351_v33 = vadd.f32 %v5811_v17, %v350_v23  ;;  %v408_v34 = vadd.f32 %v407_v27, %v383_v26  ;;  %v428_v13 = vshrl.u32 %v427_v12, 7  ;;  %v5825_v27 = vld [vmem:[%s7206_s2 + $0x180] sm:$0xff] }
 0x115   :  { %v352_v36 = vrot.slane %v351_v33, 4  ;;  %v409_v38 = vadd.f32 %v408_v34, %v384_v29  ;;  %v5820_v23 = vsub.s32 0, %v428_v13  ;;  %v5830_v29 = vld [vmem:[%s7206_s2 + $0x188] sm:$0xff] }
 0x117   :  { %v353_v39 = vadd.f32 %v352_v36, %v351_v33  ;;  %v410_v44 = vrot.slane %v409_v38, 4  ;;  %v5835_v33 = vld [vmem:[%s7206_s2 + $0x190] sm:$0xff]  ;;  %v5840_v36 = vld [vmem:[%s7206_s2 + $0x198] sm:$0xff] }
 0x119   :  { %v354_v46 = vrot.slane %v353_v39, 2  ;;  %v411_v47 = vadd.f32 %v410_v44, %v409_v38  ;;  %v5845_v38 = vld [vmem:[%s7206_s2] sm:$0xff] }
 0x11a   :  { %v326_v44 = vld [vmem:[%s7208_s4 + $0x1] sm:$0x1] }
 0x11b   :  { %v355_v49 = vadd.f32 %v354_v46, %v353_v39  ;;  %v412_v51 = vrot.slane %v411_v47, 2  ;;  %v5850_v39 = vld [vmem:[%s7206_s2 + $0x8] sm:$0xff] }
 0x11d   :  { %v356_v53 = vrot.slane %v355_v49, 1  ;;  %v413_v56 = vadd.f32 %v412_v51, %v411_v47  ;;  %v4820_v51 = vpack.c.bf16 %v5840_v36, %v5835_v33  ;;  %v3161_v33 = vld [vmem:[%s7206_s2 + $0x1b0] sm:$0xff]  ;;  %v3162_v36 = vld [vmem:[%s7206_s2 + $0x1b8] sm:$0xff] }
 0x11f   :  { %v357_v58 = vadd.f32 %v356_v53, %v355_v49  ;;  %v414_v61 = vrot.slane %v413_v56, 1  ;;  %v4817_v49 = vpack.c.bf16 %v5830_v29, %v5825_v27  ;;  %v4769_v53 = vpack.c.bf16 %v5850_v39, %v5845_v38  ;;  %v569_v38 = vld [vmem:[%s7206_s2 + $0x28] sm:$0xff] }
 0x121   :  { %v415_v63 = vadd.f32 %v414_v61, %v413_v56  ;;  %v417_v0 = vmul.f32 0.004901961, %v357_v58 }
 0x123   :  { %v418_v1 = vmul.f32 0.004901961, %v415_v63  ;;  %v419_v4 = vmul.f32 %v417_v0, %v417_v0 }
 0x125   :  { %v420_v9 = vsub.f32 %v418_v1, %v419_v4 }
 0x127   :  { %v421_v10 = vmax.f32 %v420_v9, 0.0 }
 0x129   :  { %v422_v11 = vadd.f32 1e-05, %v421_v10 }
 0x12b   :  { %5367 = vrsqrt.f32 %v422_v11 }
 0x135   :  { %v5368_v26 = vpop.eup %5367 }
 0x136   :  { %v424_v34 = vmul.f32 %v5368_v26, %v325_v21 }
 0x138   :  { %v425_v46 = vmul.f32 %v424_v34, %v417_v0  ;;  %v5856_v47 = vrot.slane %v424_v34, %v5820_v23 }
 0x13a   :  { %v426_v56 = vsub.f32 %v326_v44, %v425_v46  ;;  %v455_v58 = vmul.f32 %v5856_v47, %v316_v22  ;;  %v431_v61 = vmul.f32 %v5856_v47, %v5696_v20  ;;  %v432_v63 = vmul.f32 %v5692_v18, %v5856_v47 }
 0x13b   :  { %v446_v0 = vmul.f32 %v5761_v15, %v5856_v47  ;;  %v447_v1 = vmul.f32 %v5856_v47, %v5774_v31  ;;  %v433_v4 = vmul.f32 %v5856_v47, %v5704_v25  ;;  %v448_v9 = vmul.f32 %v5771_v28, %v5856_v47 }
 0x13c   :  { %v5878_v22 = vrot.slane %v426_v56, %v5820_v23  ;;  %v434_v20 = vmul.f32 %v5702_v24, %v5856_v47  ;;  %v449_v18 = vmul.f32 %v5856_v47, %v5784_v45  ;;  %v435_v15 = vmul.f32 %v5856_v47, %v5714_v32 }
 0x13d   :  { %v450_v31 = vmul.f32 %v5781_v41, %v5856_v47  ;;  %v436_v25 = vmul.f32 %v5711_v30, %v5856_v47  ;;  %v451_v28 = vmul.f32 %v5856_v47, %v5794_v57  ;;  %v437_v10 = vmul.f32 %v5856_v47, %v5724_v43 }
 0x13e   :  { %v485_v24 = vadd.f32 %v5878_v22, %v455_v58  ;;  %v5896_v11 = vadd.f32 %v5878_v22, %v431_v61  ;;  %v5899_v45 = vadd.f32 %v5878_v22, %v432_v63  ;;  %v5902_v32 = vadd.f32 %v5878_v22, %v446_v0 }
 0x13f   :  { %v5905_v41 = vadd.f32 %v5878_v22, %v447_v1  ;;  %v5908_v30 = vadd.f32 %v5878_v22, %v433_v4  ;;  %v5911_v57 = vadd.f32 %v5878_v22, %v448_v9  ;;  %v5914_v43 = vadd.f32 %v5878_v22, %v434_v20 }
 0x140   :  { %v511_v12 = vmax.f32 %v485_v24, 0.0  ;;  %v487_v13 = vmax.f32 %v5896_v11, 0.0  ;;  %v488_v21 = vmax.f32 %v5899_v45, 0.0  ;;  %v7216_v26 = vmax.f32 %v5902_v32, 0.0 }
 0x141   :  { %v7214_v34 = vmax.f32 %v5905_v41, 0.0  ;;  %v489_v44 = vmax.f32 %v5908_v30, 0.0  ;;  %v7213_v46 = vmax.f32 %v5911_v57, 0.0  ;;  %v490_v56 = vmax.f32 %v5914_v43, 0.0  ;;  %v3187_v30 = vld [vmem:[%s7206_s2 + $0x280] sm:$0xff] }
 0x142   :  { %537 = vst [vmem:[#allocation2 + $0xc0] sm:$0xff] %v511_v12  ;;  %513 = vst [vmem:[#allocation2] sm:$0xff] %v487_v13  ;;  %v5930_v58 = vadd.f32 %v5878_v22, %v449_v18  ;;  %v5933_v61 = vadd.f32 %v5878_v22, %v435_v15  ;;  %v5936_v63 = vadd.f32 %v5878_v22, %v450_v31 }
 0x143   :  { %514 = vst [vmem:[#allocation2 + $0x8] sm:$0xff] %v488_v21  ;;  %528 = vst [vmem:[#allocation2 + $0x78] sm:$0xff] %v7216_v26  ;;  %v5939_v0 = vadd.f32 %v5878_v22, %v436_v25  ;;  %v5950_v1 = vadd.f32 %v5878_v22, %v451_v28  ;;  %v5953_v4 = vadd.f32 %v5878_v22, %v437_v10 }
 0x144   :  { %529 = vst [vmem:[#allocation2 + $0x80] sm:$0xff] %v7214_v34  ;;  %515 = vst [vmem:[#allocation2 + $0x10] sm:$0xff] %v489_v44  ;;  %v452_v9 = vmul.f32 %v5791_v55, %v5856_v47  ;;  %v438_v20 = vmul.f32 %v5721_v40, %v5856_v47  ;;  %v7211_v18 = vmax.f32 %v5930_v58, 0.0  ;;  %v491_v15 = vmax.f32 %v5933_v61, 0.0  ;;  %v3191_v61 = vld [vmem:[%s7206_s2 + $0x2a0] sm:$0xff] }
 0x145   :  { %530 = vst [vmem:[#allocation2 + $0x88] sm:$0xff] %v7213_v46  ;;  %516 = vst [vmem:[#allocation2 + $0x18] sm:$0xff] %v490_v56  ;;  %v7210_v31 = vmax.f32 %v5936_v63, 0.0  ;;  %v492_v25 = vmax.f32 %v5939_v0, 0.0  ;;  %v7212_v28 = vmax.f32 %v5950_v1, 0.0  ;;  %v7218_v24 = vmax.f32 %v5953_v4, 0.0 }
 0x146   :  { %v5966_v10 = vadd.f32 %v5878_v22, %v452_v9  ;;  %v5969_v55 = vadd.f32 %v5878_v22, %v438_v20  ;;  %531 = vst [vmem:[#allocation2 + $0x90] sm:$0xff] %v7211_v18  ;;  %517 = vst [vmem:[#allocation2 + $0x20] sm:$0xff] %v491_v15  ;;  %v453_v40 = vmul.f32 %v5856_v47, %v5804_v6  ;;  %v7220_v11 = vmax.f32 %v5953_v4, 0.0  ;;  %v3192_v0 = vld [vmem:[%s7206_s2 + $0x2a8] sm:$0xff] }
 0x147   :  { %532 = vst [vmem:[#allocation2 + $0x98] sm:$0xff] %v7210_v31  ;;  %518 = vst [vmem:[#allocation2 + $0x28] sm:$0xff] %v492_v25  ;;  %v439_v12 = vmul.f32 %v5856_v47, %v5734_v52  ;;  %v454_v9 = vmul.f32 %v5801_v3, %v5856_v47  ;;  %v440_v20 = vmul.f32 %v5731_v50, %v5856_v47 }
 0x148   :  { %533 = vst [vmem:[#allocation2 + $0xa0] sm:$0xff] %v7212_v28  ;;  %519 = vst [vmem:[#allocation2 + $0x30] sm:$0xff] %v7218_v24  ;;  %v7215_v31 = vmax.f32 %v5966_v10, 0.0  ;;  %v7217_v18 = vmax.f32 %v5969_v55, 0.0  ;;  %v441_v6 = vmul.f32 %v5856_v47, %v5744_v62  ;;  %v456_v52 = vmul.f32 %v5811_v17, %v5856_v47 }
 0x149   :  { %v5998_v3 = vadd.f32 %v5878_v22, %v453_v40  ;;  %v6001_v50 = vadd.f32 %v5878_v22, %v439_v12  ;;  %v6004_v28 = vadd.f32 %v5878_v22, %v454_v9  ;;  %v6007_v46 = vadd.f32 %v5878_v22, %v440_v20 }
 0x14a   :  { %v580_v34 = vld [vmem:[#allocation2 + $0x1] sm:$0xff]  ;;  %534 = vst [vmem:[#allocation2 + $0xa8] sm:$0xff] %v7215_v31  ;;  %520 = vst [vmem:[#allocation2 + $0x38] sm:$0xff] %v7217_v18  ;;  %v6014_v62 = vadd.f32 %v5878_v22, %v441_v6  ;;  %v486_v17 = vadd.f32 %v5878_v22, %v456_v52  ;;  %v442_v40 = vmul.f32 %v5741_v59, %v5856_v47  ;;  %v566_v52 = vld [vmem:[%s7206_s2 + $0x10] sm:$0xff]  ;;  %v7221_v45 = vmax.f32 %v5969_v55, 0.0 }
 0x14b   :  { %v443_v12 = vmul.f32 %v5856_v47, %v5754_v7  ;;  %3785 = vmatmul.mubr.f32.vlgmr.msra.gmra.mrb[26].mxu0 %v580_v34  ;;  %v1017_v9 = vld [vmem:[#allocation2 + $0x7a] sm:$0xff]  ;;  %v509_v20 = vmax.f32 %v5998_v3, 0.0  ;;  %v495_v31 = vmax.f32 %v6001_v50, 0.0  ;;  %v7219_v26 = vmax.f32 %v6004_v28, 0.0  ;;  %v581_v29 = vld [vmem:[#allocation2 + $0x9] sm:$0xff] }
 0x14c   :  { %v444_v6 = vmul.f32 %v5751_v5, %v5856_v47  ;;  %v567_v59 = vld [vmem:[%s7206_s2 + $0x18] sm:$0xff]  ;;  %4044 = vmatmul.mubr.f32.vlgmr.msra.gmra.mrb[0].mxu1 %v1017_v9  ;;  %3787 = vmatprep.mubr.msk.f32.mxu0 %vm5399_vm1, %v5400_v16  ;;  %v496_v7 = vmax.f32 %v6007_v46, 0.0  ;;  %v497_v34 = vmax.f32 %v6014_v62, 0.0  ;;  %v512_v18 = vmax.f32 %v486_v17, 0.0  ;;  %v1516_v46 = vld [vmem:[#allocation2 + $0x4] sm:$0xff]  ;;  %v1517_v4 = vld [vmem:[#allocation2 + $0xc] sm:$0xff] }
 0x14d   :  { %v6037_v24 = vadd.f32 %v5878_v22, %v442_v40  ;;  %4818 = vmatpush3.bf16.msra.mxu1 %v4817_v49  ;;  %4046 = vmatprep.mubr.msk.f32.mxu1 %vm5399_vm1, %v5400_v16  ;;  %535 = vst [vmem:[#allocation2 + $0xb0] sm:$0xff] %v509_v20  ;;  %521 = vst [vmem:[#allocation2 + $0x40] sm:$0xff] %v495_v31  ;;  %v6051_v5 = vadd.f32 %v5878_v22, %v443_v12  ;;  %v3159_v49 = vld [vmem:[%s7206_s2 + $0x1a0] sm:$0xff]  ;;  %v3160_v40 = vld [vmem:[%s7206_s2 + $0x1a8] sm:$0xff] }
 0x14e   :  { %536 = vst [vmem:[#allocation2 + $0xb8] sm:$0xff] %v7219_v26  ;;  %v6054_v17 = vadd.f32 %v5878_v22, %v444_v6  ;;  %v445_v27 = vmul.f32 %v5856_v47, %v5764_v19  ;;  %4819 = vmatprep.subr.bf16.mxu1 %v5398_v37  ;;  %522 = vst [vmem:[#allocation2 + $0x48] sm:$0xff] %v496_v7  ;;  %4770 = vmatpush3.bf16.msra.mxu0 %v4769_v53  ;;  %v1018_v12 = vld [vmem:[#allocation2 + $0x82] sm:$0xff] }
 0x14f   :  { %523 = vst [vmem:[#allocation2 + $0x50] sm:$0xff] %v497_v34  ;;  %538 = vst [vmem:[#allocation2 + $0xc8] sm:$0xff] %v512_v18  ;;  %v498_v19 = vmax.f32 %v6037_v24, 0.0  ;;  %v4772_v47 = vpack.c.bf16 %v567_v59, %v566_v52  ;;  %3788 = vmatmul.mubr.f32.gmra.mrb[28].mxu0 %v581_v29  ;;  %v499_v9 = vmax.f32 %v6051_v5, 0.0  ;;  %4771 = vmatprep.subr.bf16.mxu0 %v5398_v37  ;;  %v568_v18 = vld [vmem:[%s7206_s2 + $0x20] sm:$0xff]  ;;  %v1019_v52 = vld [vmem:[#allocation2 + $0x8a] sm:$0xff] }
 0x150   :  { %v500_v6 = vmax.f32 %v6054_v17, 0.0  ;;  %v6076_v26 = vadd.f32 %v5878_v22, %v445_v27  ;;  %4047 = vmatmul.mubr.f32.gmra.mrb[2].mxu1 %v1018_v12  ;;  %3790 = vmatprep.mubr.msk.f32.mxu0 %vm5399_vm1, %v5400_v16  ;;  %v4823_v39 = vpack.c.bf16 %v3160_v40, %v3159_v49  ;;  %v582_v22 = vld [vmem:[#allocation2 + $0x11] sm:$0xff]  ;;  %v4826_v29 = vpack.c.bf16 %v3162_v36, %v3161_v33  ;;  %v583_v49 = vld [vmem:[#allocation2 + $0x19] sm:$0xff]  ;;  %v584_v33 = vld [vmem:[#allocation2 + $0x21] sm:$0xff] }
 0x151   :  { %524 = vst [vmem:[#allocation2 + $0x58] sm:$0xff] %v498_v19  ;;  %4821 = vmatpush3.bf16.msra.mxu1 %v4820_v51  ;;  %4049 = vmatprep.mubr.msk.f32.mxu1 %vm5399_vm1, %v5400_v16  ;;  %525 = vst [vmem:[#allocation2 + $0x60] sm:$0xff] %v499_v9  ;;  %v4775_v51 = vpack.c.bf16 %v569_v38, %v568_v18  ;;  %v570_v59 = vld [vmem:[%s7206_s2 + $0x30] sm:$0xff]  ;;  %v571_v27 = vld [vmem:[%s7206_s2 + $0x38] sm:$0xff] }
 0x152   :  { %526 = vst [vmem:[#allocation2 + $0x68] sm:$0xff] %v500_v6  ;;  %v501_v53 = vmax.f32 %v6076_v26, 0.0  ;;  %4822 = vmatprep.subr.bf16.mxu1 %v5398_v37  ;;  %4773 = vmatpush3.bf16.msra.mxu0 %v4772_v47  ;;  %v3163_v40 = vld [vmem:[%s7206_s2 + $0x1c0] sm:$0xff]  ;;  %v3164_v47 = vld [vmem:[%s7206_s2 + $0x1c8] sm:$0xff]  ;;  %v4778_v12 = vpack.c.bf16 %v571_v27, %v570_v59  ;;  %v1020_v18 = vld [vmem:[#allocation2 + $0x92] sm:$0xff] }
 0x153   :  { %3791 = vmatmul.mubr.f32.gmra.mrb[30].mxu0 %v582_v22  ;;  %4774 = vmatprep.subr.bf16.mxu0 %v5398_v37  ;;  %v572_v38 = vld [vmem:[%s7206_s2 + $0x40] sm:$0xff]  ;;  %v4829_v22 = vpack.c.bf16 %v3164_v47, %v3163_v40  ;;  %v3165_v36 = vld [vmem:[%s7206_s2 + $0x1d0] sm:$0xff]  ;;  %v3196_v62 = vld [vmem:[%s7206_s2 + $0x2c8] sm:$0xff] }
 0x154   :  { %527 = vst [vmem:[#allocation2 + $0x70] sm:$0xff] %v501_v53  ;;  %4050 = vmatmul.mubr.f32.gmra.mrb[4].mxu1 %v1019_v52  ;;  %3793 = vmatprep.mubr.msk.f32.mxu0 %vm5399_vm1, %v5400_v16  ;;  %v1021_v59 = vld [vmem:[#allocation2 + $0x9a] sm:$0xff]  ;;  %v574_v27 = vld [vmem:[%s7206_s2 + $0x50] sm:$0xff]  ;;  %v3200_v26 = vld [vmem:[%s7206_s2 + $0x2e8] sm:$0xff] }
 0x155   :  { %4824 = vmatpush3.bf16.msra.mxu1 %v4823_v39  ;;  %4052 = vmatprep.mubr.msk.f32.mxu1 %vm5399_vm1, %v5400_v16  ;;  %v573_v39 = vld [vmem:[%s7206_s2 + $0x48] sm:$0xff]  ;;  %v3167_v47 = vld [vmem:[%s7206_s2 + $0x1e0] sm:$0xff]  ;;  %v1518_v24 = vld [vmem:[#allocation2 + $0x14] sm:$0xff] }
 0x156   :  { %4825 = vmatprep.subr.bf16.mxu1 %v5398_v37  ;;  %4776 = vmatpush3.bf16.msra.mxu0 %v4775_v51  ;;  %v3166_v51 = vld [vmem:[%s7206_s2 + $0x1d8] sm:$0xff]  ;;  %v4781_v52 = vpack.c.bf16 %v573_v39, %v572_v38  ;;  %v585_v40 = vld [vmem:[#allocation2 + $0x29] sm:$0xff]  ;;  %v576_v39 = vld [vmem:[%s7206_s2 + $0x60] sm:$0xff] }
 0x157   :  { %3794 = vmatmul.mubr.f32.gmra.mrb[32].mxu0 %v583_v49  ;;  %4777 = vmatprep.subr.bf16.mxu0 %v5398_v37  ;;  %v4832_v49 = vpack.c.bf16 %v3166_v51, %v3165_v36  ;;  %v1022_v38 = vld [vmem:[#allocation2 + $0xa2] sm:$0xff]  ;;  %v586_v36 = vld [vmem:[#allocation2 + $0x31] sm:$0xff] }
 0x158   :  { %4053 = vmatmul.mubr.f32.gmra.mrb[6].mxu1 %v1020_v18  ;;  %3796 = vmatprep.mubr.msk.f32.mxu0 %vm5399_vm1, %v5400_v16  ;;  %v3169_v51 = vld [vmem:[%s7206_s2 + $0x1f0] sm:$0xff]  ;;  %v1283_v43 = vld [vmem:[#allocation2 + $0xc3] sm:$0xff]  ;;  %v3198_v17 = vld [vmem:[%s7206_s2 + $0x2d8] sm:$0xff] }
 0x159   :  { %4055 = vmatprep.mubr.msk.f32.mxu1 %vm5399_vm1, %v5400_v16  ;;  %4827 = vmatpush3.bf16.msra.mxu1 %v4826_v29  ;;  %v575_v29 = vld [vmem:[%s7206_s2 + $0x58] sm:$0xff]  ;;  %v3195_v50 = vld [vmem:[%s7206_s2 + $0x2c0] sm:$0xff]  ;;  %v3197_v5 = vld [vmem:[%s7206_s2 + $0x2d0] sm:$0xff] }
 0x15a   :  { %4828 = vmatprep.subr.bf16.mxu1 %v5398_v37  ;;  %4779 = vmatpush3.bf16.msra.mxu0 %v4778_v12  ;;  %v3168_v12 = vld [vmem:[%s7206_s2 + $0x1e8] sm:$0xff]  ;;  %v4784_v18 = vpack.c.bf16 %v575_v29, %v574_v27  ;;  %v578_v29 = vld [vmem:[%s7206_s2 + $0x70] sm:$0xff]  ;;  %v563_v3 = vld [vmem:[#allocation2 + $0xc0] sm:$0xff] }
 0x15b   :  { %3797 = vmatmul.mubr.f32.gmra.mrb[34].mxu0 %v584_v33  ;;  %4780 = vmatprep.subr.bf16.mxu0 %v5398_v37  ;;  %v4835_v33 = vpack.c.bf16 %v3168_v12, %v3167_v47  ;;  %v1023_v27 = vld [vmem:[#allocation2 + $0xaa] sm:$0xff]  ;;  %v587_v47 = vld [vmem:[#allocation2 + $0x39] sm:$0xff] }
 0x15c   :  { %4056 = vmatmul.mubr.f32.gmra.mrb[8].mxu1 %v1021_v59  ;;  %3799 = vmatprep.mubr.msk.f32.mxu0 %vm5399_vm1, %v5400_v16 }
 0x15d   :  { %4058 = vmatprep.mubr.msk.f32.mxu1 %vm5399_vm1, %v5400_v16  ;;  %4830 = vmatpush3.bf16.msra.mxu1 %v4829_v22  ;;  %v577_v22 = vld [vmem:[%s7206_s2 + $0x68] sm:$0xff] }
 0x15e   :  { %4831 = vmatprep.subr.bf16.mxu1 %v5398_v37  ;;  %4782 = vmatpush3.bf16.msra.mxu0 %v4781_v52  ;;  %v3170_v52 = vld [vmem:[%s7206_s2 + $0x1f8] sm:$0xff]  ;;  %v4787_v59 = vpack.c.bf16 %v577_v22, %v576_v39  ;;  %v589_v22 = vld [vmem:[#allocation2 + $0x49] sm:$0xff] }
 0x15f   :  { %3800 = vmatmul.mubr.f32.gmra.mrb[36].mxu0 %v585_v40  ;;  %4783 = vmatprep.subr.bf16.mxu0 %v5398_v37  ;;  %v4838_v40 = vpack.c.bf16 %v3170_v52, %v3169_v51  ;;  %v1025_v39 = vld [vmem:[#allocation2 + $0xba] sm:$0xff]  ;;  %v1026_v51 = vld [vmem:[#allocation2 + $0xc2] sm:$0xff] }
 0x160   :  { %4059 = vmatmul.mubr.f32.gmra.mrb[10].mxu1 %v1022_v38  ;;  %3802 = vmatprep.mubr.msk.f32.mxu0 %vm5399_vm1, %v5400_v16  ;;  %v588_v38 = vld [vmem:[#allocation2 + $0x41] sm:$0xff] }
 0x161   :  { %4061 = vmatprep.mubr.msk.f32.mxu1 %vm5399_vm1, %v5400_v16  ;;  %4833 = vmatpush3.bf16.msra.mxu1 %v4832_v49  ;;  %v579_v49 = vld [vmem:[%s7206_s2 + $0x78] sm:$0xff] }
 0x162   :  { %4834 = vmatprep.subr.bf16.mxu1 %v5398_v37  ;;  %4785 = vmatpush3.bf16.msra.mxu0 %v4784_v18  ;;  %v4790_v12 = vpack.c.bf16 %v579_v49, %v578_v29  ;;  %v1024_v18 = vld [vmem:[#allocation2 + $0xb2] sm:$0xff]  ;;  %v1259_v49 = vld [vmem:[#allocation2 + $0x3] sm:$0xff] }
 0x163   :  { %3803 = vmatmul.mubr.f32.gmra.mrb[38].mxu0 %v586_v36  ;;  %4786 = vmatprep.subr.bf16.mxu0 %v5398_v37  ;;  %v3172_v36 = vld [vmem:[%s7206_s2 + $0x208] sm:$0xff]  ;;  %v3174_v29 = vld [vmem:[%s7206_s2 + $0x218] sm:$0xff] }
 0x164   :  { %4062 = vmatmul.mubr.f32.gmra.mrb[12].mxu1 %v1023_v27  ;;  %3805 = vmatprep.mubr.msk.f32.mxu0 %vm5399_vm1, %v5400_v16  ;;  %v3173_v27 = vld [vmem:[%s7206_s2 + $0x210] sm:$0xff] }
 0x165   :  { %4064 = vmatprep.mubr.msk.f32.mxu1 %vm5399_vm1, %v5400_v16  ;;  %4836 = vmatpush3.bf16.msra.mxu1 %v4835_v33  ;;  %v3171_v33 = vld [vmem:[%s7206_s2 + $0x200] sm:$0xff] }
 0x166   :  { %4837 = vmatprep.subr.bf16.mxu1 %v5398_v37  ;;  %4788 = vmatpush3.bf16.msra.mxu0 %v4787_v59  ;;  %v4841_v52 = vpack.c.bf16 %v3172_v36, %v3171_v33  ;;  %v590_v59 = vld [vmem:[#allocation2 + $0x51] sm:$0xff] }
 0x167   :  { %3806 = vmatmul.mubr.f32.gmra.mrb[40].mxu0 %v587_v47  ;;  %4789 = vmatprep.subr.bf16.mxu0 %v5398_v37  ;;  %v591_v47 = vld [vmem:[#allocation2 + $0x59] sm:$0xff]  ;;  %v3177_v33 = vld [vmem:[%s7206_s2 + $0x230] sm:$0xff] }
 0x168   :  { %4065 = vmatmul.mubr.f32.gmra.mrb[14].mxu1 %v1024_v18  ;;  %3808 = vmatprep.mubr.msk.f32.mxu0 %vm5399_vm1, %v5400_v16  ;;  %v3176_v18 = vld [vmem:[%s7206_s2 + $0x228] sm:$0xff]  ;;  %v3178_v36 = vld [vmem:[%s7206_s2 + $0x238] sm:$0xff] }
 0x169   :  { %4067 = vmatprep.mubr.msk.f32.mxu1 %vm5399_vm1, %v5400_v16  ;;  %4839 = vmatpush3.bf16.msra.mxu1 %v4838_v40  ;;  %v4844_v40 = vpack.c.bf16 %v3174_v29, %v3173_v27  ;;  %v3179_v27 = vld [vmem:[%s7206_s2 + $0x240] sm:$0xff]  ;;  %v3180_v29 = vld [vmem:[%s7206_s2 + $0x248] sm:$0xff] }
 0x16a   :  { %4840 = vmatprep.subr.bf16.mxu1 %v5398_v37  ;;  %4791 = vmatpush3.bf16.msra.mxu0 %v4790_v12  ;;  %v3175_v12 = vld [vmem:[%s7206_s2 + $0x220] sm:$0xff] }
 0x16b   :  { %3809 = vmatmul.mubr.f32.gmra.mrb[42].mxu0 %v588_v38  ;;  %4792 = vmatprep.subr.bf16.mxu0 %v5398_v37  ;;  %v1260_v38 = vld [vmem:[#allocation2 + $0xb] sm:$0xff] }
 0x16c   :  { %4068 = vmatmul.mubr.f32.gmra.mrb[16].mxu1 %v1025_v39  ;;  %3811 = vmatprep.mubr.msk.f32.mxu0 %vm5399_vm1, %v5400_v16  ;;  %v4847_v39 = vpack.c.bf16 %v3176_v18, %v3175_v12  ;;  %v3181_v12 = vld [vmem:[%s7206_s2 + $0x250] sm:$0xff]  ;;  %v3182_v18 = vld [vmem:[%s7206_s2 + $0x258] sm:$0xff] }
 0x16d   :  { %4070 = vmatprep.mubr.msk.f32.mxu1 %vm5399_vm1, %v5400_v16 }
 0x16f   :  { %3812 = vmatmul.mubr.f32.gmra.mrb[44].mxu0 %v589_v22  ;;  %v592_v22 = vld [vmem:[#allocation2 + $0x61] sm:$0xff] }
 0x170   :  { %4071 = vmatmul.mubr.f32.gmra.mrb[18].mxu1 %v1026_v51  ;;  %3814 = vmatprep.mubr.msk.f32.mxu0 %vm5399_vm1, %v5400_v16  ;;  %v1261_v51 = vld [vmem:[#allocation2 + $0x13] sm:$0xff] }
 0x171   :  { %4105 = vmatprep.mubr.msk.f32.mxu1 %vm5399_vm1, %v5400_v16 }
 0x173   :  { %3815 = vmatmul.mubr.f32.gmra.mrb[46].mxu0 %v590_v59  ;;  %v593_v59 = vld [vmem:[#allocation2 + $0x69] sm:$0xff] }
 0x174   :  { %4106 = vmatmul.mubr.f32.vlgmr.msra.gmra.mrb[20].mxu1 %v1259_v49  ;;  %3817 = vmatprep.mubr.msk.f32.mxu0 %vm5399_vm1, %v5400_v16  ;;  %v1262_v49 = vld [vmem:[#allocation2 + $0x1b] sm:$0xff] }
 0x175   :  { %4842 = vmatpush3.bf16.msra.mxu1 %v4841_v52  ;;  %4108 = vmatprep.mubr.msk.f32.mxu1 %vm5399_vm1, %v5400_v16  ;;  %v4850_v52 = vpack.c.bf16 %v3178_v36, %v3177_v33  ;;  %v3183_v33 = vld [vmem:[%s7206_s2 + $0x260] sm:$0xff]  ;;  %v3184_v36 = vld [vmem:[%s7206_s2 + $0x268] sm:$0xff] }
 0x176   :  { %4843 = vmatprep.subr.bf16.mxu1 %v5398_v37 }
 0x177   :  { %3818 = vmatmul.mubr.f32.gmra.mrb[48].mxu0 %v591_v47  ;;  %v594_v47 = vld [vmem:[#allocation2 + $0x71] sm:$0xff] }
 0x178   :  { %4109 = vmatmul.mubr.f32.gmra.mrb[22].mxu1 %v1260_v38  ;;  %3820 = vmatprep.mubr.msk.f32.mxu0 %vm5399_vm1, %v5400_v16  ;;  %v1263_v38 = vld [vmem:[#allocation2 + $0x23] sm:$0xff] }
 0x179   :  { %4111 = vmatprep.mubr.msk.f32.mxu1 %vm5399_vm1, %v5400_v16  ;;  %4845 = vmatpush3.bf16.msra.mxu1 %v4844_v40  ;;  %v4853_v40 = vpack.c.bf16 %v3180_v29, %v3179_v27  ;;  %v3185_v27 = vld [vmem:[%s7206_s2 + $0x270] sm:$0xff]  ;;  %v3186_v29 = vld [vmem:[%s7206_s2 + $0x278] sm:$0xff] }
 0x17a   :  { %4846 = vmatprep.subr.bf16.mxu1 %v5398_v37 }
 0x17b   :  { %3821 = vmatmul.mubr.f32.gmra.mrb[50].mxu0 %v592_v22  ;;  %v595_v22 = vld [vmem:[#allocation2 + $0x79] sm:$0xff] }
 0x17c   :  { %4112 = vmatmul.mubr.f32.gmra.mrb[24].mxu1 %v1261_v51  ;;  %3823 = vmatprep.mubr.msk.f32.mxu0 %vm5399_vm1, %v5400_v16  ;;  %v1264_v51 = vld [vmem:[#allocation2 + $0x2b] sm:$0xff] }
 0x17d   :  { %4114 = vmatprep.mubr.msk.f32.mxu1 %vm5399_vm1, %v5400_v16  ;;  %4848 = vmatpush3.bf16.msra.mxu1 %v4847_v39  ;;  %v4856_v39 = vpack.c.bf16 %v3182_v18, %v3181_v12  ;;  %v1266_v12 = vld [vmem:[#allocation2 + $0x3b] sm:$0xff]  ;;  %v598_v18 = vld [vmem:[#allocation2 + $0x91] sm:$0xff] }
 0x17e   :  { %4849 = vmatprep.subr.bf16.mxu1 %v5398_v37 }
 0x17f   :  { %3824 = vmatmul.mubr.f32.gmra.mrb[52].mxu0 %v593_v59  ;;  %v596_v59 = vld [vmem:[#allocation2 + $0x81] sm:$0xff] }
 0x180   :  { %4115 = vmatmul.mubr.f32.gmra.mrb[26].mxu1 %v1262_v49  ;;  %3826 = vmatprep.mubr.msk.f32.mxu0 %vm5399_vm1, %v5400_v16  ;;  %v1265_v49 = vld [vmem:[#allocation2 + $0x33] sm:$0xff] }
 0x181   :  { %4117 = vmatprep.mubr.msk.f32.mxu1 %vm5399_vm1, %v5400_v16  ;;  %4851 = vmatpush3.bf16.msra.mxu1 %v4850_v52  ;;  %v4859_v52 = vpack.c.bf16 %v3184_v36, %v3183_v33  ;;  %v600_v33 = vld [vmem:[#allocation2 + $0xa1] sm:$0xff]  ;;  %v1269_v36 = vld [vmem:[#allocation2 + $0x53] sm:$0xff] }
 0x182   :  { %4852 = vmatprep.subr.bf16.mxu1 %v5398_v37 }
 0x183   :  { %3827 = vmatmul.mubr.f32.gmra.mrb[54].mxu0 %v594_v47  ;;  %v597_v47 = vld [vmem:[#allocation2 + $0x89] sm:$0xff] }
 0x184   :  { %4118 = vmatmul.mubr.f32.gmra.mrb[28].mxu1 %v1263_v38  ;;  %3829 = vmatprep.mubr.msk.f32.mxu0 %vm5399_vm1, %v5400_v16  ;;  %v1267_v38 = vld [vmem:[#allocation2 + $0x43] sm:$0xff] }
 0x185   :  { %4120 = vmatprep.mubr.msk.f32.mxu1 %vm5399_vm1, %v5400_v16  ;;  %4854 = vmatpush3.bf16.msra.mxu1 %v4853_v40  ;;  %v4862_v40 = vpack.c.bf16 %v3186_v29, %v3185_v27  ;;  %v1271_v27 = vld [vmem:[#allocation2 + $0x63] sm:$0xff]  ;;  %v603_v29 = vld [vmem:[#allocation2 + $0xb9] sm:$0xff] }
 0x186   :  { %4855 = vmatprep.subr.bf16.mxu1 %v5398_v37 }
 0x187   :  { %3830 = vmatmul.mubr.f32.gmra.mrb[56].mxu0 %v595_v22  ;;  %v1268_v22 = vld [vmem:[#allocation2 + $0x4b] sm:$0xff] }
 0x188   :  { %4121 = vmatmul.mubr.f32.gmra.mrb[30].mxu1 %v1264_v51  ;;  %3832 = vmatprep.mubr.msk.f32.mxu0 %vm5399_vm1, %v5400_v16  ;;  %v601_v51 = vld [vmem:[#allocation2 + $0xa9] sm:$0xff] }
 0x189   :  { %4123 = vmatprep.mubr.msk.f32.mxu1 %vm5399_vm1, %v5400_v16  ;;  %4857 = vmatpush3.bf16.msra.mxu1 %v4856_v39  ;;  %v599_v39 = vld [vmem:[#allocation2 + $0x99] sm:$0xff] }
 0x18a   :  { %4858 = vmatprep.subr.bf16.mxu1 %v5398_v37 }
 0x18b   :  { %3833 = vmatmul.mubr.f32.gmra.mrb[58].mxu0 %v596_v59  ;;  %v602_v59 = vld [vmem:[#allocation2 + $0xb1] sm:$0xff] }
 0x18c   :  { %4124 = vmatmul.mubr.f32.gmra.mrb[32].mxu1 %v1265_v49  ;;  %3835 = vmatprep.mubr.msk.f32.mxu0 %vm5399_vm1, %v5400_v16  ;;  %v1272_v49 = vld [vmem:[#allocation2 + $0x6b] sm:$0xff] }
 0x18d   :  { %4126 = vmatprep.mubr.msk.f32.mxu1 %vm5399_vm1, %v5400_v16  ;;  %4860 = vmatpush3.bf16.msra.mxu1 %v4859_v52  ;;  %v1270_v52 = vld [vmem:[#allocation2 + $0x5b] sm:$0xff] }
 0x18e   :  { %4861 = vmatprep.subr.bf16.mxu1 %v5398_v37 }
 0x18f   :  { %3836 = vmatmul.mubr.f32.gmra.mrb[60].mxu0 %v597_v47  ;;  %v1273_v47 = vld [vmem:[#allocation2 + $0x73] sm:$0xff] }
 0x190   :  { %4127 = vmatmul.mubr.f32.gmra.mrb[34].mxu1 %v1266_v12  ;;  %3838 = vmatprep.mubr.msk.f32.mxu0 %vm5399_vm1, %v5400_v16  ;;  %v6319_v12 = vld [vmem:[#allocation4 + $0x10] sm:$0xff] }
 0x191   :  { %4129 = vmatprep.mubr.msk.f32.mxu1 %vm5399_vm1, %v5400_v16  ;;  %4863 = vmatpush3.bf16.msra.mxu1 %v4862_v40  ;;  %v604_v40 = vld [vmem:[#allocation2 + $0xc1] sm:$0xff] }
 0x192   :  { %4864 = vmatprep.subr.bf16.mxu1 %v5398_v37 }
 0x193   :  { %3839 = vmatmul.mubr.f32.gmra.mrb[62].mxu0 %v598_v18  ;;  %v1274_v18 = vld [vmem:[#allocation2 + $0x7b] sm:$0xff] }
 0x194   :  { %4130 = vmatmul.mubr.f32.gmra.mrb[36].mxu1 %v1267_v38  ;;  %3841 = vmatprep.mubr.msk.f32.mxu0 %vm5399_vm1, %v5400_v16  ;;  %v1521_v38 = vld [vmem:[#allocation2 + $0x2c] sm:$0xff] }
 0x195   :  { %4132 = vmatprep.mubr.msk.f32.mxu1 %vm5399_vm1, %v5400_v16 }
 0x197   :  { %3842 = vmatmul.mubr.f32.gmra.mrb[64].mxu0 %v599_v39 }
 0x198   :  { %4133 = vmatmul.mubr.f32.gmra.mrb[38].mxu1 %v1268_v22  ;;  %3844 = vmatprep.mubr.msk.f32.mxu0 %vm5399_vm1, %v5400_v16  ;;  %v3201_v22 = vld [vmem:[%s7206_s2 + $0x2f0] sm:$0xff] }
 0x199   :  { %4135 = vmatprep.mubr.msk.f32.mxu1 %vm5399_vm1, %v5400_v16 }
 0x19b   :  { %3845 = vmatmul.mubr.f32.gmra.mrb[66].mxu0 %v600_v33  ;;  %v7223_v33 = vmax.f32 %v5905_v41, 0.0  ;;  %v7225_v41 = vmax.f32 %v5930_v58, 0.0  ;;  %v7227_v58 = vmax.f32 %v5950_v1, 0.0  ;;  %v1528_v1 = vld [vmem:[#allocation2 + $0x64] sm:$0xff] }
 0x19c   :  { %4136 = vmatmul.mubr.f32.gmra.mrb[40].mxu1 %v1269_v36  ;;  %3847 = vmatprep.mubr.msk.f32.mxu0 %vm5399_vm1, %v5400_v16  ;;  %v1522_v36 = vld [vmem:[#allocation2 + $0x34] sm:$0xff] }
 0x19d   :  { %4138 = vmatprep.mubr.msk.f32.mxu1 %vm5399_vm1, %v5400_v16 }
 0x19f   :  { %3848 = vmatmul.mubr.f32.gmra.mrb[68].mxu0 %v601_v51 }
 0x1a0   :  { %4139 = vmatmul.mubr.f32.gmra.mrb[42].mxu1 %v1270_v52  ;;  %3850 = vmatprep.mubr.msk.f32.mxu0 %vm5399_vm1, %v5400_v16  ;;  %v7224_v52 = vmax.f32 %v5911_v57, 0.0  ;;  %v7226_v57 = vmax.f32 %v5936_v63, 0.0  ;;  %v7228_v63 = vmax.f32 %v5966_v10, 0.0  ;;  %v7229_v10 = vmax.f32 %v6004_v28, 0.0  ;;  %v1002_v28 = vld [vmem:[#allocation2 + $0x2] sm:$0xff] }
 0x1a1   :  { %4141 = vmatprep.mubr.msk.f32.mxu1 %vm5399_vm1, %v5400_v16 }
 0x1a3   :  { %3851 = vmatmul.mubr.f32.gmra.mrb[70].mxu0 %v602_v59  ;;  %v1523_v59 = vld [vmem:[#allocation2 + $0x3c] sm:$0xff] }
 0x1a4   :  { %4142 = vmatmul.mubr.f32.gmra.mrb[44].mxu1 %v1271_v27  ;;  %3853 = vmatprep.mubr.msk.f32.mxu0 %vm5399_vm1, %v5400_v16  ;;  %v1524_v27 = vld [vmem:[#allocation2 + $0x44] sm:$0xff] }
 0x1a5   :  { %4144 = vmatprep.mubr.msk.f32.mxu1 %vm5399_vm1, %v5400_v16 }
 0x1a7   :  { %3854 = vmatmul.mubr.f32.gmra.mrb[72].mxu0 %v603_v29  ;;  %v1525_v29 = vld [vmem:[#allocation2 + $0x4c] sm:$0xff] }
 0x1a8   :  { %4145 = vmatmul.mubr.f32.gmra.mrb[46].mxu1 %v1272_v49  ;;  %3856 = vmatprep.mubr.msk.f32.mxu0 %vm5399_vm1, %v5400_v16  ;;  %v1526_v49 = vld [vmem:[#allocation2 + $0x54] sm:$0xff] }
 0x1a9   :  { %4147 = vmatprep.mubr.msk.f32.mxu1 %vm5399_vm1, %v5400_v16  ;;  %v1275_v16 = vld [vmem:[#allocation2 + $0x83] sm:$0xff] }
 0x1ab   :  { %3857 = vmatmul.mubr.f32.gmra.mrb[74].mxu0 %v604_v40  ;;  %v1527_v40 = vld [vmem:[#allocation2 + $0x5c] sm:$0xff] }
 0x1ac   :  { %4148 = vmatmul.mubr.f32.gmra.mrb[48].mxu1 %v1273_v47  ;;  %3891 = vmatprep.mubr.msk.f32.mxu0 %vm5399_vm1, %v6319_v12  ;;  %v1529_v47 = vld [vmem:[#allocation2 + $0x6c] sm:$0xff] }
 0x1ad   :  { %4150 = vmatprep.mubr.msk.f32.mxu1 %vm5399_vm1, %v6319_v12 }
 0x1af   :  { %3892 = vmatmul.mubr.f32.vlgmr.msra.gmra.mrb[26].mxu0 %v487_v13 }
 0x1b0   :  { %4151 = vmatmul.mubr.f32.gmra.mrb[0].mxu1 %v1274_v18  ;;  %3894 = vmatprep.mubr.msk.f32.mxu0 %vm5399_vm1, %v6319_v12  ;;  %v1531_v18 = vld [vmem:[#allocation2 + $0x7c] sm:$0xff] }
 0x1b1   :  { %4153 = vmatprep.mubr.msk.f32.mxu1 %vm5399_vm1, %v6319_v12  ;;  %4794 = vmatpush3.bf16.msra.mxu0 %v5557_v35  ;;  %v1276_v35 = vld [vmem:[#allocation2 + $0x8b] sm:$0xff] }
 0x1b2   :  { %4795 = vmatprep.subr.bf16.mxu0 %v5398_v37 }
 0x1b3   :  { %3895 = vmatmul.mubr.f32.gmra.mrb[28].mxu0 %v488_v21  ;;  %v3189_v21 = vld [vmem:[%s7206_s2 + $0x290] sm:$0xff] }
 0x1b4   :  { %4154 = vmatmul.mubr.f32.gmra.mrb[2].mxu1 %v1275_v16  ;;  %3897 = vmatprep.mubr.msk.f32.mxu0 %vm5399_vm1, %v6319_v12  ;;  %v1003_v16 = vld [vmem:[#allocation2 + $0xa] sm:$0xff] }
 0x1b5   :  { %4156 = vmatprep.mubr.msk.f32.mxu1 %vm5399_vm1, %v6319_v12  ;;  %4797 = vmatpush3.bf16.msra.mxu0 %v5576_v42  ;;  %v1277_v42 = vld [vmem:[#allocation2 + $0x93] sm:$0xff] }
 0x1b6   :  { %4798 = vmatprep.subr.bf16.mxu0 %v5398_v37 }
 0x1b7   :  { %3898 = vmatmul.mubr.f32.gmra.mrb[30].mxu0 %v489_v44  ;;  %v3190_v44 = vld [vmem:[%s7206_s2 + $0x298] sm:$0xff] }
 0x1b8   :  { %4157 = vmatmul.mubr.f32.gmra.mrb[4].mxu1 %v1276_v35  ;;  %3900 = vmatprep.mubr.msk.f32.mxu0 %vm5399_vm1, %v6319_v12  ;;  %v1532_v35 = vld [vmem:[#allocation2 + $0x84] sm:$0xff] }
 0x1b9   :  { %4159 = vmatprep.mubr.msk.f32.mxu1 %vm5399_vm1, %v6319_v12  ;;  %4800 = vmatpush3.bf16.msra.mxu0 %v5593_v48  ;;  %v1278_v48 = vld [vmem:[#allocation2 + $0x9b] sm:$0xff] }
 0x1ba   :  { %4801 = vmatprep.subr.bf16.mxu0 %v5398_v37 }
 0x1bb   :  { %3901 = vmatmul.mubr.f32.gmra.mrb[32].mxu0 %v490_v56  ;;  %v4868_v56 = vpack.c.bf16 %v3190_v44, %v3189_v21  ;;  %v1010_v21 = vld [vmem:[#allocation2 + $0x42] sm:$0xff] }
 0x1bc   :  { %4160 = vmatmul.mubr.f32.gmra.mrb[6].mxu1 %v1277_v42  ;;  %3903 = vmatprep.mubr.msk.f32.mxu0 %vm5399_vm1, %v6319_v12  ;;  %v1004_v42 = vld [vmem:[#allocation2 + $0x12] sm:$0xff]  ;;  %v1539_v44 = vld [vmem:[#allocation2 + $0xbc] sm:$0xff] }
 0x1bd   :  { %4162 = vmatprep.mubr.msk.f32.mxu1 %vm5399_vm1, %v6319_v12  ;;  %4803 = vmatpush3.bf16.msra.mxu0 %v5610_v54  ;;  %v1279_v54 = vld [vmem:[#allocation2 + $0xa3] sm:$0xff] }
 0x1be   :  { %4804 = vmatprep.subr.bf16.mxu0 %v5398_v37 }
 0x1bf   :  { %3904 = vmatmul.mubr.f32.gmra.mrb[34].mxu0 %v491_v15  ;;  %v4871_v15 = vpack.c.bf16 %v3192_v0, %v3191_v61  ;;  %v3204_v61 = vld [vmem:[%s7206_s2 + $0x308] sm:$0xff] }
 0x1c0   :  { %4163 = vmatmul.mubr.f32.gmra.mrb[8].mxu1 %v1278_v48  ;;  %3906 = vmatprep.mubr.msk.f32.mxu0 %vm5399_vm1, %v6319_v12  ;;  %v1533_v48 = vld [vmem:[#allocation2 + $0x8c] sm:$0xff]  ;;  %v1540_v0 = vld [vmem:[#allocation2 + $0xc4] sm:$0xff] }
 0x1c1   :  { %4165 = vmatprep.mubr.msk.f32.mxu1 %vm5399_vm1, %v6319_v12  ;;  %4806 = vmatpush3.bf16.msra.mxu0 %v5627_v60  ;;  %v1280_v60 = vld [vmem:[#allocation2 + $0xab] sm:$0xff] }
 0x1c2   :  { %4807 = vmatprep.subr.bf16.mxu0 %v5398_v37 }
 0x1c3   :  { %3907 = vmatmul.mubr.f32.gmra.mrb[36].mxu0 %v492_v25  ;;  %v3194_v25 = vld [vmem:[%s7206_s2 + $0x2b8] sm:$0xff] }
 0x1c4   :  { %4166 = vmatmul.mubr.f32.gmra.mrb[10].mxu1 %v1279_v54  ;;  %3909 = vmatprep.mubr.msk.f32.mxu0 %vm5399_vm1, %v6319_v12  ;;  %v1005_v54 = vld [vmem:[#allocation2 + $0x1a] sm:$0xff] }
 0x1c5   :  { %4168 = vmatprep.mubr.msk.f32.mxu1 %vm5399_vm1, %v6319_v12  ;;  %4809 = vmatpush3.bf16.msra.mxu0 %v5644_v2  ;;  %v1281_v2 = vld [vmem:[#allocation2 + $0xb3] sm:$0xff] }
 0x1c6   :  { %4810 = vmatprep.subr.bf16.mxu0 %v5398_v37 }
 0x1c7   :  { %3910 = vmatmul.mubr.f32.gmra.mrb[38].mxu0 %v7220_v11  ;;  %v1534_v11 = vld [vmem:[#allocation2 + $0x94] sm:$0xff] }
 0x1c8   :  { %4169 = vmatmul.mubr.f32.gmra.mrb[12].mxu1 %v1280_v60  ;;  %3912 = vmatprep.mubr.msk.f32.mxu0 %vm5399_vm1, %v6319_v12  ;;  %v1006_v60 = vld [vmem:[#allocation2 + $0x22] sm:$0xff] }
 0x1c9   :  { %4171 = vmatprep.mubr.msk.f32.mxu1 %vm5399_vm1, %v6319_v12  ;;  %4812 = vmatpush3.bf16.msra.mxu0 %v5661_v8  ;;  %v1282_v8 = vld [vmem:[#allocation2 + $0xbb] sm:$0xff] }
 0x1ca   :  { %4813 = vmatprep.subr.bf16.mxu0 %v5398_v37 }
 0x1cb   :  { %3913 = vmatmul.mubr.f32.gmra.mrb[40].mxu0 %v7221_v45  ;;  %v1535_v45 = vld [vmem:[#allocation2 + $0x9c] sm:$0xff] }
 0x1cc   :  { %4172 = vmatmul.mubr.f32.gmra.mrb[14].mxu1 %v1281_v2  ;;  %3915 = vmatprep.mubr.msk.f32.mxu0 %vm5399_vm1, %v6319_v12  ;;  %v1007_v2 = vld [vmem:[#allocation2 + $0x2a] sm:$0xff] }
 0x1cd   :  { %4174 = vmatprep.mubr.msk.f32.mxu1 %vm5399_vm1, %v6319_v12  ;;  %4815 = vmatpush3.bf16.msra.mxu0 %v5676_v14  ;;  %v3188_v14 = vld [vmem:[%s7206_s2 + $0x288] sm:$0xff] }
 0x1ce   :  { %4912 = vmatprep.subr.bf16.mxu0 %v5398_v37  ;;  %v4865_v13 = vpack.c.bf16 %v3188_v14, %v3187_v30  ;;  %v1008_v30 = vld [vmem:[#allocation2 + $0x32] sm:$0xff] }
 0x1cf   :  { %3916 = vmatmul.mubr.f32.gmra.mrb[42].mxu0 %v495_v31  ;;  %v3193_v31 = vld [vmem:[%s7206_s2 + $0x2b0] sm:$0xff] }
 0x1d0   :  { %4175 = vmatmul.mubr.f32.gmra.mrb[16].mxu1 %v1282_v8  ;;  %3918 = vmatprep.mubr.msk.f32.mxu0 %vm5399_vm1, %v6319_v12  ;;  %v4874_v55 = vpack.c.bf16 %v3194_v25, %v3193_v31  ;;  %v1536_v8 = vld [vmem:[#allocation2 + $0xa4] sm:$0xff]  ;;  %v1537_v14 = vld [vmem:[#allocation2 + $0xac] sm:$0xff]  ;;  %v3206_v25 = vld [vmem:[%s7206_s2 + $0x318] sm:$0xff] }
 0x1d1   :  { %4177 = vmatprep.mubr.msk.f32.mxu1 %vm5399_vm1, %v6319_v12  ;;  %v3205_v31 = vld [vmem:[%s7206_s2 + $0x310] sm:$0xff] }
 0x1d3   :  { %3919 = vmatmul.mubr.f32.gmra.mrb[44].mxu0 %v496_v7  ;;  %v1519_v7 = vld [vmem:[#allocation2 + $0x1c] sm:$0xff] }
 0x1d4   :  { %4178 = vmatmul.mubr.f32.gmra.mrb[18].mxu1 %v1283_v43  ;;  %3921 = vmatprep.mubr.msk.f32.mxu0 %vm5399_vm1, %v6319_v12  ;;  %v1009_v43 = vld [vmem:[#allocation2 + $0x3a] sm:$0xff] }
 0x1d5   :  { %4212 = vmatprep.mubr.msk.f32.mxu1 %vm5399_vm1, %v6319_v12 }
 0x1d7   :  { %3922 = vmatmul.mubr.f32.gmra.mrb[46].mxu0 %v497_v34  ;;  %v4877_v34 = vpack.c.bf16 %v3196_v62, %v3195_v50  ;;  %v1013_v50 = vld [vmem:[#allocation2 + $0x5a] sm:$0xff] }
 0x1d8   :  { %4213 = vmatmul.mubr.f32.vlgmr.msra.gmra.mrb[20].mxu1 %v1516_v46  ;;  %3924 = vmatprep.mubr.msk.f32.mxu0 %vm5399_vm1, %v6319_v12  ;;  %v1011_v46 = vld [vmem:[#allocation2 + $0x4a] sm:$0xff]  ;;  %v3207_v62 = vld [vmem:[%s7206_s2 + $0x320] sm:$0xff] }
 0x1d9   :  { %4866 = vmatpush3.bf16.msra.mxu1 %v4865_v13  ;;  %4215 = vmatprep.mubr.msk.f32.mxu1 %vm5399_vm1, %v6319_v12  ;;  %v1538_v13 = vld [vmem:[#allocation2 + $0xb4] sm:$0xff] }
 0x1da   :  { %4867 = vmatprep.subr.bf16.mxu1 %v5398_v37 }
 0x1db   :  { %3925 = vmatmul.mubr.f32.gmra.mrb[48].mxu0 %v498_v19  ;;  %v1520_v19 = vld [vmem:[#allocation2 + $0x24] sm:$0xff] }
 0x1dc   :  { %4216 = vmatmul.mubr.f32.gmra.mrb[22].mxu1 %v1517_v4  ;;  %3927 = vmatprep.mubr.msk.f32.mxu0 %vm5399_vm1, %v6319_v12 }
 0x1dd   :  { %4218 = vmatprep.mubr.msk.f32.mxu1 %vm5399_vm1, %v6319_v12  ;;  %4869 = vmatpush3.bf16.msra.mxu1 %v4868_v56  ;;  %v3203_v56 = vld [vmem:[%s7206_s2 + $0x300] sm:$0xff] }
 0x1de   :  { %4870 = vmatprep.subr.bf16.mxu1 %v5398_v37  ;;  %v4889_v4 = vpack.c.bf16 %v3204_v61, %v3203_v56  ;;  %v2036_v56 = vld [vmem:[#allocation2 + $0x36] sm:$0xff]  ;;  %v2037_v61 = vld [vmem:[#allocation2 + $0x3e] sm:$0xff] }
 0x1df   :  { %3928 = vmatmul.mubr.f32.gmra.mrb[50].mxu0 %v499_v9  ;;  %v4880_v9 = vpack.c.bf16 %v3198_v17, %v3197_v5  ;;  %v1014_v17 = vld [vmem:[#allocation2 + $0x62] sm:$0xff] }
 0x1e0   :  { %4219 = vmatmul.mubr.f32.gmra.mrb[24].mxu1 %v1518_v24  ;;  %3930 = vmatprep.mubr.msk.f32.mxu0 %vm5399_vm1, %v6319_v12  ;;  %v1773_v24 = vld [vmem:[#allocation2 + $0x5] sm:$0xff] }
 0x1e1   :  { %4221 = vmatprep.mubr.msk.f32.mxu1 %vm5399_vm1, %v6319_v12  ;;  %4872 = vmatpush3.bf16.msra.mxu1 %v4871_v15  ;;  %v1012_v15 = vld [vmem:[#allocation2 + $0x52] sm:$0xff] }
 0x1e2   :  { %4873 = vmatprep.subr.bf16.mxu1 %v5398_v37 }
 0x1e3   :  { %3931 = vmatmul.mubr.f32.gmra.mrb[52].mxu0 %v500_v6  ;;  %v3199_v6 = vld [vmem:[%s7206_s2 + $0x2e0] sm:$0xff] }
 0x1e4   :  { %4222 = vmatmul.mubr.f32.gmra.mrb[26].mxu1 %v1519_v7  ;;  %3933 = vmatprep.mubr.msk.f32.mxu0 %vm5399_vm1, %v6319_v12  ;;  %v4883_v39 = vpack.c.bf16 %v3200_v26, %v3199_v6  ;;  %v3208_v7 = vld [vmem:[%s7206_s2 + $0x328] sm:$0xff]  ;;  %v1775_v6 = vld [vmem:[#allocation2 + $0x15] sm:$0xff] }
 0x1e5   :  { %4224 = vmatprep.mubr.msk.f32.mxu1 %vm5399_vm1, %v6319_v12  ;;  %4875 = vmatpush3.bf16.msra.mxu1 %v4874_v55  ;;  %v4892_v55 = vpack.c.bf16 %v3206_v25, %v3205_v31  ;;  %v4895_v5 = vpack.c.bf16 %v3208_v7, %v3207_v62  ;;  %v2040_v62 = vld [vmem:[#allocation2 + $0x56] sm:$0xff] }
 0x1e6   :  { %4876 = vmatprep.subr.bf16.mxu1 %v5398_v37 }
 0x1e7   :  { %3934 = vmatmul.mubr.f32.gmra.mrb[54].mxu0 %v501_v53  ;;  %v7222_v53 = vmax.f32 %v5902_v32, 0.0  ;;  %v3202_v32 = vld [vmem:[%s7206_s2 + $0x2f8] sm:$0xff] }
 0x1e8   :  { %4225 = vmatmul.mubr.f32.gmra.mrb[28].mxu1 %v1520_v19  ;;  %3936 = vmatprep.mubr.msk.f32.mxu0 %vm5399_vm1, %v6319_v12  ;;  %v4886_v51 = vpack.c.bf16 %v3202_v32, %v3201_v22  ;;  %v3209_v19 = vld [vmem:[%s7206_s2 + $0x330] sm:$0xff]  ;;  %v1776_v22 = vld [vmem:[#allocation2 + $0x1d] sm:$0xff] }
 0x1e9   :  { %4227 = vmatprep.mubr.msk.f32.mxu1 %vm5399_vm1, %v6319_v12  ;;  %4878 = vmatpush3.bf16.msra.mxu1 %v4877_v34  ;;  %v1774_v34 = vld [vmem:[#allocation2 + $0xd] sm:$0xff] }
 0x1ea   :  { %4879 = vmatprep.subr.bf16.mxu1 %v5398_v37 }
 0x1eb   :  { %3937 = vmatmul.mubr.f32.gmra.mrb[56].mxu0 %v7222_v53  ;;  %v1015_v53 = vld [vmem:[#allocation2 + $0x6a] sm:$0xff] }
 0x1ec   :  { %4228 = vmatmul.mubr.f32.gmra.mrb[30].mxu1 %v1521_v38  ;;  %3939 = vmatprep.mubr.msk.f32.mxu0 %vm5399_vm1, %v6319_v12  ;;  %v3211_v38 = vld [vmem:[%s7206_s2 + $0x340] sm:$0xff] }
 0x1ed   :  { %4230 = vmatprep.mubr.msk.f32.mxu1 %vm5399_vm1, %v6319_v12  ;;  %4881 = vmatpush3.bf16.msra.mxu1 %v4880_v9  ;;  %v3210_v9 = vld [vmem:[%s7206_s2 + $0x338] sm:$0xff] }
 0x1ee   :  { %4882 = vmatprep.subr.bf16.mxu1 %v5398_v37  ;;  %v4898_v26 = vpack.c.bf16 %v3210_v9, %v3209_v19  ;;  %v2042_v9 = vld [vmem:[#allocation2 + $0x66] sm:$0xff] }
 0x1ef   :  { %3940 = vmatmul.mubr.f32.gmra.mrb[58].mxu0 %v7223_v33  ;;  %v1016_v33 = vld [vmem:[#allocation2 + $0x72] sm:$0xff] }
 0x1f0   :  { %4231 = vmatmul.mubr.f32.gmra.mrb[32].mxu1 %v1522_v36  ;;  %3942 = vmatprep.mubr.msk.f32.mxu0 %vm5399_vm1, %v6319_v12  ;;  %v3213_v36 = vld [vmem:[%s7206_s2 + $0x350] sm:$0xff] }
 0x1f1   :  { %4233 = vmatprep.mubr.msk.f32.mxu1 %vm5399_vm1, %v6319_v12  ;;  %4884 = vmatpush3.bf16.msra.mxu1 %v4883_v39  ;;  %v3212_v39 = vld [vmem:[%s7206_s2 + $0x348] sm:$0xff] }
 0x1f2   :  { %4885 = vmatprep.subr.bf16.mxu1 %v5398_v37  ;;  %v4901_v32 = vpack.c.bf16 %v3212_v39, %v3211_v38 }
 0x1f3   :  { %3943 = vmatmul.mubr.f32.gmra.mrb[60].mxu0 %v7224_v52  ;;  %v1777_v52 = vld [vmem:[#allocation2 + $0x25] sm:$0xff] }
 0x1f4   :  { %4234 = vmatmul.mubr.f32.gmra.mrb[34].mxu1 %v1523_v59  ;;  %3945 = vmatprep.mubr.msk.f32.mxu0 %vm5399_vm1, %v6319_v12 }
 0x1f5   :  { %4236 = vmatprep.mubr.msk.f32.mxu1 %vm5399_vm1, %v6319_v12  ;;  %4887 = vmatpush3.bf16.msra.mxu1 %v4886_v51  ;;  %v3214_v51 = vld [vmem:[%s7206_s2 + $0x358] sm:$0xff] }
 0x1f6   :  { %4888 = vmatprep.subr.bf16.mxu1 %v5398_v37  ;;  %v4904_v59 = vpack.c.bf16 %v3214_v51, %v3213_v36  ;;  %v2045_v36 = vld [vmem:[#allocation2 + $0x7e] sm:$0xff] }
 0x1f7   :  { %3946 = vmatmul.mubr.f32.gmra.mrb[62].mxu0 %v7225_v41  ;;  %v3215_v41 = vld [vmem:[%s7206_s2 + $0x360] sm:$0xff] }
 0x1f8   :  { %4237 = vmatmul.mubr.f32.gmra.mrb[36].mxu1 %v1524_v27  ;;  %3948 = vmatprep.mubr.msk.f32.mxu0 %vm5399_vm1, %v6319_v12  ;;  %v3216_v27 = vld [vmem:[%s7206_s2 + $0x368] sm:$0xff] }
 0x1f9   :  { %4239 = vmatprep.mubr.msk.f32.mxu1 %vm5399_vm1, %v6319_v12 }
 0x1fb   :  { %3949 = vmatmul.mubr.f32.gmra.mrb[64].mxu0 %v7226_v57  ;;  %v1778_v57 = vld [vmem:[#allocation2 + $0x2d] sm:$0xff] }
 0x1fc   :  { %4240 = vmatmul.mubr.f32.gmra.mrb[38].mxu1 %v1525_v29  ;;  %3951 = vmatprep.mubr.msk.f32.mxu0 %vm5399_vm1, %v6319_v12  ;;  %v4907_v29 = vpack.c.bf16 %v3216_v27, %v3215_v41 }
 0x1fd   :  { %4242 = vmatprep.mubr.msk.f32.mxu1 %vm5399_vm1, %v6319_v12 }
 0x1ff   :  { %3952 = vmatmul.mubr.f32.gmra.mrb[66].mxu0 %v7227_v58  ;;  %v3217_v58 = vld [vmem:[%s7206_s2 + $0x370] sm:$0xff] }
 0x200   :  { %4243 = vmatmul.mubr.f32.gmra.mrb[40].mxu1 %v1526_v49  ;;  %3954 = vmatprep.mubr.msk.f32.mxu0 %vm5399_vm1, %v6319_v12  ;;  %v3218_v49 = vld [vmem:[%s7206_s2 + $0x378] sm:$0xff] }
 0x201   :  { %4245 = vmatprep.mubr.msk.f32.mxu1 %vm5399_vm1, %v6319_v12 }
 0x203   :  { %3955 = vmatmul.mubr.f32.gmra.mrb[68].mxu0 %v7228_v63  ;;  %v1779_v63 = vld [vmem:[#allocation2 + $0x35] sm:$0xff] }
 0x204   :  { %4246 = vmatmul.mubr.f32.gmra.mrb[42].mxu1 %v1527_v40  ;;  %3957 = vmatprep.mubr.msk.f32.mxu0 %vm5399_vm1, %v6319_v12  ;;  %v4910_v40 = vpack.c.bf16 %v3218_v49, %v3217_v58  ;;  %v2048_v49 = vld [vmem:[#allocation2 + $0x96] sm:$0xff] }
 0x205   :  { %4248 = vmatprep.mubr.msk.f32.mxu1 %vm5399_vm1, %v6319_v12 }
 0x207   :  { %3958 = vmatmul.mubr.f32.gmra.mrb[70].mxu0 %v509_v20  ;;  %v1530_v20 = vld [vmem:[#allocation2 + $0x74] sm:$0xff] }
 0x208   :  { %4249 = vmatmul.mubr.f32.gmra.mrb[44].mxu1 %v1528_v1  ;;  %3960 = vmatprep.mubr.msk.f32.mxu0 %vm5399_vm1, %v6319_v12  ;;  %v1780_v1 = vld [vmem:[#allocation2 + $0x3d] sm:$0xff] }
 0x209   :  { %4251 = vmatprep.mubr.msk.f32.mxu1 %vm5399_vm1, %v6319_v12 }
 0x20b   :  { %3961 = vmatmul.mubr.f32.gmra.mrb[72].mxu0 %v7229_v10  ;;  %v1781_v10 = vld [vmem:[#allocation2 + $0x45] sm:$0xff] }
 0x20c   :  { %4252 = vmatmul.mubr.f32.gmra.mrb[46].mxu1 %v1529_v47  ;;  %3963 = vmatprep.mubr.msk.f32.mxu0 %vm5399_vm1, %v6319_v12  ;;  %v1782_v47 = vld [vmem:[#allocation2 + $0x4d] sm:$0xff] }
 0x20d   :  { %4254 = vmatprep.mubr.msk.f32.mxu1 %vm5399_vm1, %v6319_v12 }
 0x20f   :  { %3964 = vmatmul.mubr.f32.gmra.mrb[74].mxu0 %v563_v3  ;;  %v1783_v3 = vld [vmem:[#allocation2 + $0x55] sm:$0xff] }
 0x210   :  { %4255 = vmatmul.mubr.f32.gmra.mrb[48].mxu1 %v1530_v20  ;;  %3998 = vmatprep.mubr.msk.f32.mxu0 %vm5399_vm1, %v6319_v12  ;;  %v1784_v20 = vld [vmem:[#allocation2 + $0x5d] sm:$0xff] }
 0x211   :  { %4257 = vmatprep.mubr.msk.f32.mxu1 %vm5399_vm1, %v6319_v12 }
 0x213   :  { %3999 = vmatmul.mubr.f32.vlgmr.msra.gmra.mrb[26].mxu0 %v1002_v28  ;;  %v1785_v28 = vld [vmem:[#allocation2 + $0x65] sm:$0xff] }
 0x214   :  { %4258 = vmatmul.mubr.f32.gmra.mrb[0].mxu1 %v1531_v18  ;;  %4001 = vmatprep.mubr.msk.f32.mxu0 %vm5399_vm1, %v6319_v12  ;;  %v1786_v18 = vld [vmem:[#allocation2 + $0x6d] sm:$0xff] }
 0x215   :  { %4260 = vmatprep.mubr.msk.f32.mxu1 %vm5399_vm1, %v6319_v12 }
 0x217   :  { %4002 = vmatmul.mubr.f32.gmra.mrb[28].mxu0 %v1003_v16  ;;  %v1787_v16 = vld [vmem:[#allocation2 + $0x75] sm:$0xff] }
 0x218   :  { %4261 = vmatmul.mubr.f32.gmra.mrb[2].mxu1 %v1532_v35  ;;  %4004 = vmatprep.mubr.msk.f32.mxu0 %vm5399_vm1, %v6319_v12  ;;  %v1788_v35 = vld [vmem:[#allocation2 + $0x7d] sm:$0xff] }
 0x219   :  { %4263 = vmatprep.mubr.msk.f32.mxu1 %vm5399_vm1, %v6319_v12 }
 0x21b   :  { %4005 = vmatmul.mubr.f32.gmra.mrb[30].mxu0 %v1004_v42  ;;  %v1789_v42 = vld [vmem:[#allocation2 + $0x85] sm:$0xff] }
 0x21c   :  { %4264 = vmatmul.mubr.f32.gmra.mrb[4].mxu1 %v1533_v48  ;;  %4007 = vmatprep.mubr.msk.f32.mxu0 %vm5399_vm1, %v6319_v12  ;;  %v1790_v48 = vld [vmem:[#allocation2 + $0x8d] sm:$0xff] }
 0x21d   :  { %4266 = vmatprep.mubr.msk.f32.mxu1 %vm5399_vm1, %v6319_v12 }
 0x21f   :  { %4008 = vmatmul.mubr.f32.gmra.mrb[32].mxu0 %v1005_v54  ;;  %v1791_v54 = vld [vmem:[#allocation2 + $0x95] sm:$0xff] }
 0x220   :  { %4267 = vmatmul.mubr.f32.gmra.mrb[6].mxu1 %v1534_v11  ;;  %4010 = vmatprep.mubr.msk.f32.mxu0 %vm5399_vm1, %v6319_v12  ;;  %v1792_v11 = vld [vmem:[#allocation2 + $0x9d] sm:$0xff] }
 0x221   :  { %4269 = vmatprep.mubr.msk.f32.mxu1 %vm5399_vm1, %v6319_v12 }
 0x223   :  { %4011 = vmatmul.mubr.f32.gmra.mrb[34].mxu0 %v1006_v60  ;;  %v1793_v60 = vld [vmem:[#allocation2 + $0xa5] sm:$0xff] }
 0x224   :  { %4270 = vmatmul.mubr.f32.gmra.mrb[8].mxu1 %v1535_v45  ;;  %4013 = vmatprep.mubr.msk.f32.mxu0 %vm5399_vm1, %v6319_v12  ;;  %v1794_v45 = vld [vmem:[#allocation2 + $0xad] sm:$0xff] }
 0x225   :  { %4272 = vmatprep.mubr.msk.f32.mxu1 %vm5399_vm1, %v6319_v12 }
 0x227   :  { %4014 = vmatmul.mubr.f32.gmra.mrb[36].mxu0 %v1007_v2  ;;  %v1795_v2 = vld [vmem:[#allocation2 + $0xb5] sm:$0xff] }
 0x228   :  { %4273 = vmatmul.mubr.f32.gmra.mrb[10].mxu1 %v1536_v8  ;;  %4016 = vmatprep.mubr.msk.f32.mxu0 %vm5399_vm1, %v6319_v12  ;;  %v1796_v8 = vld [vmem:[#allocation2 + $0xbd] sm:$0xff] }
 0x229   :  { %4275 = vmatprep.mubr.msk.f32.mxu1 %vm5399_vm1, %v6319_v12 }
 0x22b   :  { %4017 = vmatmul.mubr.f32.gmra.mrb[38].mxu0 %v1008_v30  ;;  %v1797_v30 = vld [vmem:[#allocation2 + $0xc5] sm:$0xff] }
 0x22c   :  { %4276 = vmatmul.mubr.f32.gmra.mrb[12].mxu1 %v1537_v14  ;;  %4019 = vmatprep.mubr.msk.f32.mxu0 %vm5399_vm1, %v6319_v12  ;;  %v2030_v14 = vld [vmem:[#allocation2 + $0x6] sm:$0xff] }
 0x22d   :  { %4278 = vmatprep.mubr.msk.f32.mxu1 %vm5399_vm1, %v6319_v12 }
 0x22f   :  { %4020 = vmatmul.mubr.f32.gmra.mrb[40].mxu0 %v1009_v43  ;;  %v2031_v43 = vld [vmem:[#allocation2 + $0xe] sm:$0xff] }
 0x230   :  { %4279 = vmatmul.mubr.f32.gmra.mrb[14].mxu1 %v1538_v13  ;;  %4022 = vmatprep.mubr.msk.f32.mxu0 %vm5399_vm1, %v6319_v12  ;;  %v2032_v13 = vld [vmem:[#allocation2 + $0x16] sm:$0xff] }
 0x231   :  { %4281 = vmatprep.mubr.msk.f32.mxu1 %vm5399_vm1, %v6319_v12 }
 0x233   :  { %4023 = vmatmul.mubr.f32.gmra.mrb[42].mxu0 %v1010_v21  ;;  %v2033_v21 = vld [vmem:[#allocation2 + $0x1e] sm:$0xff] }
 0x234   :  { %4282 = vmatmul.mubr.f32.gmra.mrb[16].mxu1 %v1539_v44  ;;  %4025 = vmatprep.mubr.msk.f32.mxu0 %vm5399_vm1, %v6319_v12  ;;  %v2034_v44 = vld [vmem:[#allocation2 + $0x26] sm:$0xff] }
 0x235   :  { %4284 = vmatprep.mubr.msk.f32.mxu1 %vm5399_vm1, %v6319_v12 }
 0x237   :  { %4026 = vmatmul.mubr.f32.gmra.mrb[44].mxu0 %v1011_v46  ;;  %v2035_v46 = vld [vmem:[#allocation2 + $0x2e] sm:$0xff] }
 0x238   :  { %4285 = vmatmul.mubr.f32.gmra.mrb[18].mxu1 %v1540_v0  ;;  %4028 = vmatprep.mubr.msk.f32.mxu0 %vm5399_vm1, %v6319_v12 }
 0x239   :  { %4319 = vmatprep.mubr.msk.f32.mxu1 %vm5399_vm1, %v6319_v12 }
 0x23b   :  { %4029 = vmatmul.mubr.f32.gmra.mrb[46].mxu0 %v1012_v15  ;;  %v2038_v15 = vld [vmem:[#allocation2 + $0x46] sm:$0xff] }
 0x23c   :  { %4320 = vmatmul.mubr.f32.vlgmr.msra.gmra.mrb[20].mxu1 %v1773_v24  ;;  %4031 = vmatprep.mubr.msk.f32.mxu0 %vm5399_vm1, %v6319_v12  ;;  %v2039_v24 = vld [vmem:[#allocation2 + $0x4e] sm:$0xff] }
 0x23d   :  { %4890 = vmatpush3.bf16.msra.mxu1 %v4889_v4  ;;  %4322 = vmatprep.mubr.msk.f32.mxu1 %vm5399_vm1, %v6319_v12 }
 0x23e   :  { %4891 = vmatprep.subr.bf16.mxu1 %v5398_v37 }
 0x23f   :  { %4032 = vmatmul.mubr.f32.gmra.mrb[48].mxu0 %v1013_v50 }
 0x240   :  { %4323 = vmatmul.mubr.f32.gmra.mrb[22].mxu1 %v1774_v34  ;;  %4034 = vmatprep.mubr.msk.f32.mxu0 %vm5399_vm1, %v6319_v12 }
 0x241   :  { %4325 = vmatprep.mubr.msk.f32.mxu1 %vm5399_vm1, %v6319_v12  ;;  %4893 = vmatpush3.bf16.msra.mxu1 %v4892_v55 }
 0x242   :  { %4894 = vmatprep.subr.bf16.mxu1 %v5398_v37 }
 0x243   :  { %4035 = vmatmul.mubr.f32.gmra.mrb[50].mxu0 %v1014_v17 }
 0x244   :  { %4326 = vmatmul.mubr.f32.gmra.mrb[24].mxu1 %v1775_v6  ;;  %4037 = vmatprep.mubr.msk.f32.mxu0 %vm5399_vm1, %v6319_v12 }
 0x245   :  { %4328 = vmatprep.mubr.msk.f32.mxu1 %vm5399_vm1, %v6319_v12  ;;  %4896 = vmatpush3.bf16.msra.mxu1 %v4895_v5  ;;  %v2041_v5 = vld [vmem:[#allocation2 + $0x5e] sm:$0xff] }
 0x246   :  { %4897 = vmatprep.subr.bf16.mxu1 %v5398_v37 }
 0x247   :  { %4038 = vmatmul.mubr.f32.gmra.mrb[52].mxu0 %v1015_v53  ;;  %v2043_v53 = vld [vmem:[#allocation2 + $0x6e] sm:$0xff] }
 0x248   :  { %4329 = vmatmul.mubr.f32.gmra.mrb[26].mxu1 %v1776_v22  ;;  %4040 = vmatprep.mubr.msk.f32.mxu0 %vm5399_vm1, %v6319_v12  ;;  %v2044_v22 = vld [vmem:[#allocation2 + $0x76] sm:$0xff] }
 0x249   :  { %4331 = vmatprep.mubr.msk.f32.mxu1 %vm5399_vm1, %v6319_v12  ;;  %4899 = vmatpush3.bf16.msra.mxu1 %v4898_v26 }
 0x24a   :  { %4900 = vmatprep.subr.bf16.mxu1 %v5398_v37 }
 0x24b   :  { %4041 = vmatmul.mubr.f32.gmra.mrb[54].mxu0 %v1016_v33 }
 0x24c   :  { %4332 = vmatmul.mubr.f32.gmra.mrb[28].mxu1 %v1777_v52  ;;  %4533 = vmatprep.mubr.msk.f32.mxu0 %vm5399_vm1, %v6319_v12 }
 0x24d   :  { %4334 = vmatprep.mubr.msk.f32.mxu1 %vm5399_vm1, %v6319_v12  ;;  %4902 = vmatpush3.bf16.msra.mxu1 %v4901_v32 }
 0x24e   :  { %4903 = vmatprep.subr.bf16.mxu1 %v5398_v37 }
 0x250   :  { %4335 = vmatmul.mubr.f32.gmra.mrb[30].mxu1 %v1778_v57  ;;  %v2047_v57 = vld [vmem:[#allocation2 + $0x8e] sm:$0xff] }
 0x251   :  { %4337 = vmatprep.mubr.msk.f32.mxu1 %vm5399_vm1, %v6319_v12  ;;  %4905 = vmatpush3.bf16.msra.mxu1 %v4904_v59  ;;  %v2046_v59 = vld [vmem:[#allocation2 + $0x86] sm:$0xff] }
 0x252   :  { %4906 = vmatprep.subr.bf16.mxu1 %v5398_v37 }
 0x254   :  { %4338 = vmatmul.mubr.f32.gmra.mrb[32].mxu1 %v1779_v63 }
 0x255   :  { %4340 = vmatprep.mubr.msk.f32.mxu1 %vm5399_vm1, %v6319_v12  ;;  %4908 = vmatpush3.bf16.msra.mxu1 %v4907_v29 }
 0x256   :  { %4909 = vmatprep.subr.bf16.mxu1 %v5398_v37 }
 0x258   :  { %4341 = vmatmul.mubr.f32.gmra.mrb[34].mxu1 %v1780_v1  ;;  %v2049_v1 = vld [vmem:[#allocation2 + $0x9e] sm:$0xff] }
 0x259   :  { %4343 = vmatprep.mubr.msk.f32.mxu1 %vm5399_vm1, %v6319_v12  ;;  %4911 = vmatpush3.bf16.msra.mxu1 %v4910_v40 }
 0x25c   :  { %4344 = vmatmul.mubr.f32.gmra.mrb[36].mxu1 %v1781_v10 }
 0x25d   :  { %4346 = vmatprep.mubr.msk.f32.mxu1 %vm5399_vm1, %v6319_v12 }
 0x260   :  { %4347 = vmatmul.mubr.f32.gmra.mrb[38].mxu1 %v1782_v47 }
 0x261   :  { %4349 = vmatprep.mubr.msk.f32.mxu1 %vm5399_vm1, %v6319_v12 }
 0x264   :  { %4350 = vmatmul.mubr.f32.gmra.mrb[40].mxu1 %v1783_v3  ;;  %v2050_v3 = vld [vmem:[#allocation2 + $0xa6] sm:$0xff] }
 0x265   :  { %4352 = vmatprep.mubr.msk.f32.mxu1 %vm5399_vm1, %v6319_v12 }
 0x268   :  { %4353 = vmatmul.mubr.f32.gmra.mrb[42].mxu1 %v1784_v20 }
 0x269   :  { %4355 = vmatprep.mubr.msk.f32.mxu1 %vm5399_vm1, %v6319_v12 }
 0x26c   :  { %4356 = vmatmul.mubr.f32.gmra.mrb[44].mxu1 %v1785_v28 }
 0x26d   :  { %4358 = vmatprep.mubr.msk.f32.mxu1 %vm5399_vm1, %v6319_v12 }
 0x270   :  { %4359 = vmatmul.mubr.f32.gmra.mrb[46].mxu1 %v1786_v18  ;;  %v2051_v18 = vld [vmem:[#allocation2 + $0xae] sm:$0xff] }
 0x271   :  { %4361 = vmatprep.mubr.msk.f32.mxu1 %vm5399_vm1, %v6319_v12 }
 0x274   :  { %4362 = vmatmul.mubr.f32.gmra.mrb[48].mxu1 %v1787_v16 }
 0x275   :  { %4364 = vmatprep.mubr.msk.f32.mxu1 %vm5399_vm1, %v6319_v12 }
 0x278   :  { %4365 = vmatmul.mubr.f32.gmra.mrb[0].mxu1 %v1788_v35 }
 0x279   :  { %4367 = vmatprep.mubr.msk.f32.mxu1 %vm5399_vm1, %v6319_v12 }
 0x27c   :  { %4368 = vmatmul.mubr.f32.gmra.mrb[2].mxu1 %v1789_v42  ;;  %v2052_v42 = vld [vmem:[#allocation2 + $0xb6] sm:$0xff] }
 0x27d   :  { %4370 = vmatprep.mubr.msk.f32.mxu1 %vm5399_vm1, %v6319_v12 }
 0x280   :  { %4371 = vmatmul.mubr.f32.gmra.mrb[4].mxu1 %v1790_v48 }
 0x281   :  { %4373 = vmatprep.mubr.msk.f32.mxu1 %vm5399_vm1, %v6319_v12 }
 0x284   :  { %4374 = vmatmul.mubr.f32.gmra.mrb[6].mxu1 %v1791_v54 }
 0x285   :  { %4376 = vmatprep.mubr.msk.f32.mxu1 %vm5399_vm1, %v6319_v12 }
 0x288   :  { %4377 = vmatmul.mubr.f32.gmra.mrb[8].mxu1 %v1792_v11  ;;  %v2053_v11 = vld [vmem:[#allocation2 + $0xbe] sm:$0xff] }
 0x289   :  { %4379 = vmatprep.mubr.msk.f32.mxu1 %vm5399_vm1, %v6319_v12 }
 0x28c   :  { %4380 = vmatmul.mubr.f32.gmra.mrb[10].mxu1 %v1793_v60 }
 0x28d   :  { %4382 = vmatprep.mubr.msk.f32.mxu1 %vm5399_vm1, %v6319_v12 }
 0x290   :  { %4383 = vmatmul.mubr.f32.gmra.mrb[12].mxu1 %v1794_v45 }
 0x291   :  { %4385 = vmatprep.mubr.msk.f32.mxu1 %vm5399_vm1, %v6319_v12 }
 0x294   :  { %4386 = vmatmul.mubr.f32.gmra.mrb[14].mxu1 %v1795_v2  ;;  %v2054_v2 = vld [vmem:[#allocation2 + $0xc6] sm:$0xff] }
 0x295   :  { %4388 = vmatprep.mubr.msk.f32.mxu1 %vm5399_vm1, %v6319_v12 }
 0x298   :  { %4389 = vmatmul.mubr.f32.gmra.mrb[16].mxu1 %v1796_v8 }
 0x299   :  { %4391 = vmatprep.mubr.msk.f32.mxu1 %vm5399_vm1, %v6319_v12 }
 0x29c   :  { %4392 = vmatmul.mubr.f32.gmra.mrb[18].mxu1 %v1797_v30 }
 0x29d   :  { %4426 = vmatprep.mubr.msk.f32.mxu1 %vm5399_vm1, %v6319_v12 }
 0x2a0   :  { %4427 = vmatmul.mubr.f32.vlgmr.msra.gmra.mrb[20].mxu1 %v2030_v14 }
 0x2a1   :  { %4429 = vmatprep.mubr.msk.f32.mxu1 %vm5399_vm1, %v6319_v12 }
 0x2a4   :  { %4430 = vmatmul.mubr.f32.gmra.mrb[22].mxu1 %v2031_v43 }
 0x2a5   :  { %4432 = vmatprep.mubr.msk.f32.mxu1 %vm5399_vm1, %v6319_v12 }
 0x2a8   :  { %4433 = vmatmul.mubr.f32.gmra.mrb[24].mxu1 %v2032_v13 }
 0x2a9   :  { %4435 = vmatprep.mubr.msk.f32.mxu1 %vm5399_vm1, %v6319_v12 }
 0x2ac   :  { %4436 = vmatmul.mubr.f32.gmra.mrb[26].mxu1 %v2033_v21 }
 0x2ad   :  { %4438 = vmatprep.mubr.msk.f32.mxu1 %vm5399_vm1, %v6319_v12 }
 0x2b0   :  { %4439 = vmatmul.mubr.f32.gmra.mrb[28].mxu1 %v2034_v44 }
 0x2b1   :  { %4441 = vmatprep.mubr.msk.f32.mxu1 %vm5399_vm1, %v6319_v12 }
 0x2b4   :  { %4442 = vmatmul.mubr.f32.gmra.mrb[30].mxu1 %v2035_v46 }
 0x2b5   :  { %4444 = vmatprep.mubr.msk.f32.mxu1 %vm5399_vm1, %v6319_v12 }
 0x2b8   :  { %4445 = vmatmul.mubr.f32.gmra.mrb[32].mxu1 %v2036_v56 }
 0x2b9   :  { %4447 = vmatprep.mubr.msk.f32.mxu1 %vm5399_vm1, %v6319_v12 }
 0x2bc   :  { %4448 = vmatmul.mubr.f32.gmra.mrb[34].mxu1 %v2037_v61 }
 0x2bd   :  { %4450 = vmatprep.mubr.msk.f32.mxu1 %vm5399_vm1, %v6319_v12 }
 0x2be   :  { %v6716_v0 = vpop.f32.mrb[56].mxu0 }
 0x2bf   :  { %v3938_v4 = vpop.f32.mrb[57].mxu0 }
 0x2c0   :  { %4451 = vmatmul.mubr.f32.gmra.mrb[36].mxu1 %v2038_v15 }
 0x2c1   :  { %4453 = vmatprep.mubr.msk.f32.mxu1 %vm5399_vm1, %v6319_v12 }
 0x2c2   :  { %v6720_v31 = vpop.f32.mrb[58].mxu0 }
 0x2c3   :  { %v3941_v25 = vpop.f32.mrb[59].mxu0 }
 0x2c4   :  { %4454 = vmatmul.mubr.f32.gmra.mrb[38].mxu1 %v2039_v24 }
 0x2c5   :  { %4456 = vmatprep.mubr.msk.f32.mxu1 %vm5399_vm1, %v6319_v12 }
 0x2c6   :  { %v6724_v55 = vpop.f32.mrb[60].mxu0 }
 0x2c7   :  { %v3944_v50 = vpop.f32.mrb[61].mxu0 }
 0x2c8   :  { %4457 = vmatmul.mubr.f32.gmra.mrb[40].mxu1 %v2040_v62 }
 0x2c9   :  { %4459 = vmatprep.mubr.msk.f32.mxu1 %vm5399_vm1, %v6319_v12 }
 0x2ca   :  { %v6728_v7 = vpop.f32.mrb[62].mxu0 }
 0x2cb   :  { %v3947_v34 = vpop.f32.mrb[63].mxu0 }
 0x2cc   :  { %4460 = vmatmul.mubr.f32.gmra.mrb[42].mxu1 %v2041_v5 }
 0x2cd   :  { %4462 = vmatprep.mubr.msk.f32.mxu1 %vm5399_vm1, %v6319_v12 }
 0x2ce   :  { %v6732_v17 = vpop.f32.mrb[64].mxu0 }
 0x2cf   :  { %v3950_v19 = vpop.f32.mrb[65].mxu0 }
 0x2d0   :  { %4463 = vmatmul.mubr.f32.gmra.mrb[44].mxu1 %v2042_v9 }
 0x2d1   :  { %4465 = vmatprep.mubr.msk.f32.mxu1 %vm5399_vm1, %v6319_v12 }
 0x2d2   :  { %v6736_v6 = vpop.f32.mrb[66].mxu0 }
 0x2d3   :  { %v3953_v26 = vpop.f32.mrb[67].mxu0 }
 0x2d4   :  { %4466 = vmatmul.mubr.f32.gmra.mrb[46].mxu1 %v2043_v53 }
 0x2d5   :  { %4468 = vmatprep.mubr.msk.f32.mxu1 %vm5399_vm1, %v6319_v12 }
 0x2d6   :  { %v6740_v38 = vpop.f32.mrb[68].mxu0 }
 0x2d7   :  { %v3956_v39 = vpop.f32.mrb[69].mxu0 }
 0x2d8   :  { %4469 = vmatmul.mubr.f32.gmra.mrb[48].mxu1 %v2044_v22 }
 0x2d9   :  { %4471 = vmatprep.mubr.msk.f32.mxu1 %vm5399_vm1, %v6319_v12 }
 0x2da   :  { %v6744_v32 = vpop.f32.mrb[70].mxu0 }
 0x2db   :  { %v3959_v33 = vpop.f32.mrb[71].mxu0 }
 0x2dc   :  { %4472 = vmatmul.mubr.f32.gmra.mrb[0].mxu1 %v2045_v36 }
 0x2dd   :  { %4474 = vmatprep.mubr.msk.f32.mxu1 %vm5399_vm1, %v6319_v12 }
 0x2de   :  { %v6748_v51 = vpop.f32.mrb[72].mxu0 }
 0x2df   :  { %v3962_v52 = vpop.f32.mrb[73].mxu0 }
 0x2e0   :  { %4475 = vmatmul.mubr.f32.gmra.mrb[2].mxu1 %v2046_v59 }
 0x2e1   :  { %4477 = vmatprep.mubr.msk.f32.mxu1 %vm5399_vm1, %v6319_v12 }
 0x2e2   :  { %v6752_v41 = vpop.f32.mrb[74].mxu0 }
 0x2e3   :  { %v3965_v27 = vpop.f32.mrb[75].mxu0 }
 0x2e4   :  { %4478 = vmatmul.mubr.f32.gmra.mrb[4].mxu1 %v2047_v57 }
 0x2e5   :  { %4480 = vmatprep.mubr.msk.f32.mxu1 %vm5399_vm1, %v6319_v12 }
 0x2e6   :  { %v1110_v29 = vpop.f32.mrb[26].mxu0 }
 0x2e7   :  { %v4000_v58 = vpop.f32.mrb[27].mxu0 }
 0x2e8   :  { %4481 = vmatmul.mubr.f32.gmra.mrb[6].mxu1 %v2048_v49 }
 0x2e9   :  { %4483 = vmatprep.mubr.msk.f32.mxu1 %vm5399_vm1, %v6319_v12 }
 0x2ea   :  { %v1115_v63 = vpop.f32.mrb[28].mxu0 }
 0x2eb   :  { %v4003_v40 = vpop.f32.mrb[29].mxu0 }
 0x2ec   :  { %4484 = vmatmul.mubr.f32.gmra.mrb[8].mxu1 %v2049_v1  ;;  %v3220_v1 = vld [vmem:[%s7207_s3 + $0x88] sm:$0xff] }
 0x2ed   :  { %4486 = vmatprep.mubr.msk.f32.mxu1 %vm5399_vm1, %v6319_v12 }
 0x2ee   :  { %v1120_v10 = vpop.f32.mrb[30].mxu0 }
 0x2ef   :  { %v4006_v47 = vpop.f32.mrb[31].mxu0 }
 0x2f0   :  { %4487 = vmatmul.mubr.f32.gmra.mrb[10].mxu1 %v2050_v3 }
 0x2f1   :  { %4489 = vmatprep.mubr.msk.f32.mxu1 %vm5399_vm1, %v6319_v12 }
 0x2f2   :  { %v1125_v20 = vpop.f32.mrb[32].mxu0 }
 0x2f3   :  { %v4009_v28 = vpop.f32.mrb[33].mxu0 }
 0x2f4   :  { %4490 = vmatmul.mubr.f32.gmra.mrb[12].mxu1 %v2051_v18 }
 0x2f5   :  { %4492 = vmatprep.mubr.msk.f32.mxu1 %vm5399_vm1, %v6319_v12 }
 0x2f6   :  { %v1130_v16 = vpop.f32.mrb[34].mxu0 }
 0x2f7   :  { %v4012_v35 = vpop.f32.mrb[35].mxu0 }
 0x2f8   :  { %4493 = vmatmul.mubr.f32.gmra.mrb[14].mxu1 %v2052_v42  ;;  %v3223_v35 = vld [vmem:[%s7207_s3 + $0xa0] sm:$0xff]  ;;  %v3224_v42 = vld [vmem:[%s7207_s3 + $0xa8] sm:$0xff] }
 0x2f9   :  { %4495 = vmatprep.mubr.msk.f32.mxu1 %vm5399_vm1, %v6319_v12 }
 0x2fa   :  { %v1135_v48 = vpop.f32.mrb[36].mxu0 }
 0x2fb   :  { %v4015_v54 = vpop.f32.mrb[37].mxu0 }
 0x2fc   :  { %4496 = vmatmul.mubr.f32.gmra.mrb[16].mxu1 %v2053_v11 }
 0x2fd   :  { %4498 = vmatprep.mubr.msk.f32.mxu1 %vm5399_vm1, %v6319_v12 }
 0x2fe   :  { %v1140_v60 = vpop.f32.mrb[38].mxu0 }
 0x2ff   :  { %v4018_v45 = vpop.f32.mrb[39].mxu0 }
 0x300   :  { %4499 = vmatmul.mubr.f32.gmra.mrb[18].mxu1 %v2054_v2  ;;  %v4919_v45 = vpack.c.bf16 %v3224_v42, %v3223_v35  ;;  %v3226_v2 = vld [vmem:[%s7207_s3 + $0xb8] sm:$0xff] }
 0x302   :  { %v1145_v8 = vpop.f32.mrb[40].mxu0 }
 0x303   :  { %v4021_v30 = vpop.f32.mrb[41].mxu0 }
 0x306   :  { %v1150_v14 = vpop.f32.mrb[42].mxu0 }
 0x307   :  { %v4024_v43 = vpop.f32.mrb[43].mxu0 }
 0x30a   :  { %v6768_v13 = vpop.f32.mrb[44].mxu0 }
 0x30b   :  { %v4027_v21 = vpop.f32.mrb[45].mxu0 }
 0x30e   :  { %v6770_v44 = vpop.f32.mrb[46].mxu0 }
 0x30f   :  { %v4030_v46 = vpop.f32.mrb[47].mxu0 }
 0x312   :  { %v6772_v56 = vpop.f32.mrb[48].mxu0 }
 0x313   :  { %v4033_v61 = vpop.f32.mrb[49].mxu0 }
 0x314   :  { %v3228_v61 = vld [vmem:[%s7207_s3 + $0xc8] sm:$0xff] }
 0x316   :  { %v1170_v4 = vpop.f32.mrb[50].mxu0 }
 0x317   :  { %v4036_v15 = vpop.f32.mrb[51].mxu0 }
 0x31a   :  { %v6774_v25 = vpop.f32.mrb[52].mxu0 }
 0x31b   :  { %v4039_v24 = vpop.f32.mrb[53].mxu0 }
 0x31e   :  { %v6776_v50 = vpop.f32.mrb[54].mxu0 }
 0x31f   :  { %v4042_v62 = vpop.f32.mrb[55].mxu0 }
 0x320   :  { %v3229_v62 = vld [vmem:[%s7207_s3 + $0xd0] sm:$0xff] }
 0x373   :  { %v2138_v34 = vpop.f32.mrb[20].mxu1 }
 0x374   :  { %v5048_v5 = vadd.f32 %v2138_v34, %v1110_v29  ;;  %v4428_v19 = vpop.f32.mrb[21].mxu1  ;;  %v3230_v34 = vld [vmem:[%s7207_s3 + $0xd8] sm:$0xff] }
 0x376   :  { %2287 = vst [vmem:[#allocation3] sm:$0xff] %v5048_v5 }
 0x377   :  { %v2143_v9 = vpop.f32.mrb[22].mxu1 }
 0x378   :  { %v5049_v26 = vadd.f32 %v2143_v9, %v1115_v63  ;;  %v4431_v53 = vpop.f32.mrb[23].mxu1  ;;  %v3219_v63 = vld [vmem:[%s7207_s3 + $0x80] sm:$0xff] }
 0x379   :  { %v4913_v3 = vpack.c.bf16 %v3220_v1, %v3219_v63  ;;  %v3232_v53 = vld [vmem:[%s7207_s3 + $0xe8] sm:$0xff] }
 0x37a   :  { %2288 = vst [vmem:[#allocation3 + $0x8] sm:$0xff] %v5049_v26  ;;  %v3231_v26 = vld [vmem:[%s7207_s3 + $0xe0] sm:$0xff] }
 0x37b   :  { %v2148_v39 = vpop.f32.mrb[24].mxu1  ;;  %4914 = vmatpush3.bf16.msra.mxu0 %v4913_v3 }
 0x37c   :  { %v5050_v22 = vadd.f32 %v2148_v39, %v1120_v10  ;;  %v4434_v33 = vpop.f32.mrb[25].mxu1  ;;  %v3221_v10 = vld [vmem:[%s7207_s3 + $0x90] sm:$0xff]  ;;  %4915 = vmatprep.subr.bf16.mxu0 %v5398_v37 }
 0x37e   :  { %2289 = vst [vmem:[#allocation3 + $0x10] sm:$0xff] %v5050_v22 }
 0x37f   :  { %v2153_v36 = vpop.f32.mrb[26].mxu1 }
 0x380   :  { %v5051_v52 = vadd.f32 %v2153_v36, %v1125_v20  ;;  %v4437_v59 = vpop.f32.mrb[27].mxu1  ;;  %v3222_v20 = vld [vmem:[%s7207_s3 + $0x98] sm:$0xff]  ;;  %v3233_v36 = vld [vmem:[%s7207_s3 + $0xf0] sm:$0xff] }
 0x382   :  { %2290 = vst [vmem:[#allocation3 + $0x18] sm:$0xff] %v5051_v52  ;;  %v3234_v52 = vld [vmem:[%s7207_s3 + $0xf8] sm:$0xff] }
 0x383   :  { %v2158_v27 = vpop.f32.mrb[28].mxu1 }
 0x384   :  { %v5052_v57 = vadd.f32 %v2158_v27, %v1130_v16  ;;  %v4440_v58 = vpop.f32.mrb[29].mxu1  ;;  %v4916_v16 = vpack.c.bf16 %v3222_v20, %v3221_v10 }
 0x386   :  { %2291 = vst [vmem:[#allocation3 + $0x20] sm:$0xff] %v5052_v57  ;;  %4917 = vmatpush3.bf16.msra.mxu0 %v4916_v16  ;;  %v4934_v57 = vpack.c.bf16 %v3234_v52, %v3233_v36 }
 0x387   :  { %v2163_v49 = vpop.f32.mrb[30].mxu1  ;;  %4918 = vmatprep.subr.bf16.mxu0 %v5398_v37 }
 0x388   :  { %v5053_v29 = vadd.f32 %v2163_v49, %v1135_v48  ;;  %v4443_v40 = vpop.f32.mrb[31].mxu1 }
 0x38a   :  { %2292 = vst [vmem:[#allocation3 + $0x28] sm:$0xff] %v5053_v29  ;;  %4920 = vmatpush3.bf16.msra.mxu0 %v4919_v45 }
 0x38b   :  { %v2168_v47 = vpop.f32.mrb[32].mxu1  ;;  %4921 = vmatprep.subr.bf16.mxu0 %v5398_v37 }
 0x38c   :  { %v5054_v28 = vadd.f32 %v2168_v47, %v1140_v60  ;;  %v4446_v18 = vpop.f32.mrb[33].mxu1  ;;  %v3225_v60 = vld [vmem:[%s7207_s3 + $0xb0] sm:$0xff] }
 0x38d   :  { %v4922_v46 = vpack.c.bf16 %v3226_v2, %v3225_v60 }
 0x38e   :  { %2293 = vst [vmem:[#allocation3 + $0x30] sm:$0xff] %v5054_v28 }
 0x38f   :  { %v2173_v48 = vpop.f32.mrb[34].mxu1  ;;  %4923 = vmatpush3.bf16.msra.mxu0 %v4922_v46  ;;  %v6851_v46 = vld [vmem:[#allocation3] ss:$5 sm:$0xff] }
 0x390   :  { %v5055_v54 = vadd.f32 %v2173_v48, %v1145_v8  ;;  %v4449_v11 = vpop.f32.mrb[35].mxu1  ;;  %v3227_v8 = vld [vmem:[%s7207_s3 + $0xc0] sm:$0xff]  ;;  %4924 = vmatprep.subr.bf16.mxu0 %v5398_v37 }
 0x392   :  { %2294 = vst [vmem:[#allocation3 + $0x38] sm:$0xff] %v5055_v54 }
 0x393   :  { %v2178_v30 = vpop.f32.mrb[36].mxu1 }
 0x394   :  { %v5056_v43 = vadd.f32 %v2178_v30, %v1150_v14  ;;  %v4452_v21 = vpop.f32.mrb[37].mxu1  ;;  %v4925_v14 = vpack.c.bf16 %v3228_v61, %v3227_v8 }
 0x396   :  { %2295 = vst [vmem:[#allocation3 + $0x40] sm:$0xff] %v5056_v43  ;;  %4926 = vmatpush3.bf16.msra.mxu0 %v4925_v14 }
 0x397   :  { %v2183_v4 = vpop.f32.mrb[38].mxu1  ;;  %4927 = vmatprep.subr.bf16.mxu0 %v5398_v37 }
 0x398   :  { %v5057_v15 = vadd.f32 %v2183_v4, %v6768_v13  ;;  %v4455_v24 = vpop.f32.mrb[39].mxu1  ;;  %v4928_v13 = vpack.c.bf16 %v3230_v34, %v3229_v62 }
 0x39a   :  { %2296 = vst [vmem:[#allocation3 + $0x48] sm:$0xff] %v5057_v15  ;;  %4929 = vmatpush3.bf16.msra.mxu0 %v4928_v13 }
 0x39b   :  { %v2188_v5 = vpop.f32.mrb[40].mxu1  ;;  %4930 = vmatprep.subr.bf16.mxu0 %v5398_v37 }
 0x39c   :  { %v5058_v19 = vadd.f32 %v2188_v5, %v6770_v44  ;;  %v4458_v9 = vpop.f32.mrb[41].mxu1  ;;  %v4931_v44 = vpack.c.bf16 %v3232_v53, %v3231_v26 }
 0x39e   :  { %2297 = vst [vmem:[#allocation3 + $0x50] sm:$0xff] %v5058_v19  ;;  %4932 = vmatpush3.bf16.msra.mxu0 %v4931_v44 }
 0x39f   :  { %v2193_v39 = vpop.f32.mrb[42].mxu1  ;;  %4933 = vmatprep.subr.bf16.mxu0 %v5398_v37 }
 0x3a0   :  { %v5059_v22 = vadd.f32 %v2193_v39, %v6772_v56  ;;  %v4461_v33 = vpop.f32.mrb[43].mxu1 }
 0x3a1   :  { %v6848_v43 = vld [vmem:[#allocation3 + $0x28] ss:$5 sm:$0xff] }
 0x3a2   :  { %2298 = vst [vmem:[#allocation3 + $0x58] sm:$0xff] %v5059_v22  ;;  %4935 = vmatpush3.bf16.msra.mxu0 %v4934_v57  ;;  %v2325_v24 = vadd.f32 %v6848_v43, %v6851_v46 }
 0x3a3   :  { %v2198_v59 = vpop.f32.mrb[44].mxu1  ;;  %4936 = vmatprep.subr.bf16.mxu0 %v5398_v37 }
 0x3a4   :  { %v4464_v27 = vpop.f32.mrb[45].mxu1 }
 0x3a7   :  { %v2203_v56 = vpop.f32.mrb[46].mxu1 }
 0x3a8   :  { %v5061_v58 = vadd.f32 %v2203_v56, %v6774_v25  ;;  %v4467_v49 = vpop.f32.mrb[47].mxu1 }
 0x3a9   :  { %v6846_v30 = vld [vmem:[#allocation3 + $0x50] ss:$5 sm:$0xf] }
 0x3aa   :  { %2300 = vst [vmem:[#allocation3 + $0x68] sm:$0xff] %v5061_v58  ;;  %v2327_v61 = vsel %vm2326_vm2, %v6846_v30, 0.0 }
 0x3ab   :  { %v2208_v29 = vpop.f32.mrb[48].mxu1  ;;  %v2328_v34 = vadd.f32 %v2327_v61, %v2325_v24 }
 0x3ac   :  { %v5062_v40 = vadd.f32 %v2208_v29, %v6776_v50  ;;  %v4470_v63 = vpop.f32.mrb[49].mxu1 }
 0x3ad   :  { %v2329_v26 = vrot.slane %v2328_v34, 4 }
 0x3ae   :  { %2301 = vst [vmem:[#allocation3 + $0x70] sm:$0xff] %v5062_v40 }
 0x3af   :  { %v2213_v1 = vpop.f32.mrb[0].mxu1  ;;  %v2330_v22 = vadd.f32 %v2329_v26, %v2328_v34 }
 0x3b0   :  { %v5063_v10 = vadd.f32 %v2213_v1, %v6716_v0  ;;  %v4473_v47 = vpop.f32.mrb[1].mxu1 }
 0x3b1   :  { %v2331_v56 = vrot.slane %v2330_v22, 2 }
 0x3b2   :  { %2302 = vst [vmem:[#allocation3 + $0x78] sm:$0xff] %v5063_v10 }
 0x3b3   :  { %v2218_v3 = vpop.f32.mrb[2].mxu1  ;;  %v2332_v1 = vadd.f32 %v2331_v56, %v2330_v22  ;;  %v2427_v56 = vld [vmem:[%s7207_s3 + $0x10] sm:$0xff] }
 0x3b4   :  { %v5064_v20 = vadd.f32 %v2218_v3, %v6720_v31  ;;  %v4476_v28 = vpop.f32.mrb[3].mxu1 }
 0x3b6   :  { %2303 = vst [vmem:[#allocation3 + $0x80] sm:$0xff] %v5064_v20 }
 0x3b7   :  { %v2223_v25 = vpop.f32.mrb[4].mxu1 }
 0x3b8   :  { %v5065_v18 = vadd.f32 %v2223_v25, %v6724_v55  ;;  %v4479_v16 = vpop.f32.mrb[5].mxu1  ;;  %v2333_v25 = vrot.slane %v2332_v1, 1 }
 0x3ba   :  { %2304 = vst [vmem:[#allocation3 + $0x88] sm:$0xff] %v5065_v18 }
 0x3bb   :  { %v2228_v35 = vpop.f32.mrb[6].mxu1 }
 0x3bc   :  { %v5066_v50 = vadd.f32 %v2228_v35, %v6728_v7  ;;  %v4482_v42 = vpop.f32.mrb[7].mxu1 }
 0x3be   :  { %2305 = vst [vmem:[#allocation3 + $0x90] sm:$0xff] %v5066_v50 }
 0x3bf   :  { %v2233_v48 = vpop.f32.mrb[8].mxu1 }
 0x3c0   :  { %v5067_v0 = vadd.f32 %v2233_v48, %v6732_v17  ;;  %v4485_v54 = vpop.f32.mrb[9].mxu1  ;;  %v2334_v48 = vadd.f32 %v2333_v25, %v2332_v1  ;;  %v2434_v25 = vld [vmem:[%s7207_s3 + $0x48] sm:$0xff] }
 0x3c1   :  { %v2318_v39 = vld [vmem:[#allocation3 + $0x68] ss:$5 sm:$0xff] }
 0x3c2   :  { %2306 = vst [vmem:[#allocation3 + $0x98] sm:$0xff] %v5067_v0  ;;  %v2359_v36 = vmul.f32 %v2318_v39, %v2318_v39 }
 0x3c3   :  { %v2238_v11 = vpop.f32.mrb[10].mxu1 }
 0x3c4   :  { %v5068_v31 = vadd.f32 %v2238_v11, %v6736_v6  ;;  %v4488_v45 = vpop.f32.mrb[11].mxu1  ;;  %v2348_v6 = vmul.f32 %v6846_v30, %v6846_v30 }
 0x3c6   :  { %2307 = vst [vmem:[#allocation3 + $0xa0] sm:$0xff] %v5068_v31  ;;  %v2350_v14 = vsel %vm2326_vm2, %v2348_v6, 0.0 }
 0x3c7   :  { %v2243_v60 = vpop.f32.mrb[12].mxu1 }
 0x3c8   :  { %v5069_v55 = vadd.f32 %v2243_v60, %v6740_v38  ;;  %v4491_v2 = vpop.f32.mrb[13].mxu1  ;;  %v2347_v38 = vmul.f32 %v6848_v43, %v6848_v43 }
 0x3ca   :  { %2308 = vst [vmem:[#allocation3 + $0xa8] sm:$0xff] %v5069_v55 }
 0x3cb   :  { %v2248_v7 = vpop.f32.mrb[14].mxu1 }
 0x3cc   :  { %v5070_v21 = vadd.f32 %v2248_v7, %v6744_v32  ;;  %v4494_v17 = vpop.f32.mrb[15].mxu1  ;;  %v2346_v32 = vmul.f32 %v6851_v46, %v6851_v46 }
 0x3ce   :  { %2309 = vst [vmem:[#allocation3 + $0xb0] sm:$0xff] %v5070_v21  ;;  %v2349_v62 = vadd.f32 %v2347_v38, %v2346_v32  ;;  %v2323_v38 = vld [vmem:[%s7208_s4 + $0x2] sm:$0x1] }
 0x3cf   :  { %v2253_v8 = vpop.f32.mrb[16].mxu1 }
 0x3d0   :  { %v5071_v4 = vadd.f32 %v2253_v8, %v6748_v51  ;;  %v4497_v15 = vpop.f32.mrb[17].mxu1  ;;  %v2351_v13 = vadd.f32 %v2350_v14, %v2349_v62 }
 0x3d2   :  { %2310 = vst [vmem:[#allocation3 + $0xb8] sm:$0xff] %v5071_v4  ;;  %v2352_v53 = vrot.slane %v2351_v13, 4  ;;  %v2324_v4 = vld [vmem:[%s7208_s4 + $0x3] sm:$0x1] }
 0x3d3   :  { %v2258_v5 = vpop.f32.mrb[18].mxu1 }
 0x3d4   :  { %v5072_v19 = vadd.f32 %v2258_v5, %v6752_v41  ;;  %v4500_v9 = vpop.f32.mrb[19].mxu1  ;;  %v2353_v44 = vadd.f32 %v2352_v53, %v2351_v13 }
 0x3d5   :  { %v2320_v51 = vld [vmem:[#allocation3 + $0x90] ss:$5 sm:$0xff] }
 0x3d6   :  { %2311 = vst [vmem:[#allocation3 + $0xc0] sm:$0xff] %v5072_v19  ;;  %v2360_v33 = vmul.f32 %v2320_v51, %v2320_v51  ;;  %v2336_v52 = vadd.f32 %v2320_v51, %v2318_v39  ;;  %v2354_v29 = vrot.slane %v2353_v44, 2 }
 0x3d8   :  { %v2362_v58 = vadd.f32 %v2360_v33, %v2359_v36  ;;  %v2355_v3 = vadd.f32 %v2354_v29, %v2353_v44  ;;  %v2429_v29 = vld [vmem:[%s7207_s3 + $0x20] sm:$0xff] }
 0x3da   :  { %v2356_v35 = vrot.slane %v2355_v3, 1 }
 0x3dc   :  { %v2357_v11 = vadd.f32 %v2356_v35, %v2355_v3  ;;  %v2435_v35 = vld [vmem:[%s7207_s3 + $0x50] sm:$0xff] }
 0x3dd   :  { %v2322_v59 = vld [vmem:[#allocation3 + $0xb8] ss:$5 sm:$0xf] }
 0x3de   :  { %v2337_v27 = vsel %vm2326_vm2, %v2322_v59, 0.0  ;;  %v2361_v57 = vmul.f32 %v2322_v59, %v2322_v59 }
 0x3df   :  { %v2338_v49 = vadd.f32 %v2337_v27, %v2336_v52  ;;  %v2426_v27 = vld [vmem:[%s7207_s3 + $0x8] sm:$0xff] }
 0x3e0   :  { %v2363_v41 = vsel %vm2326_vm2, %v2361_v57, 0.0 }
 0x3e1   :  { %v2339_v40 = vrot.slane %v2338_v49, 4  ;;  %v2364_v63 = vadd.f32 %v2363_v41, %v2362_v58  ;;  %v2428_v58 = vld [vmem:[%s7207_s3 + $0x18] sm:$0xff] }
 0x3e2   :  { %v4940_v41 = vpack.c.bf16 %v2428_v58, %v2427_v56  ;;  %v3257_v58 = vld [vmem:[%s7207_s3 + $0x1b0] sm:$0xff] }
 0x3e3   :  { %v2340_v10 = vadd.f32 %v2339_v40, %v2338_v49  ;;  %v2365_v47 = vrot.slane %v2364_v63, 4  ;;  %v2430_v40 = vld [vmem:[%s7207_s3 + $0x28] sm:$0xff] }
 0x3e4   :  { %v4943_v1 = vpack.c.bf16 %v2430_v40, %v2429_v29  ;;  %v3259_v40 = vld [vmem:[%s7207_s3 + $0x1c0] sm:$0xff] }
 0x3e5   :  { %v2341_v20 = vrot.slane %v2340_v10, 2  ;;  %v2366_v28 = vadd.f32 %v2365_v47, %v2364_v63  ;;  %v2432_v47 = vld [vmem:[%s7207_s3 + $0x38] sm:$0xff] }
 0x3e7   :  { %v2342_v18 = vadd.f32 %v2341_v20, %v2340_v10  ;;  %v2367_v16 = vrot.slane %v2366_v28, 2  ;;  %v2431_v10 = vld [vmem:[%s7207_s3 + $0x30] sm:$0xff] }
 0x3e8   :  { %v4946_v20 = vpack.c.bf16 %v2432_v47, %v2431_v10  ;;  %v3261_v47 = vld [vmem:[%s7207_s3 + $0x1d0] sm:$0xff] }
 0x3e9   :  { %v2343_v50 = vrot.slane %v2342_v18, 1  ;;  %v2368_v42 = vadd.f32 %v2367_v16, %v2366_v28  ;;  %v2433_v28 = vld [vmem:[%s7207_s3 + $0x40] sm:$0xff] }
 0x3ea   :  { %v4949_v16 = vpack.c.bf16 %v2434_v25, %v2433_v28  ;;  %v3263_v25 = vld [vmem:[%s7207_s3 + $0x1e0] sm:$0xff] }
 0x3eb   :  { %v2344_v0 = vadd.f32 %v2343_v50, %v2342_v18  ;;  %v2369_v54 = vrot.slane %v2368_v42, 1  ;;  %v2436_v50 = vld [vmem:[%s7207_s3 + $0x58] sm:$0xff] }
 0x3ed   :  { %v2345_v31 = vadd.f32 %v2344_v0, %v2334_v48  ;;  %v2370_v45 = vadd.f32 %v2369_v54, %v2368_v42  ;;  %v4952_v48 = vpack.c.bf16 %v2436_v50, %v2435_v35  ;;  %v2437_v0 = vld [vmem:[%s7207_s3 + $0x60] sm:$0xff]  ;;  %v2438_v54 = vld [vmem:[%s7207_s3 + $0x68] sm:$0xff]  ;;  %v3265_v35 = vld [vmem:[%s7207_s3 + $0x1f0] sm:$0xff] }
 0x3ee   :  { %v3266_v50 = vld [vmem:[%s7207_s3 + $0x1f8] sm:$0xff] }
 0x3ef   :  { %v2371_v60 = vadd.f32 %v2370_v45, %v2357_v11  ;;  %v2372_v55 = vmul.f32 0.025, %v2345_v31  ;;  %v4955_v11 = vpack.c.bf16 %v2438_v54, %v2437_v0  ;;  %v2439_v31 = vld [vmem:[%s7207_s3 + $0x70] sm:$0xff]  ;;  %v2440_v45 = vld [vmem:[%s7207_s3 + $0x78] sm:$0xff]  ;;  %v3268_v0 = vld [vmem:[%s7207_s3 + $0x208] sm:$0xff] }
 0x3f1   :  { %v2373_v2 = vmul.f32 0.025, %v2371_v60  ;;  %v2374_v7 = vmul.f32 %v2372_v55, %v2372_v55  ;;  %v4958_v60 = vpack.c.bf16 %v2440_v45, %v2439_v31  ;;  %v3270_v31 = vld [vmem:[%s7207_s3 + $0x218] sm:$0xff] }
 0x3f3   :  { %v2375_v21 = vsub.f32 %v2373_v2, %v2374_v7  ;;  %v3236_v2 = vld [vmem:[%s7207_s3 + $0x108] sm:$0xff] }
 0x3f5   :  { %v2376_v17 = vmax.f32 %v2375_v21, 0.0  ;;  %v3237_v21 = vld [vmem:[%s7207_s3 + $0x110] sm:$0xff] }
 0x3f7   :  { %v2377_v6 = vadd.f32 1e-05, %v2376_v17  ;;  %v3238_v17 = vld [vmem:[%s7207_s3 + $0x118] sm:$0xff] }
 0x3f9   :  { %5369 = vrsqrt.f32 %v2377_v6  ;;  %v4964_v6 = vpack.c.bf16 %v3238_v17, %v3237_v21  ;;  %v3273_v17 = vld [vmem:[%s7207_s3 + $0x230] sm:$0xff] }
 0x403   :  { %v5370_v8 = vpop.eup %5369 }
 0x404   :  { %v2379_v61 = vmul.f32 %v5370_v8, %v2323_v38  ;;  %v3239_v38 = vld [vmem:[%s7207_s3 + $0x120] sm:$0xff]  ;;  %v3240_v8 = vld [vmem:[%s7207_s3 + $0x128] sm:$0xff] }
 0x406   :  { %v2380_v15 = vmul.f32 %v2379_v61, %v2372_v55  ;;  %v2385_v32 = vrot.slane %v2379_v61, %v5820_v23  ;;  %v3235_v55 = vld [vmem:[%s7207_s3 + $0x100] sm:$0xff]  ;;  %v4967_v61 = vpack.c.bf16 %v3240_v8, %v3239_v38 }
 0x407   :  { %v4961_v7 = vpack.c.bf16 %v3236_v2, %v3235_v55  ;;  %v3271_v55 = vld [vmem:[%s7207_s3 + $0x220] sm:$0xff]  ;;  %v3272_v2 = vld [vmem:[%s7207_s3 + $0x228] sm:$0xff] }
 0x408   :  { %v2381_v24 = vsub.f32 %v2324_v4, %v2380_v15  ;;  %v2386_v14 = vmul.f32 %v2385_v32, %v6851_v46  ;;  %v2387_v34 = vmul.f32 %v2385_v32, %v6848_v43  ;;  %v2388_v5 = vmul.f32 %v2385_v32, %v6846_v30  ;;  %v3241_v4 = vld [vmem:[%s7207_s3 + $0x130] sm:$0xff]  ;;  %v3242_v15 = vld [vmem:[%s7207_s3 + $0x138] sm:$0xff] }
 0x409   :  { %v2399_v19 = vmul.f32 %v2385_v32, %v2318_v39  ;;  %v2401_v9 = vmul.f32 %v2385_v32, %v2322_v59  ;;  %v2400_v13 = vmul.f32 %v2385_v32, %v2320_v51  ;;  %v2425_v59 = vld [vmem:[%s7207_s3] sm:$0xff]  ;;  %v5015_v21 = vpack.c.bf16 %v3272_v2, %v3271_v55 }
 0x40a   :  { %v2392_v62 = vrot.slane %v2381_v24, %v5820_v23  ;;  %v4937_v57 = vpack.c.bf16 %v2426_v27, %v2425_v59  ;;  %v4970_v24 = vpack.c.bf16 %v3242_v15, %v3241_v4  ;;  %v3255_v59 = vld [vmem:[%s7207_s3 + $0x1a0] sm:$0xff]  ;;  %v3256_v27 = vld [vmem:[%s7207_s3 + $0x1a8] sm:$0xff] }
 0x40b   :  { %v4991_v56 = vpack.c.bf16 %v3256_v27, %v3255_v59  ;;  %v3276_v4 = vld [vmem:[%s7207_s3 + $0x248] sm:$0xff] }
 0x40c   :  { %v6879_v26 = vadd.f32 %v2392_v62, %v2386_v14  ;;  %v6881_v53 = vadd.f32 %v2392_v62, %v2387_v34  ;;  %v2395_v22 = vadd.f32 %v2392_v62, %v2388_v5  ;;  %v6883_v33 = vadd.f32 %v2399_v19, %v2392_v62  ;;  %v3243_v14 = vld [vmem:[%s7207_s3 + $0x140] sm:$0xff]  ;;  %v3245_v5 = vld [vmem:[%s7207_s3 + $0x150] sm:$0xff]  ;;  %v3246_v19 = vld [vmem:[%s7207_s3 + $0x158] sm:$0xff] }
 0x40d   :  { %v6885_v44 = vadd.f32 %v2400_v13, %v2392_v62  ;;  %v2404_v36 = vadd.f32 %v2401_v9, %v2392_v62  ;;  %v3244_v62 = vld [vmem:[%s7207_s3 + $0x148] sm:$0xff]  ;;  %v4976_v9 = vpack.c.bf16 %v3246_v19, %v3245_v5  ;;  %v3247_v13 = vld [vmem:[%s7207_s3 + $0x160] sm:$0xff] }
 0x40e   :  { %v2396_v46 = vmax.f32 %v6879_v26, 0.0  ;;  %v2397_v52 = vmax.f32 %v6881_v53, 0.0  ;;  %v2398_v43 = vmax.f32 %v2395_v22, 0.0  ;;  %v2405_v30 = vmax.f32 %v6883_v33, 0.0  ;;  %v3248_v26 = vld [vmem:[%s7207_s3 + $0x168] sm:$0xff]  ;;  %v3249_v22 = vld [vmem:[%s7207_s3 + $0x170] sm:$0xff] }
 0x40f   :  { %v2406_v39 = vmax.f32 %v6885_v44, 0.0  ;;  %v2407_v51 = vmax.f32 %v2404_v36, 0.0  ;;  %v4973_v34 = vpack.c.bf16 %v3244_v62, %v3243_v14  ;;  %v4979_v53 = vpack.c.bf16 %v3248_v26, %v3247_v13  ;;  %v3250_v33 = vld [vmem:[%s7207_s3 + $0x178] sm:$0xff]  ;;  %v3251_v36 = vld [vmem:[%s7207_s3 + $0x180] sm:$0xff]  ;;  %v3280_v19 = vld [vmem:[%s7207_s3 + $0x268] sm:$0xff] }
 0x410   :  { %2414 = vst [vmem:[#allocation4] sm:$0xff] %v2396_v46  ;;  %2415 = vst [vmem:[#allocation4 + $0x8] sm:$0xff] %v2397_v52  ;;  %v4982_v44 = vpack.c.bf16 %v3250_v33, %v3249_v22  ;;  %v3278_v14 = vld [vmem:[%s7207_s3 + $0x258] sm:$0xff]  ;;  %v3279_v5 = vld [vmem:[%s7207_s3 + $0x260] sm:$0xff] }
 0x411   :  { %2416 = vst [vmem:[#allocation4 + $0x10] sm:$0xf] %v2398_v43  ;;  %2417 = vst [vmem:[#allocation4 + $0x18] sm:$0xff] %v2405_v30  ;;  %v3253_v43 = vld [vmem:[%s7207_s3 + $0x190] sm:$0xff]  ;;  %v3282_v26 = vld [vmem:[%s7207_s3 + $0x278] sm:$0xff] }
 0x412   :  { %2418 = vst [vmem:[#allocation4 + $0x20] sm:$0xff] %v2406_v39  ;;  %2419 = vst [vmem:[#allocation4 + $0x28] sm:$0xf] %v2407_v51  ;;  %v3281_v13 = vld [vmem:[%s7207_s3 + $0x270] sm:$0xff] }
 0x417   :  { %v2441_v49 = vld [vmem:[#allocation4 + $0x1] sm:$0xff] }
 0x418   :  { %4534 = vmatmul.mubr.f32.vlgmr.msra.gmra.mrb[76].mxu0 %v2441_v49  ;;  %v2442_v63 = vld [vmem:[#allocation4 + $0x9] sm:$0xff]  ;;  %v2443_v3 = vld [vmem:[#allocation4 + $0x11] sm:$0xff]  ;;  %v3258_v49 = vld [vmem:[%s7207_s3 + $0x1b8] sm:$0xff] }
 0x419   :  { %4938 = vmatpush3.bf16.msra.mxu0 %v4937_v57  ;;  %4536 = vmatprep.mubr.msk.f32.mxu0 %vm5399_vm1, %v6319_v12  ;;  %v2444_v18 = vld [vmem:[#allocation4 + $0x19] sm:$0xff]  ;;  %v2445_v42 = vld [vmem:[#allocation4 + $0x21] sm:$0xff]  ;;  %v2422_v32 = vld [vmem:[#allocation4 + $0x10] sm:$0xff]  ;;  %v4994_v29 = vpack.c.bf16 %v3258_v49, %v3257_v58 }
 0x41a   :  { %4939 = vmatprep.subr.bf16.mxu0 %v5398_v37  ;;  %v2644_v57 = vld [vmem:[#allocation4 + $0xa] sm:$0xff]  ;;  %v2762_v38 = vld [vmem:[#allocation4 + $0x13] sm:$0xff]  ;;  %v2763_v15 = vld [vmem:[#allocation4 + $0x1b] sm:$0xff] }
 0x41b   :  { %v2760_v45 = vld [vmem:[#allocation4 + $0x3] sm:$0xff]  ;;  %v2878_v33 = vld [vmem:[#allocation4 + $0xc] sm:$0xff] }
 0x41c   :  { %4537 = vmatmul.mubr.f32.gmra.mrb[78].mxu0 %v2442_v63  ;;  %v3260_v63 = vld [vmem:[%s7207_s3 + $0x1c8] sm:$0xff]  ;;  %v2764_v62 = vld [vmem:[#allocation4 + $0x23] sm:$0xff] }
 0x41d   :  { %4941 = vmatpush3.bf16.msra.mxu0 %v4940_v41  ;;  %4539 = vmatprep.mubr.msk.f32.mxu0 %vm5399_vm1, %v6319_v12  ;;  %v2645_v41 = vld [vmem:[#allocation4 + $0x12] sm:$0xff]  ;;  %v4997_v10 = vpack.c.bf16 %v3260_v63, %v3259_v40  ;;  %v2877_v22 = vld [vmem:[#allocation4 + $0x4] sm:$0xff] }
 0x41e   :  { %4942 = vmatprep.subr.bf16.mxu0 %v5398_v37 }
 0x420   :  { %4540 = vmatmul.mubr.f32.gmra.mrb[80].mxu0 %v2443_v3  ;;  %v3262_v3 = vld [vmem:[%s7207_s3 + $0x1d8] sm:$0xff] }
 0x421   :  { %4944 = vmatpush3.bf16.msra.mxu0 %v4943_v1  ;;  %4542 = vmatprep.mubr.msk.f32.mxu0 %vm5399_vm1, %v6319_v12  ;;  %v2646_v1 = vld [vmem:[#allocation4 + $0x1a] sm:$0xff]  ;;  %v5000_v28 = vpack.c.bf16 %v3262_v3, %v3261_v47 }
 0x422   :  { %4945 = vmatprep.subr.bf16.mxu0 %v5398_v37 }
 0x424   :  { %4543 = vmatmul.mubr.f32.gmra.mrb[82].mxu0 %v2444_v18  ;;  %v3264_v18 = vld [vmem:[%s7207_s3 + $0x1e8] sm:$0xff] }
 0x425   :  { %4947 = vmatpush3.bf16.msra.mxu0 %v4946_v20  ;;  %4545 = vmatprep.mubr.msk.f32.mxu0 %vm5399_vm1, %v6319_v12  ;;  %v2647_v20 = vld [vmem:[#allocation4 + $0x22] sm:$0xff] }
 0x426   :  { %4948 = vmatprep.subr.bf16.mxu0 %v5398_v37 }
 0x428   :  { %4546 = vmatmul.mubr.f32.gmra.mrb[84].mxu0 %v2445_v42  ;;  %v5006_v42 = vpack.c.bf16 %v3266_v50, %v3265_v35 }
 0x429   :  { %4950 = vmatpush3.bf16.msra.mxu0 %v4949_v16  ;;  %4580 = vmatprep.mubr.msk.f32.mxu0 %vm5399_vm1, %v6319_v12  ;;  %v5003_v16 = vpack.c.bf16 %v3264_v18, %v3263_v25 }
 0x42a   :  { %4951 = vmatprep.subr.bf16.mxu0 %v5398_v37 }
 0x42d   :  { %4953 = vmatpush3.bf16.msra.mxu0 %v4952_v48  ;;  %v3267_v48 = vld [vmem:[%s7207_s3 + $0x200] sm:$0xff] }
 0x42e   :  { %4954 = vmatprep.subr.bf16.mxu0 %v5398_v37  ;;  %v5009_v54 = vpack.c.bf16 %v3268_v0, %v3267_v48 }
 0x431   :  { %4956 = vmatpush3.bf16.msra.mxu0 %v4955_v11  ;;  %v3269_v11 = vld [vmem:[%s7207_s3 + $0x210] sm:$0xff] }
 0x432   :  { %4957 = vmatprep.subr.bf16.mxu0 %v5398_v37 }
 0x435   :  { %4959 = vmatpush3.bf16.msra.mxu0 %v4958_v60  ;;  %v5012_v60 = vpack.c.bf16 %v3270_v31, %v3269_v11 }
 0x436   :  { %4960 = vmatprep.subr.bf16.mxu0 %v5398_v37 }
 0x438   :  { %4581 = vmatmul.mubr.f32.vlgmr.msra.gmra.mrb[76].mxu0 %v2396_v46  ;;  %v3252_v46 = vld [vmem:[%s7207_s3 + $0x188] sm:$0xff] }
 0x439   :  { %4962 = vmatpush3.bf16.msra.mxu0 %v4961_v7  ;;  %4583 = vmatprep.mubr.msk.f32.mxu0 %vm5399_vm1, %v6319_v12  ;;  %v2761_v7 = vld [vmem:[#allocation4 + $0xb] sm:$0xff] }
 0x43a   :  { %4963 = vmatprep.subr.bf16.mxu0 %v5398_v37 }
 0x43c   :  { %4584 = vmatmul.mubr.f32.gmra.mrb[78].mxu0 %v2397_v52  ;;  %v4985_v52 = vpack.c.bf16 %v3252_v46, %v3251_v36  ;;  %v2880_v36 = vld [vmem:[#allocation4 + $0x1c] sm:$0xff] }
 0x43d   :  { %4965 = vmatpush3.bf16.msra.mxu0 %v4964_v6  ;;  %4586 = vmatprep.mubr.msk.f32.mxu0 %vm5399_vm1, %v6319_v12  ;;  %v3274_v6 = vld [vmem:[%s7207_s3 + $0x238] sm:$0xff] }
 0x43e   :  { %4966 = vmatprep.subr.bf16.mxu0 %v5398_v37  ;;  %v5018_v8 = vpack.c.bf16 %v3274_v6, %v3273_v17 }
 0x440   :  { %4587 = vmatmul.mubr.f32.gmra.mrb[80].mxu0 %v2422_v32 }
 0x441   :  { %4968 = vmatpush3.bf16.msra.mxu0 %v4967_v61  ;;  %4589 = vmatprep.mubr.msk.f32.mxu0 %vm5399_vm1, %v6319_v12  ;;  %v3275_v61 = vld [vmem:[%s7207_s3 + $0x240] sm:$0xff] }
 0x442   :  { %4969 = vmatprep.subr.bf16.mxu0 %v5398_v37  ;;  %v5021_v32 = vpack.c.bf16 %v3276_v4, %v3275_v61 }
 0x444   :  { %4590 = vmatmul.mubr.f32.gmra.mrb[82].mxu0 %v2405_v30  ;;  %v3254_v30 = vld [vmem:[%s7207_s3 + $0x198] sm:$0xff] }
 0x445   :  { %4971 = vmatpush3.bf16.msra.mxu0 %v4970_v24  ;;  %4592 = vmatprep.mubr.msk.f32.mxu0 %vm5399_vm1, %v6319_v12  ;;  %v4988_v51 = vpack.c.bf16 %v3254_v30, %v3253_v43  ;;  %v3277_v24 = vld [vmem:[%s7207_s3 + $0x250] sm:$0xff] }
 0x446   :  { %4972 = vmatprep.subr.bf16.mxu0 %v5398_v37 }
 0x448   :  { %4593 = vmatmul.mubr.f32.gmra.mrb[84].mxu0 %v2406_v39  ;;  %v2643_v39 = vld [vmem:[#allocation4 + $0x2] sm:$0xff] }
 0x449   :  { %4974 = vmatpush3.bf16.msra.mxu0 %v4973_v34  ;;  %4627 = vmatprep.mubr.msk.f32.mxu0 %vm5399_vm1, %v6319_v12  ;;  %v5024_v34 = vpack.c.bf16 %v3278_v14, %v3277_v24 }
 0x44a   :  { %4975 = vmatprep.subr.bf16.mxu0 %v5398_v37 }
 0x44d   :  { %4977 = vmatpush3.bf16.msra.mxu0 %v4976_v9  ;;  %v5027_v9 = vpack.c.bf16 %v3280_v19, %v3279_v5  ;;  %v3003_v19 = vld [vmem:[%s7208_s4 + $0x5] sm:$0x1] }
 0x44e   :  { %4978 = vmatprep.subr.bf16.mxu0 %v5398_v37 }
 0x451   :  { %4980 = vmatpush3.bf16.msra.mxu0 %v4979_v53  ;;  %v5030_v53 = vpack.c.bf16 %v3282_v26, %v3281_v13 }
 0x452   :  { %4981 = vmatprep.subr.bf16.mxu0 %v5398_v37 }
 0x455   :  { %4983 = vmatpush3.bf16.msra.mxu0 %v4982_v44  ;;  %v2879_v44 = vld [vmem:[#allocation4 + $0x14] sm:$0xff] }
 0x456   :  { %4984 = vmatprep.subr.bf16.mxu0 %v5398_v37 }
 0x458   :  { %4628 = vmatmul.mubr.f32.vlgmr.msra.gmra.mrb[76].mxu0 %v2643_v39 }
 0x459   :  { %4986 = vmatpush3.bf16.msra.mxu0 %v4985_v52  ;;  %4630 = vmatprep.mubr.msk.f32.mxu0 %vm5399_vm1, %v6319_v12 }
 0x45a   :  { %4987 = vmatprep.subr.bf16.mxu0 %v5398_v37 }
 0x45c   :  { %4631 = vmatmul.mubr.f32.gmra.mrb[78].mxu0 %v2644_v57 }
 0x45d   :  { %4989 = vmatpush3.bf16.msra.mxu0 %v4988_v51  ;;  %4633 = vmatprep.mubr.msk.f32.mxu0 %vm5399_vm1, %v6319_v12 }
 0x45e   :  { %4990 = vmatprep.subr.bf16.mxu0 %v5398_v37 }
 0x460   :  { %4634 = vmatmul.mubr.f32.gmra.mrb[80].mxu0 %v2645_v41 }
 0x461   :  { %4992 = vmatpush3.bf16.msra.mxu0 %v4991_v56  ;;  %4636 = vmatprep.mubr.msk.f32.mxu0 %vm5399_vm1, %v6319_v12 }
 0x462   :  { %4993 = vmatprep.subr.bf16.mxu0 %v5398_v37 }
 0x464   :  { %4637 = vmatmul.mubr.f32.gmra.mrb[82].mxu0 %v2646_v1 }
 0x465   :  { %4995 = vmatpush3.bf16.msra.mxu0 %v4994_v29  ;;  %4639 = vmatprep.mubr.msk.f32.mxu0 %vm5399_vm1, %v6319_v12 }
 0x466   :  { %4996 = vmatprep.subr.bf16.mxu0 %v5398_v37 }
 0x468   :  { %4640 = vmatmul.mubr.f32.gmra.mrb[84].mxu0 %v2647_v20 }
 0x469   :  { %4998 = vmatpush3.bf16.msra.mxu0 %v4997_v10  ;;  %4674 = vmatprep.mubr.msk.f32.mxu0 %vm5399_vm1, %v6319_v12 }
 0x46a   :  { %4999 = vmatprep.subr.bf16.mxu0 %v5398_v37 }
 0x46d   :  { %5001 = vmatpush3.bf16.msra.mxu0 %v5000_v28 }
 0x46e   :  { %5002 = vmatprep.subr.bf16.mxu0 %v5398_v37 }
 0x471   :  { %5004 = vmatpush3.bf16.msra.mxu0 %v5003_v16 }
 0x472   :  { %5005 = vmatprep.subr.bf16.mxu0 %v5398_v37 }
 0x475   :  { %5007 = vmatpush3.bf16.msra.mxu0 %v5006_v42 }
 0x476   :  { %5008 = vmatprep.subr.bf16.mxu0 %v5398_v37 }
 0x478   :  { %4675 = vmatmul.mubr.f32.vlgmr.msra.gmra.mrb[76].mxu0 %v2760_v45 }
 0x479   :  { %5010 = vmatpush3.bf16.msra.mxu0 %v5009_v54  ;;  %4677 = vmatprep.mubr.msk.f32.mxu0 %vm5399_vm1, %v6319_v12 }
 0x47a   :  { %5011 = vmatprep.subr.bf16.mxu0 %v5398_v37 }
 0x47c   :  { %4678 = vmatmul.mubr.f32.gmra.mrb[78].mxu0 %v2761_v7 }
 0x47d   :  { %5013 = vmatpush3.bf16.msra.mxu0 %v5012_v60  ;;  %4680 = vmatprep.mubr.msk.f32.mxu0 %vm5399_vm1, %v6319_v12 }
 0x47e   :  { %5014 = vmatprep.subr.bf16.mxu0 %v5398_v37 }
 0x480   :  { %4681 = vmatmul.mubr.f32.gmra.mrb[80].mxu0 %v2762_v38 }
 0x481   :  { %5016 = vmatpush3.bf16.msra.mxu0 %v5015_v21  ;;  %4683 = vmatprep.mubr.msk.f32.mxu0 %vm5399_vm1, %v6319_v12 }
 0x482   :  { %5017 = vmatprep.subr.bf16.mxu0 %v5398_v37 }
 0x484   :  { %4684 = vmatmul.mubr.f32.gmra.mrb[82].mxu0 %v2763_v15 }
 0x485   :  { %5019 = vmatpush3.bf16.msra.mxu0 %v5018_v8  ;;  %4686 = vmatprep.mubr.msk.f32.mxu0 %vm5399_vm1, %v6319_v12 }
 0x486   :  { %5020 = vmatprep.subr.bf16.mxu0 %v5398_v37 }
 0x488   :  { %4687 = vmatmul.mubr.f32.gmra.mrb[84].mxu0 %v2764_v62  ;;  %v3002_v62 = vld [vmem:[%s7208_s4 + $0x4] sm:$0x1]  ;;  %s5401_s4 = smov [#allocation6]  }
 0x489   :  { %5022 = vmatpush3.bf16.msra.mxu0 %v5021_v32  ;;  %4721 = vmatprep.mubr.msk.f32.mxu0 %vm5399_vm1, %v6319_v12  ;;  %s3089_s10 = sshll.u32 %s5401_s4, 4  ;;  %s3090_s10 = int_to_ptr.vmem [resolvable:$true] %s3089_s10 }
 0x48a   :  { %5023 = vmatprep.subr.bf16.mxu0 %v5398_v37  ;;  %s5374_s2 = scalar_lea.vmem %s3090_s10, 32  ;;  %p5379_p1 = scmp.lt.s32.totalorder %s3090_s10, %s3090_s10 }
 0x48b   :  { %p5375_p0 = scmp.ne.s32.totalorder %s3090_s10, %s5374_s2  ;;  %p5380_p2 = scmp.lt.s32.totalorder %s5374_s2, %s5374_s2 }
 0x48d   :  { %5025 = vmatpush3.bf16.msra.mxu0 %v5024_v34  ;;  %p5381_p3 = por %p5380_p2, %p5379_p1 }
 0x48e   :  { %5026 = vmatprep.subr.bf16.mxu0 %v5398_v37 }
 0x48f   :  { %p5382_p4 = pnand %p5381_p3, %p5375_p0 }
 0x491   :  { %5028 = vmatpush3.bf16.msra.mxu0 %v5027_v9 }
 0x492   :  { %5029 = vmatprep.subr.bf16.mxu0 %v5398_v37  ;;  %v2881_v37 = vld [vmem:[#allocation4 + $0x24] sm:$0xff] }
 0x495   :  { %5031 = vmatpush3.bf16.msra.mxu0 %v5030_v53 }
 0x498   :  { %4722 = vmatmul.mubr.f32.vlgmr.msra.gmra.mrb[76].mxu0 %v2877_v22 }
 0x499   :  { %4724 = vmatprep.mubr.msk.f32.mxu0 %vm5399_vm1, %v6319_v12 }
 0x49c   :  { %4725 = vmatmul.mubr.f32.gmra.mrb[78].mxu0 %v2878_v33 }
 0x49d   :  { %4727 = vmatprep.mubr.msk.f32.mxu0 %vm5399_vm1, %v6319_v12 }
 0x4a0   :  { %4728 = vmatmul.mubr.f32.gmra.mrb[80].mxu0 %v2879_v44 }
 0x4a1   :  { %4730 = vmatprep.mubr.msk.f32.mxu0 %vm5399_vm1, %v6319_v12 }
 0x4a4   :  { %4731 = vmatmul.mubr.f32.gmra.mrb[82].mxu0 %v2880_v36 }
 0x4a5   :  { %4733 = vmatprep.mubr.msk.f32.mxu0 %vm5399_vm1, %v6319_v12 }
 0x4a8   :  { %4734 = vmatmul.mubr.f32.gmra.mrb[84].mxu0 %v2881_v37 }
 0x56b   :  { %v2965_v46 = vpop.f32.mrb[76].mxu0 }
 0x56c   :  { %2994 = vst [vmem:[#allocation5] sm:$0xff] %v2965_v46  ;;  %v4723_v52 = vpop.f32.mrb[77].mxu0 }
 0x56f   :  { %v2970_v43 = vpop.f32.mrb[78].mxu0 }
 0x570   :  { %2995 = vst [vmem:[#allocation5 + $0x8] sm:$0xff] %v2970_v43  ;;  %v4726_v30 = vpop.f32.mrb[79].mxu0 }
 0x573   :  { %v2975_v39 = vpop.f32.mrb[80].mxu0 }
 0x574   :  { %v4729_v51 = vpop.f32.mrb[81].mxu0 }
 0x577   :  { %v2980_v59 = vpop.f32.mrb[82].mxu0  ;;  %v2999_v27 = vld [vmem:[#allocation5] ss:$3 sm:$0x3f] }
 0x578   :  { %2997 = vst [vmem:[#allocation5 + $0x18] sm:$0xff] %v2980_v59  ;;  %v4732_v57 = vpop.f32.mrb[83].mxu0  ;;  %v3005_v56 = vsel %vm3004_vm3, %v2999_v27, 0.0  ;;  %v3021_v58 = vmul.f32 %v2999_v27, %v2999_v27 }
 0x579   :  { %v3006_v41 = vrot.slane %v3005_v56, 4 }
 0x57a   :  { %v3022_v12 = vsel %vm3004_vm3, %v3021_v58, 0.0 }
 0x57b   :  { %v2985_v49 = vpop.f32.mrb[84].mxu0  ;;  %v3023_v40 = vrot.slane %v3022_v12, 4  ;;  %v3007_v63 = vadd.f32 %v3006_v41, %v3005_v56 }
 0x57c   :  { %2998 = vst [vmem:[#allocation5 + $0x20] sm:$0xff] %v2985_v49  ;;  %v4735_v29 = vpop.f32.mrb[85].mxu0 }
 0x57d   :  { %v3024_v1 = vadd.f32 %v3023_v40, %v3022_v12  ;;  %v3008_v47 = vrot.slane %v3007_v63, 2 }
 0x57f   :  { %v3025_v25 = vrot.slane %v3024_v1, 2  ;;  %v3009_v16 = vadd.f32 %v3008_v47, %v3007_v63 }
 0x581   :  { %v3026_v48 = vadd.f32 %v3025_v25, %v3024_v1  ;;  %v3010_v54 = vrot.slane %v3009_v16, 1 }
 0x583   :  { %v3001_v10 = vld [vmem:[#allocation5 + $0x18] ss:$3 sm:$0x3f]  ;;  %v3027_v60 = vrot.slane %v3026_v48, 1  ;;  %v3011_v2 = vadd.f32 %v3010_v54, %v3009_v16 }
 0x584   :  { %v3013_v3 = vsel %vm3004_vm3, %v3001_v10, 0.0  ;;  %v3030_v20 = vmul.f32 %v3001_v10, %v3001_v10 }
 0x585   :  { %v3014_v28 = vrot.slane %v3013_v3, 4  ;;  %v3028_v6 = vadd.f32 %v3027_v60, %v3026_v48 }
 0x586   :  { %v3031_v18 = vsel %vm3004_vm3, %v3030_v20, 0.0 }
 0x587   :  { %v3015_v35 = vadd.f32 %v3014_v28, %v3013_v3  ;;  %v3032_v50 = vrot.slane %v3031_v18, 4 }
 0x589   :  { %v3016_v42 = vrot.slane %v3015_v35, 2  ;;  %v3033_v0 = vadd.f32 %v3032_v50, %v3031_v18 }
 0x58b   :  { %v3017_v11 = vadd.f32 %v3016_v42, %v3015_v35  ;;  %v3034_v31 = vrot.slane %v3033_v0, 2 }
 0x58d   :  { %v3018_v45 = vrot.slane %v3017_v11, 1  ;;  %v3035_v55 = vadd.f32 %v3034_v31, %v3033_v0 }
 0x58f   :  { %v3019_v7 = vadd.f32 %v3018_v45, %v3017_v11  ;;  %v3036_v21 = vrot.slane %v3035_v55, 1 }
 0x591   :  { %v3020_v17 = vadd.f32 %v3019_v7, %v3011_v2  ;;  %v3037_v38 = vadd.f32 %v3036_v21, %v3035_v55 }
 0x593   :  { %v3038_v8 = vadd.f32 %v3037_v38, %v3028_v6  ;;  %v3039_v61 = vmul.f32 0.083333336, %v3020_v17 }
 0x595   :  { %v3040_v4 = vmul.f32 0.083333336, %v3038_v8  ;;  %v3041_v15 = vmul.f32 %v3039_v61, %v3039_v61 }
 0x597   :  { %v3042_v32 = vsub.f32 %v3040_v4, %v3041_v15 }
 0x599   :  { %v3043_v24 = vmax.f32 %v3042_v32, 0.0 }
 0x59b   :  { %v3044_v14 = vadd.f32 1e-05, %v3043_v24 }
 0x59d   :  { %5371 = vrsqrt.f32 %v3044_v14 }
 0x5a7   :  { %v5372_v34 = vpop.eup %5371 }
 0x5a8   :  { %v3046_v5 = vmul.f32 %v5372_v34, %v3002_v62 }
 0x5aa   :  { %v3047_v9 = vmul.f32 %v3046_v5, %v3039_v61  ;;  %v3052_v13 = vrot.slane %v3046_v5, %v5820_v23 }
 0x5ac   :  { %v3048_v26 = vsub.f32 %v3003_v19, %v3047_v9  ;;  %v3053_v53 = vmul.f32 %v3052_v13, %v2999_v27  ;;  %v3060_v33 = vmul.f32 %v3052_v13, %v3001_v10 }
 0x5ae   :  { %v3057_v22 = vrot.slane %v3048_v26, %v5820_v23 }
 0x5b0   :  { %v3058_v44 = vadd.f32 %v3057_v22, %v3053_v53  ;;  %v3061_v36 = vadd.f32 %v3060_v33, %v3057_v22 }
 0x5b2   :  { %v3059_v37 = vmax.f32 %v3058_v44, 0.0  ;;  %v3062_v46 = vmax.f32 %v3061_v36, 0.0 }
 0x5b4   :  { %v3063_v52 = vsel %vm3004_vm3, %v3059_v37, 0.0  ;;  %v3072_v43 = vsel %vm3004_vm3, %v3062_v46, 0.0 }
 0x5b5   :  { %v3064_v30 = vrot.slane %v3063_v52, 4  ;;  %v3073_v39 = vrot.slane %v3072_v43, 4 }
 0x5b7   :  { %v3065_v51 = vadd.f32 %v3064_v30, %v3063_v52  ;;  %v3074_v59 = vadd.f32 %v3073_v39, %v3072_v43 }
 0x5b9   :  { %v3066_v57 = vrot.slane %v3065_v51, 2  ;;  %v3075_v56 = vrot.slane %v3074_v59, 2 }
 0x5bb   :  { %v3067_v58 = vadd.f32 %v3066_v57, %v3065_v51  ;;  %v3076_v12 = vadd.f32 %v3075_v56, %v3074_v59 }
 0x5bd   :  { %v3068_v27 = vrot.slane %v3067_v58, 1  ;;  %v3077_v49 = vrot.slane %v3076_v12, 1 }
 0x5bf   :  { %v3069_v23 = vadd.f32 %v3068_v27, %v3067_v58  ;;  %v3078_v41 = vadd.f32 %v3077_v49, %v3076_v12 }
 0x5c1   :  { %v3071_v29 = vmul.f32 0.16666667, %v3069_v23  ;;  %v3079_v40 = vmul.f32 0.16666667, %v3078_v41 }
 0x5c3   :  { %v3081_v63 = vsel %vm3080_vm4, %v3071_v29, %v3079_v40 }
 0x5c4   :  { %3082 = vst [vmem:[#allocation6] sm:$0x3] %v3081_v63 }
 0x5c5   :  { %5385 = shalt.err (!%p5382_p4)
}
 0x5c6   :  { %s5386_s13 = scalar_lea.hbm %s7209_s5, 32 }
 0x5c7   :  { %p5387_p5 = scmp.ne.s32.totalorder %s7209_s5, %s5386_s13  ;;  %p5390_p6 = scmp.lt.u32.totalorder %s5386_s13, %s7209_s5 }
 0x5c9   :  { %p5392_p7 = pnand %p5390_p6, %p5387_p5 }
 0x5cb   :  { %5395 = shalt.err (!%p5392_p7)
}
 0x5cc   :  { %3092 = dma.vmem_to_hbm [thread:$0]  %s3090_s10, 32, %s7209_s5, [#allocation7]  }
 0x5cd   :  { %5396 = dma.done.wait [#allocation7], 32  }
 0x5ce   :  { %5397 = vsyncadd [#allocation7], 4294967264 }
 0x5cf   :  { %3096 = vsyncpa [#allocation7], 1 }

</bundles_post_ra>
